<compile_context>
chip_gen: v5e
topology: v5e:2x2
jax: 0.10.0
libtpu: 0.0.40
codegen_flags: <defaults>
</compile_context>

<pallas_src>
import functools

import jax
import jax.numpy as jnp
from jax.experimental import pallas as pl
from jax.experimental.pallas import tpu as pltpu

HIDDEN = 128      # ModelParameters.hidden_dim
MAX_TB = 2048     # batch-tile cap; beyond this spilled (128, tb) activations
                  # start costing ld/st slots while EUP(tanh) is already binding


def _softplus(z):
    # PyTorch Softplus(beta=1): log(1 + exp(z)), numerically stable form.
    return jnp.maximum(z, 0.0) + jnp.log1p(jnp.exp(-jnp.abs(z)))


def mlp_kernel(x_ref,
               w1_ref, b1_ref,
               w2_ref, b2_ref,
               w3_ref, b3_ref,
               w4_ref, b4_ref,
               w5_ref, b5_ref,
               o_ref):
    x = x_ref[...]                                      # (1, tb) f32

    # Layer 1: Linear(1, H). K=1 matmul is an outer product -> VPU broadcast.
    h = jnp.tanh(w1_ref[...] * x + b1_ref[...])         # (H, tb) f32

    # Layers 2-4: Linear(H, H). Lane-dense (H,H)@(H,tb) MXU matmuls.
    # Weights may be stored bf16; cast h to match so the MXU sees bf16 inputs
    # (no f32 emulation passes) while accumulation stays f32.
    for w_ref, b_ref in ((w2_ref, b2_ref), (w3_ref, b3_ref), (w4_ref, b4_ref)):
        h = jnp.tanh(
            jnp.dot(w_ref[...], h.astype(w_ref.dtype),
                    preferred_element_type=jnp.float32)
            + b_ref[...])

    # Layer 5: Linear(H, 1). N=1 matmul -> VPU multiply + sublane (XLU) reduce,
    # keeps the output block (1, tb) lane-dense.
    z = jnp.sum(h * w5_ref[...], axis=0, keepdims=True) + b5_ref[...]   # (1, tb)

    o_ref[...] = _softplus(z)                           # lane-dense store


def _round_up(n, m):
    return ((n + m - 1) // m) * m


def _pick_tb(n, max_tb=MAX_TB):
    """Batch tile: multiple of 128, large enough to amortize per-step overhead,
    small enough that (a) n_tiles >= 2 so both v7x TensorCores get work and
    (b) the zero-padded tail stays bounded relative to N."""
    tb = min(max_tb, _round_up(max(1, -(-n // 2)), 128))
    return max(tb, 128)


@functools.partial(
    jax.jit, static_argnames=("tb", "use_bf16", "single_buffer_weights"))
def _forward(x, params, tb, use_bf16, single_buffer_weights):
    N = x.shape[0]
    (w1, b1), (w2, b2), (w3, b3), (w4, b4), (w5, b5) = params
    if use_bf16:
        w2, w3, w4 = (w.astype(jnp.bfloat16) for w in (w2, w3, w4))

    n_tiles = pl.cdiv(N, tb)
    n_pad = n_tiles * tb

    xr = x.reshape(1, N)
    if n_pad != N:
        xr = jnp.pad(xr, ((0, 0), (0, n_pad - N)))

    def _resident_spec(shape):
        # Whole array, same block every grid step -> never refilled. Buffered(1)
        # drops the dead second buffer (weights stay single-buffered in VMEM).
        if single_buffer_weights:
            return pl.BlockSpec(shape, lambda i: (0, 0),
                                pipeline_mode=pl.Buffered(1))
        return pl.BlockSpec(shape, lambda i: (0, 0))

    operands = (xr, w1, b1, w2, b2, w3, b3, w4, b4, w5, b5)
    in_specs = [pl.BlockSpec((1, tb), lambda i: (0, i))] + [
        _resident_spec(a.shape) for a in operands[1:]
    ]
    out_specs = pl.BlockSpec((1, tb), lambda i: (0, i))

    # VMEM budget: resident weights + double-buffered (1, tb) x/out blocks +
    # a few live (HIDDEN, tb) f32 activation copies, with 2x margin. Clamp to
    # [32 MiB, 48 MiB] (v7x physical VMEM is 64 MiB; leave headroom).
    weight_bytes = sum(int(a.size) * a.dtype.itemsize for a in operands[1:])
    act_bytes = 4 * HIDDEN * tb          # one live (HIDDEN, tb) f32 copy
    io_bytes = 2 * 2 * 4 * tb            # x + out, double-buffered, f32
    est = 2 * (weight_bytes + io_bytes + 6 * act_bytes)
    vmem_limit = int(min(48 << 20, max(32 << 20, est)))

    cost = pl.CostEstimate(
        flops=int(n_pad * (3 * 2 * HIDDEN * HIDDEN + 4 * HIDDEN)),
        transcendentals=int(n_pad * (4 * HIDDEN + 2)),
        bytes_accessed=int(2 * 4 * n_pad + weight_bytes),
    )

    out = pl.pallas_call(
        mlp_kernel,
        out_shape=jax.ShapeDtypeStruct((1, n_pad), jnp.float32),
        grid_spec=pltpu.PrefetchScalarGridSpec(
            num_scalar_prefetch=0,
            grid=(n_tiles,),
            in_specs=in_specs,
            out_specs=out_specs,
        ),
        compiler_params=pltpu.CompilerParams(
            dimension_semantics=("parallel",),
            vmem_limit_bytes=vmem_limit),
        cost_estimate=cost,
    )(*operands)

    return out[:, :N].reshape(N, 1)


def capital_model_forward(x, params, tb=None, use_bf16=True):
    """CapitalModel.forward: x (N, 1) float32 -> (N, 1) float32."""
    if tb is None:
        tb = _pick_tb(x.shape[0])
    assert tb % 128 == 0, "tb must be a multiple of 128 (lane-dense tiles)"
    try:
        return jax.block_until_ready(_forward(x, params, tb, use_bf16, True))
    except Exception:
        # Fallback for jax versions whose TPU pipeliner rejects pl.Buffered(1)
        # (single-buffered resident weights); default double-buffering instead.
        return jax.block_until_ready(_forward(x, params, tb, use_bf16, False))


def init_params(key, hidden=HIDDEN):
    """Deterministic init mimicking nn.Linear's default U(-1/sqrt(fan_in), +).

    Storage layout (kernel-friendly, lane-dense batch):
      w1:      (hidden, 1)      == PyTorch (out, in) weight of Linear(1, hidden)
      w2..w4:  (hidden, hidden) == PyTorch (out, in) weight of Linear(hidden, hidden)
      w5:      (hidden, 1)      == PyTorch (1, hidden) weight of Linear(hidden, 1),
                                   stored TRANSPOSED (as a column)
      b1..b4:  (hidden, 1);  b5: (1, 1)
    """
    layer_defs = [
        (1,      (hidden, 1),      (hidden, 1)),
        (hidden, (hidden, hidden), (hidden, 1)),
        (hidden, (hidden, hidden), (hidden, 1)),
        (hidden, (hidden, hidden), (hidden, 1)),
        (hidden, (hidden, 1),      (1, 1)),
    ]
    params = []
    for fan_in, w_shape, b_shape in layer_defs:
        key, kw, kb = jax.random.split(key, 3)
        bound = 1.0 / float(fan_in) ** 0.5
        w = jax.random.uniform(kw, w_shape, jnp.float32, -bound, bound)
        b = jax.random.uniform(kb, b_shape, jnp.float32, -bound, bound)
        params.append((w, b))
    return tuple(params)


def reference_forward(x, params, use_bf16=False):
    """Plain-JAX reference of CapitalModel.forward (row-major math). With
    use_bf16=True it mirrors the kernel's bf16-input / f32-accumulate matmuls
    for layers 2-4 exactly."""
    (w1, b1), (w2, b2), (w3, b3), (w4, b4), (w5, b5) = params
    h = jnp.tanh(x @ w1.T + b1.T)                       # (N, H)
    for w, b in ((w2, b2), (w3, b3), (w4, b4)):
        if use_bf16:
            hw = jnp.dot(h.astype(jnp.bfloat16), w.T.astype(jnp.bfloat16),
                         preferred_element_type=jnp.float32)
        else:
            hw = h @ w.T
        h = jnp.tanh(hw + b.T)
    z = h @ w5 + b5                                     # (N, 1); w5 is (H, 1)
    return _softplus(z)


if __name__ == "__main__":
    key = jax.random.PRNGKey(0)
    key, kx = jax.random.split(key)

    # Batch of capital states k in [k_min, k_max] = [0.4, 4.0]; deliberately
    # NOT a multiple of 128 to exercise the padded-tail path. N=1000 picks
    # tb=512 -> n_tiles=2, so both v7x TensorCores get a tile.
    N = 1000
    x = jax.random.uniform(kx, (N, 1), jnp.float32, 0.4, 4.0)
    params = init_params(key)

    out = capital_model_forward(x, params)              # bf16 matmul path
    out = jax.block_until_ready(out)
    assert out.shape == (N, 1)
    assert bool(jnp.all(jnp.isfinite(out)))

    # Matched-precision reference (same bf16 matmul recipe): tight tolerance.
    ref_bf16 = reference_forward(x, params, use_bf16=True)
    assert jnp.allclose(out, ref_bf16, atol=5e-4, rtol=5e-4), \
        "mismatch vs matched-precision reference"

    # Full-f32 reference: bf16 matmul inputs cost ~1e-3 relative error.
    ref_f32 = reference_forward(x, params, use_bf16=False)
    max_err = float(jnp.max(jnp.abs(out - ref_f32)))
    assert max_err < 2e-2, f"bf16 path deviates from f32 reference: {max_err}"

    # Pure-f32 kernel path must match the f32 reference tightly.
    out_f32 = capital_model_forward(x, params, use_bf16=False)
    assert jnp.allclose(out_f32, ref_f32, atol=1e-4, rtol=1e-4), \
        "mismatch vs f32 reference"

    print("KERNEL_OK")
</pallas_src>

<mosaic_0001>
module attributes {stable_mosaic.version = 11 : i64} {
  func.func @mlp_kernel(%arg0: i32, %arg1: memref<1x512xf32, #tpu.memory_space<vmem>>, %arg2: memref<128x1xf32, #tpu.memory_space<vmem>>, %arg3: memref<128x1xf32, #tpu.memory_space<vmem>>, %arg4: memref<128x128xbf16, #tpu.memory_space<vmem>>, %arg5: memref<128x1xf32, #tpu.memory_space<vmem>>, %arg6: memref<128x128xbf16, #tpu.memory_space<vmem>>, %arg7: memref<128x1xf32, #tpu.memory_space<vmem>>, %arg8: memref<128x128xbf16, #tpu.memory_space<vmem>>, %arg9: memref<128x1xf32, #tpu.memory_space<vmem>>, %arg10: memref<128x1xf32, #tpu.memory_space<vmem>>, %arg11: memref<1x1xf32, #tpu.memory_space<vmem>>, %arg12: memref<1x512xf32, #tpu.memory_space<vmem>>) attributes {dimension_semantics = [#tpu.dimension_semantics<parallel>], iteration_bounds = array<i64: 2>, scalar_prefetch = 0 : i64, scratch_operands = 0 : i64, tpu.core_type = #tpu.core_type<tc>, window_params = [{transform_indices = @transform_0, window_bounds = array<i64: 1, 512>}, {pipeline_mode = #tpu.pipeline_mode<synchronous>, transform_indices = @transform_1, window_bounds = array<i64: 128, 1>}, {pipeline_mode = #tpu.pipeline_mode<synchronous>, transform_indices = @transform_2, window_bounds = array<i64: 128, 1>}, {pipeline_mode = #tpu.pipeline_mode<synchronous>, transform_indices = @transform_3, window_bounds = array<i64: 128, 128>}, {pipeline_mode = #tpu.pipeline_mode<synchronous>, transform_indices = @transform_4, window_bounds = array<i64: 128, 1>}, {pipeline_mode = #tpu.pipeline_mode<synchronous>, transform_indices = @transform_5, window_bounds = array<i64: 128, 128>}, {pipeline_mode = #tpu.pipeline_mode<synchronous>, transform_indices = @transform_6, window_bounds = array<i64: 128, 1>}, {pipeline_mode = #tpu.pipeline_mode<synchronous>, transform_indices = @transform_7, window_bounds = array<i64: 128, 128>}, {pipeline_mode = #tpu.pipeline_mode<synchronous>, transform_indices = @transform_8, window_bounds = array<i64: 128, 1>}, {pipeline_mode = #tpu.pipeline_mode<synchronous>, transform_indices = @transform_9, window_bounds = array<i64: 128, 1>}, {pipeline_mode = #tpu.pipeline_mode<synchronous>, transform_indices = @transform_10, window_bounds = array<i64: 1, 1>}, {transform_indices = @transform_11, window_bounds = array<i64: 1, 512>}]} {
    %c0 = arith.constant 0 : index
    %c0_0 = arith.constant 0 : index
    %0 = vector.load %arg1[%c0, %c0_0] : memref<1x512xf32, #tpu.memory_space<vmem>>, vector<1x512xf32>
    %c0_1 = arith.constant 0 : index
    %c0_2 = arith.constant 0 : index
    %1 = vector.load %arg2[%c0_1, %c0_2] : memref<128x1xf32, #tpu.memory_space<vmem>>, vector<128x1xf32>
    %2 = vector.broadcast %1 : vector<128x1xf32> to vector<128x512xf32>
    %3 = vector.broadcast %0 : vector<1x512xf32> to vector<128x512xf32>
    %4 = arith.mulf %2, %3 : vector<128x512xf32>
    %c0_3 = arith.constant 0 : index
    %c0_4 = arith.constant 0 : index
    %5 = vector.load %arg3[%c0_3, %c0_4] : memref<128x1xf32, #tpu.memory_space<vmem>>, vector<128x1xf32>
    %6 = vector.broadcast %5 : vector<128x1xf32> to vector<128x512xf32>
    %7 = arith.addf %4, %6 : vector<128x512xf32>
    %8 = math.tanh %7 : vector<128x512xf32>
    %c0_5 = arith.constant 0 : index
    %c0_6 = arith.constant 0 : index
    %9 = vector.load %arg4[%c0_5, %c0_6] : memref<128x128xbf16, #tpu.memory_space<vmem>>, vector<128x128xbf16>
    %10 = arith.truncf %8 : vector<128x512xf32> to vector<128x512xbf16>
    %cst = arith.constant dense<0.000000e+00> : vector<128x512xf32>
    %11 = tpu.matmul %9, %10, %cst {dimension_numbers = #tpu.dot_dimension_numbers<[1], [0], [0], [1], [0, 0, 1, 1], [], []>} : vector<128x128xbf16>, vector<128x512xbf16>, vector<128x512xf32> -> vector<128x512xf32>
    %c0_7 = arith.constant 0 : index
    %c0_8 = arith.constant 0 : index
    %12 = vector.load %arg5[%c0_7, %c0_8] : memref<128x1xf32, #tpu.memory_space<vmem>>, vector<128x1xf32>
    %13 = vector.broadcast %12 : vector<128x1xf32> to vector<128x512xf32>
    %14 = arith.addf %11, %13 : vector<128x512xf32>
    %15 = math.tanh %14 : vector<128x512xf32>
    %c0_9 = arith.constant 0 : index
    %c0_10 = arith.constant 0 : index
    %16 = vector.load %arg6[%c0_9, %c0_10] : memref<128x128xbf16, #tpu.memory_space<vmem>>, vector<128x128xbf16>
    %17 = arith.truncf %15 : vector<128x512xf32> to vector<128x512xbf16>
    %cst_11 = arith.constant dense<0.000000e+00> : vector<128x512xf32>
    %18 = tpu.matmul %16, %17, %cst_11 {dimension_numbers = #tpu.dot_dimension_numbers<[1], [0], [0], [1], [0, 0, 1, 1], [], []>} : vector<128x128xbf16>, vector<128x512xbf16>, vector<128x512xf32> -> vector<128x512xf32>
    %c0_12 = arith.constant 0 : index
    %c0_13 = arith.constant 0 : index
    %19 = vector.load %arg7[%c0_12, %c0_13] : memref<128x1xf32, #tpu.memory_space<vmem>>, vector<128x1xf32>
    %20 = vector.broadcast %19 : vector<128x1xf32> to vector<128x512xf32>
    %21 = arith.addf %18, %20 : vector<128x512xf32>
    %22 = math.tanh %21 : vector<128x512xf32>
    %c0_14 = arith.constant 0 : index
    %c0_15 = arith.constant 0 : index
    %23 = vector.load %arg8[%c0_14, %c0_15] : memref<128x128xbf16, #tpu.memory_space<vmem>>, vector<128x128xbf16>
    %24 = arith.truncf %22 : vector<128x512xf32> to vector<128x512xbf16>
    %cst_16 = arith.constant dense<0.000000e+00> : vector<128x512xf32>
    %25 = tpu.matmul %23, %24, %cst_16 {dimension_numbers = #tpu.dot_dimension_numbers<[1], [0], [0], [1], [0, 0, 1, 1], [], []>} : vector<128x128xbf16>, vector<128x512xbf16>, vector<128x512xf32> -> vector<128x512xf32>
    %c0_17 = arith.constant 0 : index
    %c0_18 = arith.constant 0 : index
    %26 = vector.load %arg9[%c0_17, %c0_18] : memref<128x1xf32, #tpu.memory_space<vmem>>, vector<128x1xf32>
    %27 = vector.broadcast %26 : vector<128x1xf32> to vector<128x512xf32>
    %28 = arith.addf %25, %27 : vector<128x512xf32>
    %29 = math.tanh %28 : vector<128x512xf32>
    %c0_19 = arith.constant 0 : index
    %c0_20 = arith.constant 0 : index
    %30 = vector.load %arg10[%c0_19, %c0_20] : memref<128x1xf32, #tpu.memory_space<vmem>>, vector<128x1xf32>
    %31 = vector.broadcast %30 : vector<128x1xf32> to vector<128x512xf32>
    %32 = arith.mulf %29, %31 : vector<128x512xf32>
    %cst_21 = arith.constant dense<0.000000e+00> : vector<512xf32>
    %33 = vector.multi_reduction <add>, %32, %cst_21 [0] : vector<128x512xf32> to vector<512xf32>
    %34 = vector.shape_cast %33 : vector<512xf32> to vector<1x512xf32>
    %c0_22 = arith.constant 0 : index
    %c0_23 = arith.constant 0 : index
    %35 = vector.load %arg11[%c0_22, %c0_23] : memref<1x1xf32, #tpu.memory_space<vmem>>, vector<1x1xf32>
    %36 = vector.broadcast %35 : vector<1x1xf32> to vector<1x512xf32>
    %37 = arith.addf %34, %36 : vector<1x512xf32>
    %cst_24 = arith.constant 0.000000e+00 : f32
    %38 = vector.broadcast %cst_24 : f32 to vector<1x512xf32>
    %39 = arith.maximumf %37, %38 : vector<1x512xf32>
    %40 = math.absf %37 : vector<1x512xf32>
    %cst_25 = arith.constant 0.000000e+00 : f32
    %41 = vector.broadcast %cst_25 : f32 to vector<1x512xf32>
    %42 = arith.subf %41, %40 : vector<1x512xf32>
    %43 = math.exp %42 : vector<1x512xf32>
    %44 = math.log1p %43 : vector<1x512xf32>
    %45 = arith.addf %39, %44 : vector<1x512xf32>
    %c0_26 = arith.constant 0 : index
    %c0_27 = arith.constant 0 : index
    %46 = vector.load %arg12[%c0_26, %c0_27] : memref<1x512xf32, #tpu.memory_space<vmem>>, vector<1x512xf32>
    tpu.vector_store %arg12[%c0_26, %c0_27], %45 {strides = array<i32>} : memref<1x512xf32, #tpu.memory_space<vmem>>, vector<1x512xf32>,
    return
  }
  func.func @transform_0(%arg0: i32) -> (i32, i32) {
    %c0_i32 = arith.constant 0 : i32
    %c0_i32_0 = arith.constant 0 : i32
    return %c0_i32, %arg0 : i32, i32
  }
  func.func @transform_1(%arg0: i32) -> (i32, i32) {
    %c0_i32 = arith.constant 0 : i32
    %c0_i32_0 = arith.constant 0 : i32
    %c0_i32_1 = arith.constant 0 : i32
    return %c0_i32, %c0_i32_0 : i32, i32
  }
  func.func @transform_2(%arg0: i32) -> (i32, i32) {
    %c0_i32 = arith.constant 0 : i32
    %c0_i32_0 = arith.constant 0 : i32
    %c0_i32_1 = arith.constant 0 : i32
    return %c0_i32, %c0_i32_0 : i32, i32
  }
  func.func @transform_3(%arg0: i32) -> (i32, i32) {
    %c0_i32 = arith.constant 0 : i32
    %c0_i32_0 = arith.constant 0 : i32
    %c0_i32_1 = arith.constant 0 : i32
    return %c0_i32, %c0_i32_0 : i32, i32
  }
  func.func @transform_4(%arg0: i32) -> (i32, i32) {
    %c0_i32 = arith.constant 0 : i32
    %c0_i32_0 = arith.constant 0 : i32
    %c0_i32_1 = arith.constant 0 : i32
    return %c0_i32, %c0_i32_0 : i32, i32
  }
  func.func @transform_5(%arg0: i32) -> (i32, i32) {
    %c0_i32 = arith.constant 0 : i32
    %c0_i32_0 = arith.constant 0 : i32
    %c0_i32_1 = arith.constant 0 : i32
    return %c0_i32, %c0_i32_0 : i32, i32
  }
  func.func @transform_6(%arg0: i32) -> (i32, i32) {
    %c0_i32 = arith.constant 0 : i32
    %c0_i32_0 = arith.constant 0 : i32
    %c0_i32_1 = arith.constant 0 : i32
    return %c0_i32, %c0_i32_0 : i32, i32
  }
  func.func @transform_7(%arg0: i32) -> (i32, i32) {
    %c0_i32 = arith.constant 0 : i32
    %c0_i32_0 = arith.constant 0 : i32
    %c0_i32_1 = arith.constant 0 : i32
    return %c0_i32, %c0_i32_0 : i32, i32
  }
  func.func @transform_8(%arg0: i32) -> (i32, i32) {
    %c0_i32 = arith.constant 0 : i32
    %c0_i32_0 = arith.constant 0 : i32
    %c0_i32_1 = arith.constant 0 : i32
    return %c0_i32, %c0_i32_0 : i32, i32
  }
  func.func @transform_9(%arg0: i32) -> (i32, i32) {
    %c0_i32 = arith.constant 0 : i32
    %c0_i32_0 = arith.constant 0 : i32
    %c0_i32_1 = arith.constant 0 : i32
    return %c0_i32, %c0_i32_0 : i32, i32
  }
  func.func @transform_10(%arg0: i32) -> (i32, i32) {
    %c0_i32 = arith.constant 0 : i32
    %c0_i32_0 = arith.constant 0 : i32
    %c0_i32_1 = arith.constant 0 : i32
    return %c0_i32, %c0_i32_0 : i32, i32
  }
  func.func @transform_11(%arg0: i32) -> (i32, i32) {
    %c0_i32 = arith.constant 0 : i32
    %c0_i32_0 = arith.constant 0 : i32
    return %c0_i32, %arg0 : i32, i32
  }
}

module attributes {stable_mosaic.version = 11 : i64} {
  func.func @mlp_kernel(%arg0: i32, %arg1: memref<1x512xf32, #tpu.memory_space<vmem>>, %arg2: memref<128x1xf32, #tpu.memory_space<vmem>>, %arg3: memref<128x1xf32, #tpu.memory_space<vmem>>, %arg4: memref<128x128xbf16, #tpu.memory_space<vmem>>, %arg5: memref<128x1xf32, #tpu.memory_space<vmem>>, %arg6: memref<128x128xbf16, #tpu.memory_space<vmem>>, %arg7: memref<128x1xf32, #tpu.memory_space<vmem>>, %arg8: memref<128x128xbf16, #tpu.memory_space<vmem>>, %arg9: memref<128x1xf32, #tpu.memory_space<vmem>>, %arg10: memref<128x1xf32, #tpu.memory_space<vmem>>, %arg11: memref<1x1xf32, #tpu.memory_space<vmem>>, %arg12: memref<1x512xf32, #tpu.memory_space<vmem>>) attributes {dimension_semantics = [#tpu.dimension_semantics<parallel>], iteration_bounds = array<i64: 2>, scalar_prefetch = 0 : i64, scratch_operands = 0 : i64, tpu.core_type = #tpu.core_type<tc>, window_params = [{transform_indices = @transform_0, window_bounds = array<i64: 1, 512>}, {pipeline_mode = #tpu.pipeline_mode<synchronous>, transform_indices = @transform_1, window_bounds = array<i64: 128, 1>}, {pipeline_mode = #tpu.pipeline_mode<synchronous>, transform_indices = @transform_2, window_bounds = array<i64: 128, 1>}, {pipeline_mode = #tpu.pipeline_mode<synchronous>, transform_indices = @transform_3, window_bounds = array<i64: 128, 128>}, {pipeline_mode = #tpu.pipeline_mode<synchronous>, transform_indices = @transform_4, window_bounds = array<i64: 128, 1>}, {pipeline_mode = #tpu.pipeline_mode<synchronous>, transform_indices = @transform_5, window_bounds = array<i64: 128, 128>}, {pipeline_mode = #tpu.pipeline_mode<synchronous>, transform_indices = @transform_6, window_bounds = array<i64: 128, 1>}, {pipeline_mode = #tpu.pipeline_mode<synchronous>, transform_indices = @transform_7, window_bounds = array<i64: 128, 128>}, {pipeline_mode = #tpu.pipeline_mode<synchronous>, transform_indices = @transform_8, window_bounds = array<i64: 128, 1>}, {pipeline_mode = #tpu.pipeline_mode<synchronous>, transform_indices = @transform_9, window_bounds = array<i64: 128, 1>}, {pipeline_mode = #tpu.pipeline_mode<synchronous>, transform_indices = @transform_10, window_bounds = array<i64: 1, 1>}, {transform_indices = @transform_11, window_bounds = array<i64: 1, 512>}]} {
    %c0 = arith.constant 0 : index
    %c0_0 = arith.constant 0 : index
    %0 = vector.load %arg1[%c0, %c0_0] : memref<1x512xf32, #tpu.memory_space<vmem>>, vector<1x512xf32>
    %c0_1 = arith.constant 0 : index
    %c0_2 = arith.constant 0 : index
    %1 = vector.load %arg2[%c0_1, %c0_2] : memref<128x1xf32, #tpu.memory_space<vmem>>, vector<128x1xf32>
    %2 = vector.broadcast %1 : vector<128x1xf32> to vector<128x512xf32>
    %3 = vector.broadcast %0 : vector<1x512xf32> to vector<128x512xf32>
    %4 = arith.mulf %2, %3 : vector<128x512xf32>
    %c0_3 = arith.constant 0 : index
    %c0_4 = arith.constant 0 : index
    %5 = vector.load %arg3[%c0_3, %c0_4] : memref<128x1xf32, #tpu.memory_space<vmem>>, vector<128x1xf32>
    %6 = vector.broadcast %5 : vector<128x1xf32> to vector<128x512xf32>
    %7 = arith.addf %4, %6 : vector<128x512xf32>
    %8 = math.tanh %7 : vector<128x512xf32>
    %c0_5 = arith.constant 0 : index
    %c0_6 = arith.constant 0 : index
    %9 = vector.load %arg4[%c0_5, %c0_6] : memref<128x128xbf16, #tpu.memory_space<vmem>>, vector<128x128xbf16>
    %10 = arith.truncf %8 : vector<128x512xf32> to vector<128x512xbf16>
    %cst = arith.constant dense<0.000000e+00> : vector<128x512xf32>
    %11 = tpu.matmul %9, %10, %cst {dimension_numbers = #tpu.dot_dimension_numbers<[1], [0], [0], [1], [0, 0, 1, 1], [], []>} : vector<128x128xbf16>, vector<128x512xbf16>, vector<128x512xf32> -> vector<128x512xf32>
    %c0_7 = arith.constant 0 : index
    %c0_8 = arith.constant 0 : index
    %12 = vector.load %arg5[%c0_7, %c0_8] : memref<128x1xf32, #tpu.memory_space<vmem>>, vector<128x1xf32>
    %13 = vector.broadcast %12 : vector<128x1xf32> to vector<128x512xf32>
    %14 = arith.addf %11, %13 : vector<128x512xf32>
    %15 = math.tanh %14 : vector<128x512xf32>
    %c0_9 = arith.constant 0 : index
    %c0_10 = arith.constant 0 : index
    %16 = vector.load %arg6[%c0_9, %c0_10] : memref<128x128xbf16, #tpu.memory_space<vmem>>, vector<128x128xbf16>
    %17 = arith.truncf %15 : vector<128x512xf32> to vector<128x512xbf16>
    %cst_11 = arith.constant dense<0.000000e+00> : vector<128x512xf32>
    %18 = tpu.matmul %16, %17, %cst_11 {dimension_numbers = #tpu.dot_dimension_numbers<[1], [0], [0], [1], [0, 0, 1, 1], [], []>} : vector<128x128xbf16>, vector<128x512xbf16>, vector<128x512xf32> -> vector<128x512xf32>
    %c0_12 = arith.constant 0 : index
    %c0_13 = arith.constant 0 : index
    %19 = vector.load %arg7[%c0_12, %c0_13] : memref<128x1xf32, #tpu.memory_space<vmem>>, vector<128x1xf32>
    %20 = vector.broadcast %19 : vector<128x1xf32> to vector<128x512xf32>
    %21 = arith.addf %18, %20 : vector<128x512xf32>
    %22 = math.tanh %21 : vector<128x512xf32>
    %c0_14 = arith.constant 0 : index
    %c0_15 = arith.constant 0 : index
    %23 = vector.load %arg8[%c0_14, %c0_15] : memref<128x128xbf16, #tpu.memory_space<vmem>>, vector<128x128xbf16>
    %24 = arith.truncf %22 : vector<128x512xf32> to vector<128x512xbf16>
    %cst_16 = arith.constant dense<0.000000e+00> : vector<128x512xf32>
    %25 = tpu.matmul %23, %24, %cst_16 {dimension_numbers = #tpu.dot_dimension_numbers<[1], [0], [0], [1], [0, 0, 1, 1], [], []>} : vector<128x128xbf16>, vector<128x512xbf16>, vector<128x512xf32> -> vector<128x512xf32>
    %c0_17 = arith.constant 0 : index
    %c0_18 = arith.constant 0 : index
    %26 = vector.load %arg9[%c0_17, %c0_18] : memref<128x1xf32, #tpu.memory_space<vmem>>, vector<128x1xf32>
    %27 = vector.broadcast %26 : vector<128x1xf32> to vector<128x512xf32>
    %28 = arith.addf %25, %27 : vector<128x512xf32>
    %29 = math.tanh %28 : vector<128x512xf32>
    %c0_19 = arith.constant 0 : index
    %c0_20 = arith.constant 0 : index
    %30 = vector.load %arg10[%c0_19, %c0_20] : memref<128x1xf32, #tpu.memory_space<vmem>>, vector<128x1xf32>
    %31 = vector.broadcast %30 : vector<128x1xf32> to vector<128x512xf32>
    %32 = arith.mulf %29, %31 : vector<128x512xf32>
    %cst_21 = arith.constant dense<0.000000e+00> : vector<512xf32>
    %33 = vector.multi_reduction <add>, %32, %cst_21 [0] : vector<128x512xf32> to vector<512xf32>
    %34 = vector.shape_cast %33 : vector<512xf32> to vector<1x512xf32>
    %c0_22 = arith.constant 0 : index
    %c0_23 = arith.constant 0 : index
    %35 = vector.load %arg11[%c0_22, %c0_23] : memref<1x1xf32, #tpu.memory_space<vmem>>, vector<1x1xf32>
    %36 = vector.broadcast %35 : vector<1x1xf32> to vector<1x512xf32>
    %37 = arith.addf %34, %36 : vector<1x512xf32>
    %cst_24 = arith.constant 0.000000e+00 : f32
    %38 = vector.broadcast %cst_24 : f32 to vector<1x512xf32>
    %39 = arith.maximumf %37, %38 : vector<1x512xf32>
    %40 = math.absf %37 : vector<1x512xf32>
    %cst_25 = arith.constant 0.000000e+00 : f32
    %41 = vector.broadcast %cst_25 : f32 to vector<1x512xf32>
    %42 = arith.subf %41, %40 : vector<1x512xf32>
    %43 = math.exp %42 : vector<1x512xf32>
    %44 = math.log1p %43 : vector<1x512xf32>
    %45 = arith.addf %39, %44 : vector<1x512xf32>
    %c0_26 = arith.constant 0 : index
    %c0_27 = arith.constant 0 : index
    %46 = vector.load %arg12[%c0_26, %c0_27] : memref<1x512xf32, #tpu.memory_space<vmem>>, vector<1x512xf32>
    tpu.vector_store %arg12[%c0_26, %c0_27], %45 {strides = array<i32>} : memref<1x512xf32, #tpu.memory_space<vmem>>, vector<1x512xf32>,
    return
  }
  func.func @transform_0(%arg0: i32) -> (i32, i32) {
    %c0_i32 = arith.constant 0 : i32
    %c0_i32_0 = arith.constant 0 : i32
    return %c0_i32, %arg0 : i32, i32
  }
  func.func @transform_1(%arg0: i32) -> (i32, i32) {
    %c0_i32 = arith.constant 0 : i32
    %c0_i32_0 = arith.constant 0 : i32
    %c0_i32_1 = arith.constant 0 : i32
    return %c0_i32, %c0_i32_0 : i32, i32
  }
  func.func @transform_2(%arg0: i32) -> (i32, i32) {
    %c0_i32 = arith.constant 0 : i32
    %c0_i32_0 = arith.constant 0 : i32
    %c0_i32_1 = arith.constant 0 : i32
    return %c0_i32, %c0_i32_0 : i32, i32
  }
  func.func @transform_3(%arg0: i32) -> (i32, i32) {
    %c0_i32 = arith.constant 0 : i32
    %c0_i32_0 = arith.constant 0 : i32
    %c0_i32_1 = arith.constant 0 : i32
    return %c0_i32, %c0_i32_0 : i32, i32
  }
  func.func @transform_4(%arg0: i32) -> (i32, i32) {
    %c0_i32 = arith.constant 0 : i32
    %c0_i32_0 = arith.constant 0 : i32
    %c0_i32_1 = arith.constant 0 : i32
    return %c0_i32, %c0_i32_0 : i32, i32
  }
  func.func @transform_5(%arg0: i32) -> (i32, i32) {
    %c0_i32 = arith.constant 0 : i32
    %c0_i32_0 = arith.constant 0 : i32
    %c0_i32_1 = arith.constant 0 : i32
    return %c0_i32, %c0_i32_0 : i32, i32
  }
  func.func @transform_6(%arg0: i32) -> (i32, i32) {
    %c0_i32 = arith.constant 0 : i32
    %c0_i32_0 = arith.constant 0 : i32
    %c0_i32_1 = arith.constant 0 : i32
    return %c0_i32, %c0_i32_0 : i32, i32
  }
  func.func @transform_7(%arg0: i32) -> (i32, i32) {
    %c0_i32 = arith.constant 0 : i32
    %c0_i32_0 = arith.constant 0 : i32
    %c0_i32_1 = arith.constant 0 : i32
    return %c0_i32, %c0_i32_0 : i32, i32
  }
  func.func @transform_8(%arg0: i32) -> (i32, i32) {
    %c0_i32 = arith.constant 0 : i32
    %c0_i32_0 = arith.constant 0 : i32
    %c0_i32_1 = arith.constant 0 : i32
    return %c0_i32, %c0_i32_0 : i32, i32
  }
  func.func @transform_9(%arg0: i32) -> (i32, i32) {
    %c0_i32 = arith.constant 0 : i32
    %c0_i32_0 = arith.constant 0 : i32
    %c0_i32_1 = arith.constant 0 : i32
    return %c0_i32, %c0_i32_0 : i32, i32
  }
  func.func @transform_10(%arg0: i32) -> (i32, i32) {
    %c0_i32 = arith.constant 0 : i32
    %c0_i32_0 = arith.constant 0 : i32
    %c0_i32_1 = arith.constant 0 : i32
    return %c0_i32, %c0_i32_0 : i32, i32
  }
  func.func @transform_11(%arg0: i32) -> (i32, i32) {
    %c0_i32 = arith.constant 0 : i32
    %c0_i32_0 = arith.constant 0 : i32
    return %c0_i32, %arg0 : i32, i32
  }
}

</mosaic_0001>

<bundles_post_ra>
// kernel: _forward.1
= control target key start
LH: loop header
LB: loop body
LE: loop exit
PB: predicated region body
PF: predicated region fallthrough
CT: control target
= control target key end

     0   :  { %s3259_s19 = smov 0   ;;  %s4607_s0 = inlined_call_operand.vmem [shape: f32[1,1024], index: 0, kind: input, shape index: {}]   ;;  %s4608_s1 = inlined_call_operand.vmem [shape: f32[128,1], index: 1, kind: input, shape index: {}]   ;;  %s4609_s2 = inlined_call_operand.vmem [shape: f32[128,1], index: 2, kind: input, shape index: {}]   ;;  %s4610_s3 = inlined_call_operand.vmem [shape: bf16[128,128], index: 3, kind: input, shape index: {}]   ;;  %s4611_s4 = inlined_call_operand.vmem [shape: f32[128,1], index: 4, kind: input, shape index: {}]   ;;  %s4612_s5 = inlined_call_operand.vmem [shape: bf16[128,128], index: 5, kind: input, shape index: {}]   ;;  %s4613_s6 = inlined_call_operand.vmem [shape: f32[128,1], index: 6, kind: input, shape index: {}]   ;;  %s4614_s7 = inlined_call_operand.vmem [shape: bf16[128,128], index: 7, kind: input, shape index: {}]   ;;  %s4615_s8 = inlined_call_operand.vmem [shape: f32[128,1], index: 8, kind: input, shape index: {}]   ;;  %s4616_s9 = inlined_call_operand.vmem [shape: f32[128,1], index: 9, kind: input, shape index: {}]   ;;  %s4617_s10 = inlined_call_operand.<no memory space> [shape: f32[1,1], index: 10, kind: input, shape index: {}]   ;;  %s4618_s11 = inlined_call_operand.vmem [shape: f32[1,1024], index: 11, kind: output, shape index: {}]  }
   0x1   :  { %v16_v0 = vstv %s4617_s10 }
   0x2   :  { %17 = vst [vmem:[#allocation2] sm:$0x1] %v16_v0 }
   0x3 LB: > { %s2518_s20 = sadd.s32 4294967295, %s3193_s19   ;;  %p2522_p0 = scmp.ge.s32.totalorder %s3193_s19, 1  ;;  %s3193_s19 = sphi %s3259_s19, %s23_s19  }
   0x4   : > { %p339_p1 = scmp.lt.s32.totalorder %s3193_s19, 3 }
   0x6   : > { %p340_p2 = pnand %p2522_p0, %p339_p1 }
   0x8   : > { %343 = sbr.rel (%p340_p2) target bundleno = 1130 (0x46a), region = 64 }
   0xd   : > { %v571_v1 = vld [vmem:[%s4609_s2 + $0x70] sm:$0xff]  ;;  %v400_v3 = vld [vmem:[%s4608_s1 + $0x60] sm:$0xff]  ;;  %v3195_v4 = vmov 0   ;;  %v572_v5 = vld [vmem:[%s4609_s2 + $0x78] sm:$0xff]  ;;  %s2523_s26 = sshll.u32 %s2518_s20, 2  ;;  %vm2459_vm2 = vcmask 1040384  }
   0xe   : > { %v402_v2 = vld [vmem:[%s4608_s1 + $0x70] sm:$0xff]  ;;  %2658 = vset.pattern.permute.xlu2 %v3195_v4  ;;  %2657 = vset.pattern.permute.xlu1 %v3195_v4  ;;  %v403_v6 = vld [vmem:[%s4608_s1 + $0x78] sm:$0xff]  ;;  %v401_v7 = vld [vmem:[%s4608_s1 + $0x68] sm:$0xff]  ;;  %p378_p3 = scmp.lt.s32.totalorder %s2523_s26, 7  ;;  %vm2461_vm5 = vcmask 1042434   ;;  %vm2463_vm6 = vcmask 1041408  }
   0xf   : > { %2656 = vset.pattern.permute.xlu0 %v3195_v4  ;;  %645 = vperm.xlu1 %2657, %v571_v1   ;;  %v570_v8 = vld [vmem:[%s4609_s2 + $0x68] sm:$0xff]  ;;  %v569_v9 = vld [vmem:[%s4609_s2 + $0x60] sm:$0xff]  ;;  %v398_v10 = vld [vmem:[%s4608_s1 + $0x50] sm:$0xff] }
  0x10   : > { %476 = vperm.xlu0 %2656, %v402_v2   ;;  %466 = vperm.xlu2 %2658, %v400_v3   ;;  %v567_v11 = vld [vmem:[%s4609_s2 + $0x50] sm:$0xff]  ;;  %v399_v12 = vld [vmem:[%s4608_s1 + $0x58] sm:$0xff]  ;;  %v397_v14 = vld [vmem:[%s4608_s1 + $0x48] sm:$0xff]  ;;  %s4710_s26 = smov (!%p378_p3, %s2523_s26), 7 }
  0x11   : > { %v568_v13 = vld [vmem:[%s4609_s2 + $0x58] sm:$0xff]  ;;  %v565_v15 = vld [vmem:[%s4609_s2 + $0x40] sm:$0xff]  ;;  %v394_v17 = vld [vmem:[%s4608_s1 + $0x30] sm:$0xff]  ;;  %s380_s15 = scalar_lea.vmem %s4607_s0, %s4710_s26  ;;  %s385_s13 = scalar_lea.vmem %s4618_s11, %s4710_s26 }
  0x12   : > { %v396_v16 = vld [vmem:[%s4608_s1 + $0x40] sm:$0xff]  ;;  %v566_v18 = vld [vmem:[%s4609_s2 + $0x48] sm:$0xff]  ;;  %v395_v19 = vld [vmem:[%s4608_s1 + $0x38] sm:$0xff] }
  0x13   : > { %v564_v20 = vld [vmem:[%s4609_s2 + $0x38] sm:$0xff]  ;;  %v563_v21 = vld [vmem:[%s4609_s2 + $0x30] sm:$0xff]  ;;  %v392_v22 = vld [vmem:[%s4608_s1 + $0x20] sm:$0xff] }
  0x14   : > { %v561_v23 = vld [vmem:[%s4609_s2 + $0x20] sm:$0xff]  ;;  %v393_v24 = vld [vmem:[%s4608_s1 + $0x28] sm:$0xff]  ;;  %v391_v26 = vld [vmem:[%s4608_s1 + $0x18] sm:$0xff] }
  0x15   : > { %v562_v25 = vld [vmem:[%s4609_s2 + $0x28] sm:$0xff]  ;;  %v559_v27 = vld [vmem:[%s4609_s2 + $0x10] sm:$0xff]  ;;  %v388_v29 = vld [vmem:[%s4608_s1] sm:$0xff] }
  0x16   : > { %v390_v28 = vld [vmem:[%s4608_s1 + $0x10] sm:$0xff]  ;;  %v560_v30 = vld [vmem:[%s4609_s2 + $0x18] sm:$0xff]  ;;  %v389_v31 = vld [vmem:[%s4608_s1 + $0x8] sm:$0xff] }
  0x17   : > { %650 = vperm.xlu1 %2657, %v572_v5   ;;  %v558_v32 = vld [vmem:[%s4609_s2 + $0x8] sm:$0xff]  ;;  %v557_v33 = vld [vmem:[%s4609_s2] sm:$0xff]  ;;  %v843_v34 = vld [vmem:[%s4611_s4 + $0x70] sm:$0xff] }
  0x18   : > { %481 = vperm.xlu0 %2656, %v403_v6   ;;  %471 = vperm.xlu2 %2658, %v401_v7   ;;  %v841_v35 = vld [vmem:[%s4611_s4 + $0x60] sm:$0xff]  ;;  %v844_v36 = vld [vmem:[%s4611_s4 + $0x78] sm:$0xff]  ;;  %v842_v37 = vld [vmem:[%s4611_s4 + $0x68] sm:$0xff] }
  0x19   : > { %v840_v38 = vld [vmem:[%s4611_s4 + $0x58] sm:$0xff]  ;;  %v839_v39 = vld [vmem:[%s4611_s4 + $0x50] sm:$0xff]  ;;  %v837_v40 = vld [vmem:[%s4611_s4 + $0x40] sm:$0xff] }
  0x1a   : > { %v835_v42 = vld [vmem:[%s4611_s4 + $0x30] sm:$0xff]  ;;  %v838_v43 = vld [vmem:[%s4611_s4 + $0x48] sm:$0xff]  ;;  %v836_v44 = vld [vmem:[%s4611_s4 + $0x38] sm:$0xff] }
  0x1b   : > { %v834_v45 = vld [vmem:[%s4611_s4 + $0x28] sm:$0xff]  ;;  %v387_v46 = vld [vmem:[%s380_s15] sm:$0xf]  ;;  %v831_v49 = vld [vmem:[%s4611_s4 + $0x10] sm:$0xff] }
  0x1c   : > { %v833_v48 = vld [vmem:[%s4611_s4 + $0x20] sm:$0xff]  ;;  %v3412_v50 = vperm.slane %v387_v46, 0  ;;  %v3414_v51 = vperm.slane %v387_v46, 1  ;;  %v3416_v53 = vperm.slane %v387_v46, 2  ;;  %v832_v58 = vld [vmem:[%s4611_s4 + $0x18] sm:$0xff]  ;;  %v830_v59 = vld [vmem:[%s4611_s4 + $0x8] sm:$0xff] }
  0x1d   : > { %v829_v56 = vld [vmem:[%s4611_s4] sm:$0xff]  ;;  %v3430_v61 = vperm.slane %v387_v46, 3 }
  0x1f   : > { %640 = vperm.xlu1 %2657, %v570_v8   ;;  %v1296_v8 = vld [vmem:[%s4613_s6 + $0x78] sm:$0xff] }
  0x20   : > { %635 = vperm.xlu0 %2656, %v569_v9   ;;  %456 = vperm.xlu2 %2658, %v398_v10   ;;  %v1295_v9 = vld [vmem:[%s4613_s6 + $0x70] sm:$0xff]  ;;  %v1293_v10 = vld [vmem:[%s4613_s6 + $0x60] sm:$0xff] }
  0x27   : > { %625 = vperm.xlu1 %2657, %v567_v11  }
  0x28   : > { %461 = vperm.xlu0 %2656, %v399_v12   ;;  %630 = vperm.xlu2 %2658, %v568_v13  }
  0x2f   : > { %451 = vperm.xlu1 %2657, %v397_v14  }
  0x30   : > { %615 = vperm.xlu2 %2658, %v565_v15   ;;  %446 = vperm.xlu0 %2656, %v396_v16  }
  0x37   : > { %436 = vperm.xlu1 %2657, %v394_v17  }
  0x38   : > { %620 = vperm.xlu0 %2656, %v566_v18   ;;  %441 = vperm.xlu2 %2658, %v395_v19  }
  0x3f   : > { %610 = vperm.xlu1 %2657, %v564_v20  }
  0x40   : > { %605 = vperm.xlu0 %2656, %v563_v21   ;;  %426 = vperm.xlu2 %2658, %v392_v22  }
  0x47   : > { %595 = vperm.xlu1 %2657, %v561_v23  }
  0x48   : > { %431 = vperm.xlu0 %2656, %v393_v24   ;;  %600 = vperm.xlu2 %2658, %v562_v25  }
  0x4f   : > { %421 = vperm.xlu1 %2657, %v391_v26  }
  0x50   : > { %585 = vperm.xlu2 %2658, %v559_v27   ;;  %416 = vperm.xlu0 %2656, %v390_v28  }
  0x57   : > { %406 = vperm.xlu1 %2657, %v388_v29  }
  0x58   : > { %590 = vperm.xlu0 %2656, %v560_v30   ;;  %411 = vperm.xlu2 %2658, %v389_v31  }
  0x5f   : > { %580 = vperm.xlu1 %2657, %v558_v32  }
  0x60   : > { %575 = vperm.xlu0 %2656, %v557_v33   ;;  %917 = vperm.xlu2 %2658, %v843_v34   ;;  %v1291_v34 = vld [vmem:[%s4613_s6 + $0x50] sm:$0xff] }
  0x67   : > { %907 = vperm.xlu1 %2657, %v841_v35  }
  0x68   : > { %922 = vperm.xlu0 %2656, %v844_v36   ;;  %912 = vperm.xlu2 %2658, %v842_v37  }
  0x6a   : > { %v3386_v41 = vpop.permute.xlu2 %466 }
  0x6b   : > { %v541_v22 = vmul.f32 %v3412_v50, %v3386_v41  ;;  %v542_v28 = vmul.f32 %v3414_v51, %v3386_v41  ;;  %v543_v31 = vmul.f32 %v3416_v53, %v3386_v41  ;;  %v544_v36 = vmul.f32 %v3430_v61, %v3386_v41 }
  0x6f   : > { %902 = vperm.xlu1 %2657, %v840_v38   ;;  %v1294_v38 = vld [vmem:[%s4613_s6 + $0x68] sm:$0xff] }
  0x70   : > { %897 = vperm.xlu0 %2656, %v839_v39   ;;  %887 = vperm.xlu2 %2658, %v837_v40   ;;  %v1292_v39 = vld [vmem:[%s4613_s6 + $0x58] sm:$0xff] }
  0x72   : > { %v472_v47 = vpop.permute.xlu2 %471 }
  0x73   : > { %v545_v15 = vmul.f32 %v3412_v50, %v472_v47  ;;  %v546_v16 = vmul.f32 %v3414_v51, %v472_v47  ;;  %v547_v17 = vmul.f32 %v3416_v53, %v472_v47  ;;  %v548_v18 = vmul.f32 %v3430_v61, %v472_v47 }
  0x77   : > { %877 = vperm.xlu1 %2657, %v835_v42  }
  0x78   : > { %892 = vperm.xlu0 %2656, %v838_v43   ;;  %882 = vperm.xlu2 %2658, %v836_v44  }
  0x7a   : > { %v3432_v62 = vpop.permute.xlu2 %456 }
  0x7b   : > { %v534_v47 = vmul.f32 %v3414_v51, %v3432_v62 }
  0x7f   : > { %872 = vperm.xlu1 %2657, %v834_v45   ;;  %v533_v45 = vmul.f32 %v3412_v50, %v3432_v62 }
  0x80   : > { %867 = vperm.xlu0 %2656, %v833_v48   ;;  %857 = vperm.xlu2 %2658, %v831_v49  }
  0x81   : > { %v646_v52 = vpop.permute.xlu1 %645 }
  0x82   : > { %v477_v54 = vpop.permute.xlu0 %476  ;;  %v3456_v19 = vpop.permute.xlu2 %630 }
  0x83   : > { %v549_v55 = vmul.f32 %v3412_v50, %v477_v54  ;;  %v550_v57 = vmul.f32 %v3414_v51, %v477_v54  ;;  %v551_v60 = vmul.f32 %v3416_v53, %v477_v54  ;;  %v552_v4 = vmul.f32 %v3430_v61, %v477_v54 }
  0x84   : > { %v535_v54 = vmul.f32 %v3416_v53, %v3432_v62 }
  0x85   : > { %v709_v63 = vadd.f32 %v646_v52, %v549_v55  ;;  %v710_v1 = vadd.f32 %v646_v52, %v550_v57  ;;  %v711_v3 = vadd.f32 %v646_v52, %v551_v60  ;;  %v712_v14 = vadd.f32 %v646_v52, %v552_v4 }
  0x86   : > { %v536_v57 = vmul.f32 %v3430_v61, %v3432_v62 }
  0x87   : > { %847 = vperm.xlu1 %2657, %v829_v56   ;;  %2659 = vtanh.f32 %v709_v63 }
  0x88   : > { %862 = vperm.xlu0 %2656, %v832_v58   ;;  %852 = vperm.xlu2 %2658, %v830_v59   ;;  %2661 = vtanh.f32 %v710_v1 }
  0x89   : > { %v3434_v0 = vpop.permute.xlu1 %650  ;;  %2663 = vtanh.f32 %v711_v3 }
  0x8a   : > { %v482_v2 = vpop.permute.xlu0 %481 }
  0x8b   : > { %v553_v5 = vmul.f32 %v3412_v50, %v482_v2  ;;  %v554_v6 = vmul.f32 %v3414_v51, %v482_v2  ;;  %v555_v7 = vmul.f32 %v3416_v53, %v482_v2  ;;  %v556_v32 = vmul.f32 %v3430_v61, %v482_v2 }
  0x8d   : > { %v713_v11 = vadd.f32 %v3434_v0, %v553_v5  ;;  %v714_v12 = vadd.f32 %v3434_v0, %v554_v6  ;;  %v715_v13 = vadd.f32 %v3434_v0, %v555_v7  ;;  %v2660_v21 = vpop.eup %2659  ;;  %v716_v49 = vadd.f32 %v3434_v0, %v556_v32  ;;  %v3487_v0 = vpop.permute.xlu2 %615  ;;  %v1290_v7 = vld [vmem:[%s4613_s6 + $0x48] sm:$0xff] }
  0x8e   : > { %v2662_v27 = vpop.eup %2661 }
  0x8f   : > { %1374 = vperm.xlu1 %2657, %v1296_v8   ;;  %2665 = vtanh.f32 %v713_v11  ;;  %v2664_v30 = vpop.eup %2663  ;;  %v1287_v11 = vld [vmem:[%s4613_s6 + $0x30] sm:$0xff] }
  0x90   : > { %1369 = vperm.xlu0 %2656, %v1295_v9   ;;  %1359 = vperm.xlu2 %2658, %v1293_v10   ;;  %2667 = vtanh.f32 %v714_v12  ;;  %v1289_v10 = vld [vmem:[%s4613_s6 + $0x40] sm:$0xff] }
  0x91   : > { %v641_v20 = vpop.permute.xlu1 %640  ;;  %2669 = vtanh.f32 %v715_v13 }
  0x92   : > { %v705_v23 = vadd.f32 %v641_v20, %v545_v15  ;;  %v706_v24 = vadd.f32 %v641_v20, %v546_v16  ;;  %v707_v25 = vadd.f32 %v641_v20, %v547_v17  ;;  %v636_v26 = vpop.permute.xlu0 %635  ;;  %v708_v29 = vadd.f32 %v641_v20, %v548_v18 }
  0x93   : > { %2671 = vtanh.f32 %v712_v14  ;;  %v701_v33 = vadd.f32 %v636_v26, %v541_v22  ;;  %v702_v37 = vadd.f32 %v636_v26, %v542_v28  ;;  %v703_v42 = vadd.f32 %v636_v26, %v543_v31  ;;  %v1285_v31 = vld [vmem:[%s4613_s6 + $0x20] sm:$0xff] }
  0x94   : > { %2673 = vtanh.f32 %v705_v23  ;;  %v704_v41 = vadd.f32 %v636_v26, %v544_v36  ;;  %v1288_v36 = vld [vmem:[%s4613_s6 + $0x38] sm:$0xff] }
  0x95   : > { %v2666_v35 = vpop.eup %2665  ;;  %2675 = vtanh.f32 %v706_v24 }
  0x96   : > { %v2668_v40 = vpop.eup %2667  ;;  %2677 = vtanh.f32 %v707_v25  ;;  %v825_v43 = vpack.c.bf16 %v2666_v35, %v2660_v21 }
  0x97   : > { %v2670_v44 = vpop.eup %2669  ;;  %2679 = vtanh.f32 %v708_v29  ;;  %1349 = vperm.xlu1 %2657, %v1291_v34   ;;  %v826_v46 = vpack.c.bf16 %v2668_v40, %v2662_v27 }
  0x98   : > { %2681 = vtanh.f32 %v701_v33  ;;  %1364 = vperm.xlu0 %2656, %v1294_v38   ;;  %1354 = vperm.xlu2 %2658, %v1292_v39   ;;  %v827_v48 = vpack.c.bf16 %v2670_v44, %v2664_v30  ;;  %v3513_v33 = vpop.permute.xlu2 %441 }
  0x99   : > { %v3481_v52 = vpop.eup %2671  ;;  %2683 = vtanh.f32 %v702_v37  ;;  %973 = vmatpush.bf16.msra.mxu0 %v825_v43  ;;  %1022 = vmatpush.bf16.msra.mxu1 %v826_v46  ;;  %v626_v55 = vpop.permute.xlu1 %625  ;;  %v1286_v37 = vld [vmem:[%s4613_s6 + $0x28] sm:$0xff] }
  0x9a   : > { %v2674_v56 = vpop.eup %2673  ;;  %2685 = vtanh.f32 %v703_v42  ;;  %1071 = vmatpush.bf16.msra.mxu2 %v827_v48  ;;  %v693_v58 = vadd.f32 %v626_v55, %v533_v45  ;;  %v694_v59 = vadd.f32 %v626_v55, %v534_v47  ;;  %v462_v60 = vpop.permute.xlu0 %461  ;;  %v695_v1 = vadd.f32 %v626_v55, %v535_v54 }
  0x9b   : > { %v2676_v63 = vpop.eup %2675  ;;  %2687 = vtanh.f32 %v704_v41  ;;  %v537_v2 = vmul.f32 %v3412_v50, %v462_v60  ;;  %v538_v3 = vmul.f32 %v3414_v51, %v462_v60  ;;  %v696_v5 = vadd.f32 %v626_v55, %v536_v57 }
  0x9c   : > { %v2678_v4 = vpop.eup %2677  ;;  %2689 = vtanh.f32 %v716_v49  ;;  %v539_v6 = vmul.f32 %v3416_v53, %v462_v60  ;;  %v540_v62 = vmul.f32 %v3430_v61, %v462_v60 }
  0x9d   : > { %v2680_v8 = vpop.eup %2679  ;;  %2691 = vtanh.f32 %v693_v58  ;;  %v697_v9 = vadd.f32 %v3456_v19, %v537_v2  ;;  %v698_v13 = vadd.f32 %v3456_v19, %v538_v3  ;;  %v1284_v2 = vld [vmem:[%s4613_s6 + $0x18] sm:$0xff]  ;;  %v1283_v3 = vld [vmem:[%s4613_s6 + $0x10] sm:$0xff] }
  0x9e   : > { %v2682_v12 = vpop.eup %2681  ;;  %2693 = vtanh.f32 %v694_v59  ;;  %v699_v15 = vadd.f32 %v3456_v19, %v539_v6  ;;  %v700_v18 = vadd.f32 %v3456_v19, %v540_v62 }
  0x9f   : > { %v2684_v14 = vpop.eup %2683  ;;  %2695 = vtanh.f32 %v695_v1  ;;  %v821_v16 = vpack.c.bf16 %v2674_v56, %v2682_v12  ;;  %1344 = vperm.xlu1 %2657, %v1290_v7   ;;  %v521_v7 = vmul.f32 %v3412_v50, %v3513_v33 }
  0xa0   : > { %v2686_v17 = vpop.eup %2685  ;;  %2697 = vtanh.f32 %v696_v5  ;;  %v822_v20 = vpack.c.bf16 %v2676_v63, %v2684_v14  ;;  %1339 = vperm.xlu0 %2656, %v1289_v10   ;;  %1329 = vperm.xlu2 %2658, %v1287_v11   ;;  %v427_v6 = vpop.permute.xlu2 %426 }
  0xa1   : > { %v2688_v21 = vpop.eup %2687  ;;  %2699 = vtanh.f32 %v697_v9  ;;  %974 = vmatpush.bf16.msra.mxu0 %v821_v16  ;;  %v823_v22 = vpack.c.bf16 %v2678_v4, %v2686_v17  ;;  %v452_v23 = vpop.permute.xlu1 %451  ;;  %v1281_v4 = vld [vmem:[%s4613_s6] sm:$0xff] }
  0xa2   : > { %v2690_v24 = vpop.eup %2689  ;;  %2701 = vtanh.f32 %v698_v13  ;;  %1023 = vmatpush.bf16.msra.mxu1 %v822_v20  ;;  %v447_v25 = vpop.permute.xlu0 %446  ;;  %v824_v34 = vpack.c.bf16 %v2680_v8, %v2688_v21  ;;  %v529_v47 = vmul.f32 %v3412_v50, %v452_v23  ;;  %v530_v48 = vmul.f32 %v3414_v51, %v452_v23 }
  0xa3   : > { %v2692_v26 = vpop.eup %2691  ;;  %v828_v27 = vpack.c.bf16 %v2690_v24, %v3481_v52  ;;  %2703 = vtanh.f32 %v699_v15  ;;  %1072 = vmatpush.bf16.msra.mxu2 %v823_v22  ;;  %v525_v19 = vmul.f32 %v3412_v50, %v447_v25  ;;  %v526_v29 = vmul.f32 %v3414_v51, %v447_v25 }
  0xa4   : > { %v2694_v28 = vpop.eup %2693  ;;  %2705 = vtanh.f32 %v700_v18  ;;  %v527_v30 = vmul.f32 %v3416_v53, %v447_v25  ;;  %v528_v35 = vmul.f32 %v3430_v61, %v447_v25  ;;  %v531_v55 = vmul.f32 %v3416_v53, %v452_v23 }
  0xa5   : > { %v2696_v32 = vpop.eup %2695  ;;  %1120 = vmatpush.bf16.msra.mxu3 %v828_v27  ;;  %v685_v39 = vadd.f32 %v3487_v0, %v525_v19  ;;  %v686_v40 = vadd.f32 %v3487_v0, %v526_v29  ;;  %v532_v56 = vmul.f32 %v3430_v61, %v452_v23  ;;  %v522_v18 = vmul.f32 %v3414_v51, %v3513_v33 }
  0xa6   : > { %v2698_v38 = vpop.eup %2697  ;;  %v687_v43 = vadd.f32 %v3487_v0, %v527_v30  ;;  %v688_v45 = vadd.f32 %v3487_v0, %v528_v35  ;;  %v523_v24 = vmul.f32 %v3416_v53, %v3513_v33  ;;  %v524_v25 = vmul.f32 %v3430_v61, %v3513_v33  ;;  %v1282_v30 = vld [vmem:[%s4613_s6 + $0x8] sm:$0xff] }
  0xa7   : > { %v2700_v42 = vpop.eup %2699  ;;  %1319 = vperm.xlu1 %2657, %v1285_v31   ;;  %2707 = vtanh.f32 %v685_v39  ;;  %v1734_v35 = vld [vmem:[%s4615_s8 + $0x8] sm:$0xff]  ;;  %v510_v39 = vmul.f32 %v3414_v51, %v427_v6 }
  0xa8   : > { %v2702_v44 = vpop.eup %2701  ;;  %1334 = vperm.xlu0 %2656, %v1288_v36   ;;  %1324 = vperm.xlu2 %2658, %v1286_v37   ;;  %v817_v41 = vpack.c.bf16 %v2700_v42, %v2692_v26  ;;  %2709 = vtanh.f32 %v686_v40  ;;  %v1733_v37 = vld [vmem:[%s4615_s8] sm:$0xff]  ;;  %v511_v40 = vmul.f32 %v3416_v53, %v427_v6  ;;  %v512_v42 = vmul.f32 %v3430_v61, %v427_v6 }
  0xa9   : > { %v2704_v46 = vpop.eup %2703  ;;  %1121 = vmatpush.bf16.msra.mxu3 %v824_v34  ;;  %v818_v49 = vpack.c.bf16 %v2702_v44, %v2694_v28  ;;  %v437_v52 = vpop.permute.xlu1 %436  ;;  %2711 = vtanh.f32 %v687_v43 }
  0xaa   : > { %v2706_v54 = vpop.eup %2705  ;;  %975 = vmatpush.bf16.msra.mxu0 %v817_v41  ;;  %v819_v57 = vpack.c.bf16 %v2704_v46, %v2696_v32  ;;  %v621_v58 = vpop.permute.xlu0 %620  ;;  %2713 = vtanh.f32 %v688_v45  ;;  %v517_v9 = vmul.f32 %v3412_v50, %v437_v52  ;;  %v518_v10 = vmul.f32 %v3414_v51, %v437_v52 }
  0xab   : > { %1024 = vmatpush.bf16.msra.mxu1 %v818_v49  ;;  %v820_v59 = vpack.c.bf16 %v2706_v54, %v2698_v38  ;;  %v689_v60 = vadd.f32 %v621_v58, %v529_v47  ;;  %v690_v63 = vadd.f32 %v621_v58, %v530_v48  ;;  %v691_v0 = vadd.f32 %v621_v58, %v531_v55  ;;  %v601_v43 = vpop.permute.xlu2 %600 }
  0xac   : > { %1073 = vmatpush.bf16.msra.mxu2 %v819_v57  ;;  %v692_v1 = vadd.f32 %v621_v58, %v532_v56  ;;  %v519_v11 = vmul.f32 %v3416_v53, %v437_v52  ;;  %v520_v14 = vmul.f32 %v3430_v61, %v437_v52  ;;  %v509_v38 = vmul.f32 %v3412_v50, %v427_v6 }
  0xad   : > { %1122 = vmatpush.bf16.msra.mxu3 %v820_v59  ;;  %2715 = vtanh.f32 %v689_v60  ;;  %v2708_v5 = vpop.eup %2707 }
  0xae   : > { %2717 = vtanh.f32 %v690_v63  ;;  %v2710_v62 = vpop.eup %2709 }
  0xaf   : > { %2719 = vtanh.f32 %v691_v0  ;;  %1314 = vperm.xlu1 %2657, %v1284_v2   ;;  %v2712_v8 = vpop.eup %2711 }
  0xb0   : > { %2721 = vtanh.f32 %v692_v1  ;;  %1309 = vperm.xlu0 %2656, %v1283_v3   ;;  %1299 = vperm.xlu2 %2658, %v1281_v4   ;;  %v2714_v13 = vpop.eup %2713  ;;  %v1735_v1 = vld [vmem:[%s4615_s8 + $0x10] sm:$0xff]  ;;  %v1737_v4 = vld [vmem:[%s4615_s8 + $0x20] sm:$0xff] }
  0xb1   : > { %v611_v12 = vpop.permute.xlu1 %610 }
  0xb2   : > { %v606_v15 = vpop.permute.xlu0 %605  ;;  %v681_v16 = vadd.f32 %v611_v12, %v521_v7  ;;  %v682_v28 = vadd.f32 %v611_v12, %v522_v18  ;;  %v683_v32 = vadd.f32 %v611_v12, %v523_v24  ;;  %v684_v33 = vadd.f32 %v611_v12, %v524_v25  ;;  %v1738_v25 = vld [vmem:[%s4615_s8 + $0x28] sm:$0xff] }
  0xb3   : > { %v2716_v17 = vpop.eup %2715  ;;  %v677_v20 = vadd.f32 %v606_v15, %v517_v9  ;;  %v678_v21 = vadd.f32 %v606_v15, %v518_v10  ;;  %v679_v22 = vadd.f32 %v606_v15, %v519_v11  ;;  %v680_v26 = vadd.f32 %v606_v15, %v520_v14 }
  0xb4   : > { %v2718_v23 = vpop.eup %2717  ;;  %2723 = vtanh.f32 %v681_v16  ;;  %v813_v19 = vpack.c.bf16 %v2716_v17, %v2708_v5  ;;  %v586_v16 = vpop.permute.xlu2 %585 }
  0xb5   : > { %v2720_v27 = vpop.eup %2719  ;;  %2725 = vtanh.f32 %v677_v20  ;;  %v814_v29 = vpack.c.bf16 %v2718_v23, %v2710_v62  ;;  %v1736_v62 = vld [vmem:[%s4615_s8 + $0x18] sm:$0xff] }
  0xb6   : > { %v2722_v31 = vpop.eup %2721  ;;  %2727 = vtanh.f32 %v678_v21  ;;  %v815_v34 = vpack.c.bf16 %v2720_v27, %v2712_v8  ;;  %976 = vmatpush.bf16.msra.mxu0 %v813_v19 }
  0xb7   : > { %2729 = vtanh.f32 %v679_v22  ;;  %1025 = vmatpush.bf16.msra.mxu1 %v814_v29  ;;  %v816_v36 = vpack.c.bf16 %v2722_v31, %v2714_v13  ;;  %1751 = vperm.xlu1 %2657, %v1733_v37  }
  0xb8   : > { %2731 = vtanh.f32 %v680_v26  ;;  %1074 = vmatpush.bf16.msra.mxu2 %v815_v34  ;;  %1304 = vperm.xlu0 %2656, %v1282_v30   ;;  %v1739_v30 = vld [vmem:[%s4615_s8 + $0x30] sm:$0xff] }
  0xb9   : > { %2733 = vtanh.f32 %v682_v28  ;;  %1123 = vmatpush.bf16.msra.mxu3 %v816_v36  ;;  %1756 = vperm.xlu2 %2658, %v1734_v35   ;;  %v596_v44 = vpop.permute.xlu1 %595  ;;  %v1740_v28 = vld [vmem:[%s4615_s8 + $0x38] sm:$0xff] }
  0xba   : > { %v2724_v45 = vpop.eup %2723  ;;  %2735 = vtanh.f32 %v683_v32  ;;  %v669_v41 = vadd.f32 %v596_v44, %v509_v38  ;;  %v670_v46 = vadd.f32 %v596_v44, %v510_v39  ;;  %v671_v47 = vadd.f32 %v596_v44, %v511_v40  ;;  %v432_v48 = vpop.permute.xlu0 %431 }
  0xbb   : > { %v2726_v49 = vpop.eup %2725  ;;  %2737 = vtanh.f32 %v684_v33  ;;  %v672_v52 = vadd.f32 %v596_v44, %v512_v42  ;;  %v513_v54 = vmul.f32 %v3412_v50, %v432_v48  ;;  %v514_v55 = vmul.f32 %v3414_v51, %v432_v48 }
  0xbc   : > { %v2728_v56 = vpop.eup %2727  ;;  %2739 = vtanh.f32 %v669_v41  ;;  %v515_v57 = vmul.f32 %v3416_v53, %v432_v48  ;;  %v516_v58 = vmul.f32 %v3430_v61, %v432_v48  ;;  %v809_v59 = vpack.c.bf16 %v2724_v45, %v2726_v49  ;;  %v412_v48 = vpop.permute.xlu2 %411  ;;  %v1741_v49 = vld [vmem:[%s4615_s8 + $0x40] sm:$0xff] }
  0xbd   : > { %v2730_v60 = vpop.eup %2729  ;;  %2741 = vtanh.f32 %v670_v46  ;;  %v673_v63 = vadd.f32 %v601_v43, %v513_v54  ;;  %v674_v0 = vadd.f32 %v601_v43, %v514_v55  ;;  %v1742_v55 = vld [vmem:[%s4615_s8 + $0x48] sm:$0xff] }
  0xbe   : > { %v2732_v2 = vpop.eup %2731  ;;  %2743 = vtanh.f32 %v671_v47  ;;  %v675_v3 = vadd.f32 %v601_v43, %v515_v57  ;;  %977 = vmatpush.bf16.msra.mxu0 %v809_v59  ;;  %v676_v6 = vadd.f32 %v601_v43, %v516_v58  ;;  %v497_v57 = vmul.f32 %v3412_v50, %v412_v48 }
  0xbf   : > { %v2734_v5 = vpop.eup %2733  ;;  %2745 = vtanh.f32 %v672_v52  ;;  %1766 = vperm.xlu1 %2657, %v1736_v62   ;;  %v1743_v52 = vld [vmem:[%s4615_s8 + $0x50] sm:$0xff] }
  0xc0   : > { %v2736_v7 = vpop.eup %2735  ;;  %2747 = vtanh.f32 %v673_v63  ;;  %v810_v8 = vpack.c.bf16 %v2734_v5, %v2728_v56  ;;  %1761 = vperm.xlu0 %2656, %v1735_v1  }
  0xc1   : > { %v2738_v9 = vpop.eup %2737  ;;  %2749 = vtanh.f32 %v674_v0  ;;  %v811_v10 = vpack.c.bf16 %v2736_v7, %v2730_v60  ;;  %1771 = vperm.xlu2 %2658, %v1737_v4   ;;  %v422_v11 = vpop.permute.xlu1 %421 }
  0xc2   : > { %v2740_v12 = vpop.eup %2739  ;;  %2751 = vtanh.f32 %v675_v3  ;;  %1026 = vmatpush.bf16.msra.mxu1 %v810_v8  ;;  %v812_v13 = vpack.c.bf16 %v2738_v9, %v2732_v2  ;;  %v417_v14 = vpop.permute.xlu0 %416  ;;  %v505_v34 = vmul.f32 %v3412_v50, %v422_v11  ;;  %v506_v37 = vmul.f32 %v3414_v51, %v422_v11 }
  0xc3   : > { %v2742_v15 = vpop.eup %2741  ;;  %2753 = vtanh.f32 %v676_v6  ;;  %1075 = vmatpush.bf16.msra.mxu2 %v811_v10  ;;  %v501_v17 = vmul.f32 %v3412_v50, %v417_v14  ;;  %v502_v20 = vmul.f32 %v3414_v51, %v417_v14  ;;  %v503_v21 = vmul.f32 %v3416_v53, %v417_v14 }
  0xc4   : > { %v2744_v18 = vpop.eup %2743  ;;  %1124 = vmatpush.bf16.msra.mxu3 %v812_v13  ;;  %v504_v22 = vmul.f32 %v3430_v61, %v417_v14  ;;  %v507_v38 = vmul.f32 %v3416_v53, %v422_v11  ;;  %v508_v42 = vmul.f32 %v3430_v61, %v422_v11  ;;  %v498_v6 = vmul.f32 %v3414_v51, %v412_v48 }
  0xc5   : > { %v2746_v23 = vpop.eup %2745  ;;  %v661_v24 = vadd.f32 %v586_v16, %v501_v17  ;;  %v662_v27 = vadd.f32 %v586_v16, %v502_v20  ;;  %v663_v29 = vadd.f32 %v586_v16, %v503_v21  ;;  %v500_v13 = vmul.f32 %v3430_v61, %v412_v48  ;;  %v1745_v21 = vld [vmem:[%s4615_s8 + $0x60] sm:$0xff] }
  0xc6   : > { %v2748_v26 = vpop.eup %2747  ;;  %v664_v35 = vadd.f32 %v586_v16, %v504_v22  ;;  %v1744_v16 = vld [vmem:[%s4615_s8 + $0x58] sm:$0xff] }
  0xc7   : > { %v2750_v19 = vpop.eup %2749  ;;  %v805_v31 = vpack.c.bf16 %v2748_v26, %v2740_v12  ;;  %2755 = vtanh.f32 %v661_v24  ;;  %1781 = vperm.xlu1 %2657, %v1739_v30  }
  0xc8   : > { %v2752_v32 = vpop.eup %2751  ;;  %1776 = vperm.xlu0 %2656, %v1738_v25   ;;  %v806_v33 = vpack.c.bf16 %v2750_v19, %v2742_v15  ;;  %2757 = vtanh.f32 %v662_v27  ;;  %v2137_v27 = vld [vmem:[%s4616_s9] sm:$0xff] }
  0xc9   : > { %v2754_v36 = vpop.eup %2753  ;;  %1786 = vperm.xlu2 %2658, %v1740_v28   ;;  %978 = vmatpush.bf16.msra.mxu0 %v805_v31  ;;  %v807_v39 = vpack.c.bf16 %v2752_v32, %v2744_v18  ;;  %v407_v40 = vpop.permute.xlu1 %406  ;;  %2759 = vtanh.f32 %v663_v29  ;;  %v2623_v28 = vld [vmem:[%s4610_s3] sm:$0xff]  ;;  %v2139_v29 = vld [vmem:[%s4616_s9 + $0x10] sm:$0xff]  ;;  %v2138_v31 = vld [vmem:[%s4616_s9 + $0x8] sm:$0xff] }
  0xca   : > { %1027 = vmatpush.bf16.msra.mxu1 %v806_v33  ;;  %v808_v43 = vpack.c.bf16 %v2754_v36, %v2746_v23  ;;  %v591_v44 = vpop.permute.xlu0 %590  ;;  %2761 = vtanh.f32 %v664_v35  ;;  %v493_v59 = vmul.f32 %v3412_v50, %v407_v40  ;;  %v494_v60 = vmul.f32 %v3414_v51, %v407_v40 }
  0xcb   : > { %1076 = vmatpush.bf16.msra.mxu2 %v807_v39  ;;  %v665_v45 = vadd.f32 %v591_v44, %v505_v34  ;;  %v666_v41 = vadd.f32 %v591_v44, %v506_v37  ;;  %v667_v46 = vadd.f32 %v591_v44, %v507_v38  ;;  %v668_v47 = vadd.f32 %v591_v44, %v508_v42  ;;  %v2140_v37 = vld [vmem:[%s4616_s9 + $0x18] sm:$0xff]  ;;  %v2142_v38 = vld [vmem:[%s4616_s9 + $0x28] sm:$0xff]  ;;  %v2141_v39 = vld [vmem:[%s4616_s9 + $0x20] sm:$0xff] }
  0xcc   : > { %1125 = vmatpush.bf16.msra.mxu3 %v808_v43  ;;  %v495_v63 = vmul.f32 %v3416_v53, %v407_v40  ;;  %v496_v2 = vmul.f32 %v3430_v61, %v407_v40  ;;  %v499_v50 = vmul.f32 %v3416_v53, %v412_v48  ;;  %v1746_v53 = vld [vmem:[%s4615_s8 + $0x68] sm:$0xff]  ;;  %v2143_v40 = vld [vmem:[%s4616_s9 + $0x30] sm:$0xff]  ;;  %v2145_v43 = vld [vmem:[%s4616_s9 + $0x40] sm:$0xff] }
  0xcd   : > { %2763 = vtanh.f32 %v665_v45  ;;  %v2756_v54 = vpop.eup %2755  ;;  %v2624_v42 = vld [vmem:[%s4610_s3 + $0x8] sm:$0xff]  ;;  %v2144_v44 = vld [vmem:[%s4616_s9 + $0x38] sm:$0xff]  ;;  %v2625_v48 = vld [vmem:[%s4610_s3 + $0x10] sm:$0xff] }
  0xce   : > { %2765 = vtanh.f32 %v666_v41  ;;  %v2758_v56 = vpop.eup %2757  ;;  %v2146_v45 = vld [vmem:[%s4616_s9 + $0x48] sm:$0xff]  ;;  %v2147_v41 = vld [vmem:[%s4616_s9 + $0x50] sm:$0xff] }
  0xcf   : > { %2767 = vtanh.f32 %v667_v46  ;;  %v2760_v58 = vpop.eup %2759  ;;  %1796 = vperm.xlu1 %2657, %v1742_v55   ;;  %v1747_v46 = vld [vmem:[%s4615_s8 + $0x70] sm:$0xff]  ;;  %v2152_v55 = vld [vmem:[%s4616_s9 + $0x78] sm:$0xff] }
  0xd0   : > { %2769 = vtanh.f32 %v668_v47  ;;  %1791 = vperm.xlu0 %2656, %v1741_v49   ;;  %v2762_v1 = vpop.eup %2761  ;;  %v1748_v47 = vld [vmem:[%s4615_s8 + $0x78] sm:$0xff]  ;;  %v2149_v49 = vld [vmem:[%s4616_s9 + $0x60] sm:$0xff] }
  0xd1   : > { %1801 = vperm.xlu2 %2658, %v1743_v52   ;;  %v581_v0 = vpop.permute.xlu1 %580  ;;  %v2148_v52 = vld [vmem:[%s4616_s9 + $0x58] sm:$0xff] }
  0xd2   : > { %v576_v3 = vpop.permute.xlu0 %575  ;;  %v657_v4 = vadd.f32 %v581_v0, %v497_v57  ;;  %v658_v14 = vadd.f32 %v581_v0, %v498_v6  ;;  %v659_v17 = vadd.f32 %v581_v0, %v499_v50  ;;  %v660_v20 = vadd.f32 %v581_v0, %v500_v13  ;;  %v2381_v57 = vld [vmem:[#allocation2] sm:$0x1]  ;;  %v2630_v0 = vld [vmem:[%s4610_s3 + $0x38] sm:$0xff] }
  0xd3   : > { %v2764_v5 = vpop.eup %2763  ;;  %v653_v62 = vadd.f32 %v576_v3, %v493_v59  ;;  %v654_v7 = vadd.f32 %v576_v3, %v494_v60  ;;  %v655_v8 = vadd.f32 %v576_v3, %v495_v63  ;;  %v656_v10 = vadd.f32 %v576_v3, %v496_v2  ;;  %v2627_v59 = vld [vmem:[%s4610_s3 + $0x20] sm:$0xff]  ;;  %v2628_v60 = vld [vmem:[%s4610_s3 + $0x28] sm:$0xff]  ;;  %v2629_v63 = vld [vmem:[%s4610_s3 + $0x30] sm:$0xff] }
  0xd4   : > { %v2766_v9 = vpop.eup %2765  ;;  %2771 = vtanh.f32 %v657_v4  ;;  %v801_v11 = vpack.c.bf16 %v2764_v5, %v2756_v54  ;;  %v2150_v54 = vld [vmem:[%s4616_s9 + $0x68] sm:$0xff] }
  0xd5   : > { %v2768_v12 = vpop.eup %2767  ;;  %2773 = vtanh.f32 %v653_v62  ;;  %v802_v15 = vpack.c.bf16 %v2766_v9, %v2758_v56  ;;  %v2151_v56 = vld [vmem:[%s4616_s9 + $0x70] sm:$0xff] }
  0xd6   : > { %v2770_v51 = vpop.eup %2769  ;;  %2775 = vtanh.f32 %v654_v7  ;;  %979 = vmatpush.bf16.msra.mxu0 %v801_v11  ;;  %v803_v18 = vpack.c.bf16 %v2768_v12, %v2760_v58  ;;  %v2626_v58 = vld [vmem:[%s4610_s3 + $0x18] sm:$0xff] }
  0xd7   : > { %2777 = vtanh.f32 %v655_v8  ;;  %1028 = vmatpush.bf16.msra.mxu1 %v802_v15  ;;  %v804_v61 = vpack.c.bf16 %v2770_v51, %v2762_v1  ;;  %1811 = vperm.xlu1 %2657, %v1745_v21  }
  0xd8   : > { %2779 = vtanh.f32 %v656_v10  ;;  %1077 = vmatpush.bf16.msra.mxu2 %v803_v18  ;;  %1806 = vperm.xlu0 %2656, %v1744_v16  }
  0xd9   : > { %2781 = vtanh.f32 %v658_v14  ;;  %1126 = vmatpush.bf16.msra.mxu3 %v804_v61  ;;  %1816 = vperm.xlu2 %2658, %v1746_v53  }
  0xda   : > { %v2772_v22 = vpop.eup %2771  ;;  %2783 = vtanh.f32 %v659_v17 }
  0xdb   : > { %v2774_v23 = vpop.eup %2773  ;;  %2785 = vtanh.f32 %v660_v20  ;;  %v3732_v20 = vpop.permute.xlu2 %917 }
  0xdc   : > { %v2776_v24 = vpop.eup %2775  ;;  %v797_v25 = vpack.c.bf16 %v2772_v22, %v2774_v23 }
  0xdd   : > { %v2778_v26 = vpop.eup %2777 }
  0xde   : > { %v2780_v19 = vpop.eup %2779  ;;  %980 = vmatpush.bf16.msra.mxu0 %v797_v25 }
  0xdf   : > { %v2782_v30 = vpop.eup %2781  ;;  %2160 = vperm.xlu1 %2657, %v2138_v31  }
  0xe0   : > { %v2784_v32 = vpop.eup %2783  ;;  %v798_v34 = vpack.c.bf16 %v2782_v30, %v2776_v24  ;;  %2155 = vperm.xlu0 %2656, %v2137_v27   ;;  %v3742_v24 = vpop.permute.xlu1 %907 }
  0xe1   : > { %v2786_v35 = vpop.eup %2785  ;;  %v799_v33 = vpack.c.bf16 %v2784_v32, %v2778_v26  ;;  %2165 = vperm.xlu2 %2658, %v2139_v29   ;;  %981 = vmatmul.bf16.vlgmr.msra.gmra.mxu0 %v2623_v28  ;;  %v3754_v29 = vpop.permute.xlu0 %922 }
  0xe2   : > { %1029 = vmatpush.bf16.msra.mxu1 %v798_v34  ;;  %v800_v36 = vpack.c.bf16 %v2786_v35, %v2780_v19 }
  0xe3   : > { %1078 = vmatpush.bf16.msra.mxu2 %v799_v33  ;;  %v3746_v26 = vpop.permute.xlu2 %912 }
  0xe4   : > { %1127 = vmatpush.bf16.msra.mxu3 %v800_v36 }
  0xe5   : > { %1030 = vmatmul.bf16.vlgmr.msra.gmra.mxu1 %v2623_v28 }
  0xe6   : > { %1079 = vmatmul.bf16.vlgmr.msra.gmra.mxu2 %v2623_v28 }
  0xe7   : > { %1128 = vmatmul.bf16.vlgmr.msra.gmra.mxu3 %v2623_v28  ;;  %2175 = vperm.xlu1 %2657, %v2141_v39  }
  0xe8   : > { %2170 = vperm.xlu0 %2656, %v2140_v37   ;;  %v3758_v31 = vpop.permute.xlu1 %902 }
  0xe9   : > { %2180 = vperm.xlu2 %2658, %v2142_v38   ;;  %v3768_v36 = vpop.permute.xlu0 %897 }
  0xeb   : > { %v3760_v32 = vpop.permute.xlu2 %887 }
  0xef   : > { %2190 = vperm.xlu1 %2657, %v2144_v44  }
  0xf0   : > { %2185 = vperm.xlu0 %2656, %v2143_v40   ;;  %v3772_v38 = vpop.permute.xlu1 %877 }
  0xf1   : > { %2195 = vperm.xlu2 %2658, %v2145_v43   ;;  %986 = vmatmul.bf16.gmra.mxu0 %v2624_v42 }
  0xf3   : > { %v3780_v43 = vpop.permute.xlu2 %882 }
  0xf5   : > { %1035 = vmatmul.bf16.gmra.mxu1 %v2624_v42 }
  0xf6   : > { %1084 = vmatmul.bf16.gmra.mxu2 %v2624_v42 }
  0xf7   : > { %1133 = vmatmul.bf16.gmra.mxu3 %v2624_v42  ;;  %1821 = vperm.xlu1 %2657, %v1747_v46  }
  0xf8   : > { %2200 = vperm.xlu0 %2656, %v2146_v45   ;;  %v3784_v45 = vpop.permute.xlu0 %892 }
  0xf9   : > { %2205 = vperm.xlu2 %2658, %v2147_v41  }
  0xff   : > { %2210 = vperm.xlu1 %2657, %v2148_v52  }
 0x100   : > { %1826 = vperm.xlu0 %2656, %v1748_v47  }
 0x101   : > { %2215 = vperm.xlu2 %2658, %v2149_v49   ;;  %991 = vmatmul.bf16.gmra.mxu0 %v2625_v48  ;;  %v3794_v49 = vpop.permute.xlu2 %857 }
 0x102   : > { %4640 = vst [vmem:[#allocation10_spill] sm:$0xff] %v3794_v49 }
 0x105   : > { %1040 = vmatmul.bf16.gmra.mxu1 %v2625_v48 }
 0x106   : > { %1089 = vmatmul.bf16.gmra.mxu2 %v2625_v48 }
 0x107   : > { %1138 = vmatmul.bf16.gmra.mxu3 %v2625_v48  ;;  %2225 = vperm.xlu1 %2657, %v2151_v56   ;;  %v3792_v48 = vpop.permute.xlu1 %872 }
 0x108   : > { %2220 = vperm.xlu0 %2656, %v2150_v54   ;;  %v3798_v54 = vpop.permute.xlu0 %867 }
 0x109   : > { %2230 = vperm.xlu2 %2658, %v2152_v55  }
 0x110   : > { %2384 = vperm.xlu0 %2656, %v2381_v57  }
 0x111   : > { %996 = vmatmul.bf16.gmra.mxu0 %v2626_v58 }
 0x115   : > { %1045 = vmatmul.bf16.gmra.mxu1 %v2626_v58 }
 0x116   : > { %1094 = vmatmul.bf16.gmra.mxu2 %v2626_v58 }
 0x117   : > { %1143 = vmatmul.bf16.gmra.mxu3 %v2626_v58  ;;  %v3806_v58 = vpop.permute.xlu1 %847 }
 0x118   : > { %4641 = vst [vmem:[#allocation11_spill] sm:$0xff] %v3806_v58 }
 0x121   : > { %1001 = vmatmul.bf16.gmra.mxu0 %v2627_v59 }
 0x125   : > { %1050 = vmatmul.bf16.gmra.mxu1 %v2627_v59 }
 0x126   : > { %1099 = vmatmul.bf16.gmra.mxu2 %v2627_v59 }
 0x127   : > { %1148 = vmatmul.bf16.gmra.mxu3 %v2627_v59 }
 0x131   : > { %1006 = vmatmul.bf16.gmra.mxu0 %v2628_v60 }
 0x135   : > { %1055 = vmatmul.bf16.gmra.mxu1 %v2628_v60 }
 0x136   : > { %1104 = vmatmul.bf16.gmra.mxu2 %v2628_v60 }
 0x137   : > { %1153 = vmatmul.bf16.gmra.mxu3 %v2628_v60 }
 0x141   : > { %1011 = vmatmul.bf16.gmra.mxu0 %v2629_v63 }
 0x145   : > { %1060 = vmatmul.bf16.gmra.mxu1 %v2629_v63 }
 0x146   : > { %1109 = vmatmul.bf16.gmra.mxu2 %v2629_v63 }
 0x147   : > { %1158 = vmatmul.bf16.gmra.mxu3 %v2629_v63  ;;  %v3811_v63 = vpop.permute.xlu2 %852 }
 0x148   : > { %4642 = vst [vmem:[#allocation12_spill] sm:$0xff] %v3811_v63 }
 0x151   : > { %1016 = vmatmul.bf16.gmra.mxu0 %v2630_v0 }
 0x155   : > { %1065 = vmatmul.bf16.gmra.mxu1 %v2630_v0 }
 0x156   : > { %1114 = vmatmul.bf16.gmra.mxu2 %v2630_v0 }
 0x157   : > { %1163 = vmatmul.bf16.gmra.mxu3 %v2630_v0 }
 0x15e   : > { %v982_v1 = vpop.f32.mrf.mxu0 }
 0x15f   : > { %v983_v59 = vadd.f32 %v982_v1, %v3806_v58  ;;  %v3823_v1 = vpop.permute.xlu0 %862 }
 0x161   : > { %2787 = vtanh.f32 %v983_v59 }
 0x162   : > { %v1031_v2 = vpop.f32.mrf.mxu1 }
 0x163   : > { %v1032_v0 = vadd.f32 %v1031_v2, %v3806_v58 }
 0x165   : > { %2789 = vtanh.f32 %v1032_v0 }
 0x166   : > { %v984_v3 = vpop.f32.mrf.mxu0 }
 0x167   : > { %v3835_v0 = vpop.eup %2787 }
 0x168   : > { %4643 = vst [vmem:[#allocation13_spill] sm:$0xff] %v3835_v0 }
 0x169   : > { %v3698_v4 = vpop.f32.mrf.mxu2 }
 0x16a   : > { %4633 = vst [vmem:[#allocation3_spill] sm:$0xff] %v3698_v4  ;;  %v3700_v5 = vpop.f32.mrf.mxu3  ;;  %v1033_v6 = vpop.f32.mrf.mxu1 }
 0x16b   : > { %4634 = vst [vmem:[#allocation4_spill] sm:$0xff] %v3700_v5  ;;  %v985_v5 = vadd.f32 %v984_v3, %v3811_v63  ;;  %v1034_v4 = vadd.f32 %v1033_v6, %v3811_v63 }
 0x16d   : > { %2791 = vtanh.f32 %v985_v5 }
 0x16e   : > { %v987_v62 = vpop.f32.mrf.mxu0  ;;  %2793 = vtanh.f32 %v1034_v4 }
 0x171   : > { %v3702_v7 = vpop.f32.mrf.mxu2 }
 0x172   : > { %4635 = vst [vmem:[#allocation5_spill] sm:$0xff] %v3702_v7  ;;  %v3704_v8 = vpop.f32.mrf.mxu3  ;;  %v3706_v9 = vpop.f32.mrf.mxu1  ;;  %v988_v7 = vadd.f32 %v987_v62, %v3794_v49 }
 0x173   : > { %4636 = vst [vmem:[#allocation6_spill] sm:$0xff] %v3704_v8 }
 0x174   : > { %2795 = vtanh.f32 %v988_v7 }
 0x176   : > { %v3708_v50 = vpop.f32.mrf.mxu0 }
 0x177   : > { %v990_v2 = vadd.f32 %v3708_v50, %v3823_v1 }
 0x179   : > { %v3710_v10 = vpop.f32.mrf.mxu2 }
 0x17a   : > { %4637 = vst [vmem:[#allocation7_spill] sm:$0xff] %v3710_v10  ;;  %v3712_v11 = vpop.f32.mrf.mxu3  ;;  %v3714_v12 = vpop.f32.mrf.mxu1 }
 0x17b   : > { %4638 = vst [vmem:[#allocation8_spill] sm:$0xff] %v3712_v11  ;;  %v1039_v3 = vadd.f32 %v3714_v12, %v3823_v1 }
 0x17e   : > { %v3716_v13 = vpop.f32.mrf.mxu0 }
 0x17f   : > { %v993_v6 = vadd.f32 %v3716_v13, %v3798_v54 }
 0x181   : > { %v3718_v14 = vpop.f32.mrf.mxu2 }
 0x182   : > { %v3720_v15 = vpop.f32.mrf.mxu3  ;;  %v3722_v16 = vpop.f32.mrf.mxu1 }
 0x183   : > { %4639 = vst [vmem:[#allocation9_spill] sm:$0xff] %v3720_v15  ;;  %v1037_v15 = vadd.f32 %v3706_v9, %v3794_v49  ;;  %v1042_v59 = vadd.f32 %v3722_v16, %v3798_v54  ;;  %v3839_v9 = vpop.eup %2789 }
 0x184   : > { %4644 = vst [vmem:[#allocation14_spill] sm:$0xff] %v3839_v9  ;;  %v3845_v50 = vpop.eup %2791 }
 0x185   : > { %2797 = vtanh.f32 %v1037_v15  ;;  %4645 = vst [vmem:[#allocation15_spill] sm:$0xff] %v3845_v50  ;;  %v3851_v16 = vpop.eup %2793 }
 0x186   : > { %v3724_v51 = vpop.f32.mrf.mxu0  ;;  %2799 = vtanh.f32 %v990_v2  ;;  %4646 = vst [vmem:[#allocation16_spill] sm:$0xff] %v3851_v16  ;;  %v3855_v2 = vpop.eup %2795 }
 0x187   : > { %v995_v5 = vadd.f32 %v3724_v51, %v3792_v48  ;;  %2801 = vtanh.f32 %v1039_v3  ;;  %4647 = vst [vmem:[#allocation17_spill] sm:$0xff] %v3855_v2 }
 0x188   : > { %2803 = vtanh.f32 %v993_v6 }
 0x189   : > { %v3726_v17 = vpop.f32.mrf.mxu2  ;;  %2805 = vtanh.f32 %v1042_v59 }
 0x18a   : > { %v3728_v18 = vpop.f32.mrf.mxu3  ;;  %v3730_v53 = vpop.f32.mrf.mxu1  ;;  %2807 = vtanh.f32 %v995_v5 }
 0x18b   : > { %v1044_v4 = vadd.f32 %v3730_v53, %v3792_v48  ;;  %v3859_v3 = vpop.eup %2797 }
 0x18c   : > { %4648 = vst [vmem:[#allocation18_spill] sm:$0xff] %v3859_v3  ;;  %v3863_v6 = vpop.eup %2799 }
 0x18d   : > { %2809 = vtanh.f32 %v1044_v4  ;;  %4649 = vst [vmem:[#allocation19_spill] sm:$0xff] %v3863_v6 }
 0x18e   : > { %v3734_v61 = vpop.f32.mrf.mxu0 }
 0x18f   : > { %v998_v12 = vadd.f32 %v3734_v61, %v3772_v38 }
 0x191   : > { %v3736_v21 = vpop.f32.mrf.mxu2  ;;  %2811 = vtanh.f32 %v998_v12 }
 0x192   : > { %v3738_v22 = vpop.f32.mrf.mxu3  ;;  %v3740_v23 = vpop.f32.mrf.mxu1 }
 0x193   : > { %v1047_v51 = vadd.f32 %v3740_v23, %v3772_v38  ;;  %v3867_v23 = vpop.eup %2801 }
 0x194   : > { %4650 = vst [vmem:[#allocation20_spill] sm:$0xff] %v3867_v23 }
 0x195   : > { %2813 = vtanh.f32 %v1047_v51 }
 0x196   : > { %v3744_v25 = vpop.f32.mrf.mxu0 }
 0x197   : > { %v1000_v53 = vadd.f32 %v3744_v25, %v3780_v43  ;;  %v3871_v25 = vpop.eup %2803 }
 0x199   : > { %v3748_v27 = vpop.f32.mrf.mxu2  ;;  %2815 = vtanh.f32 %v1000_v53 }
 0x19a   : > { %v3750_v28 = vpop.f32.mrf.mxu3  ;;  %v3752_v19 = vpop.f32.mrf.mxu1 }
 0x19b   : > { %v1049_v61 = vadd.f32 %v3752_v19, %v3780_v43  ;;  %v3875_v19 = vpop.eup %2805 }
 0x19c   : > { %4651 = vst [vmem:[#allocation21_spill] sm:$0xff] %v3875_v19  ;;  %v3879_v9 = vpop.eup %2807 }
 0x19d   : > { %2817 = vtanh.f32 %v1049_v61  ;;  %v3883_v3 = vpop.eup %2809 }
 0x19e   : > { %v3756_v30 = vpop.f32.mrf.mxu0  ;;  %4652 = vst [vmem:[#allocation22_spill] sm:$0xff] %v3883_v3  ;;  %v3887_v53 = vpop.eup %2811 }
 0x19f   : > { %v1003_v59 = vadd.f32 %v3756_v30, %v3760_v32  ;;  %v3890_v61 = vpop.eup %2813 }
 0x1a1   : > { %v3762_v34 = vpop.f32.mrf.mxu2  ;;  %2819 = vtanh.f32 %v1003_v59  ;;  %v3892_v59 = vpop.eup %2815 }
 0x1a2   : > { %v3764_v35 = vpop.f32.mrf.mxu3  ;;  %v3766_v33 = vpop.f32.mrf.mxu1 }
 0x1a3   : > { %v1052_v5 = vadd.f32 %v3766_v33, %v3760_v32  ;;  %v3896_v0 = vpop.eup %2817 }
 0x1a5   : > { %2821 = vtanh.f32 %v1052_v5 }
 0x1a6   : > { %v3770_v37 = vpop.f32.mrf.mxu0 }
 0x1a7   : > { %v1005_v4 = vadd.f32 %v3770_v37, %v3784_v45 }
 0x1a9   : > { %v3774_v39 = vpop.f32.mrf.mxu2  ;;  %2823 = vtanh.f32 %v1005_v4  ;;  %v3900_v4 = vpop.eup %2819 }
 0x1aa   : > { %v3776_v40 = vpop.f32.mrf.mxu3  ;;  %v3778_v42 = vpop.f32.mrf.mxu1 }
 0x1ab   : > { %v1054_v12 = vadd.f32 %v3778_v42, %v3784_v45 }
 0x1ad   : > { %2825 = vtanh.f32 %v1054_v12  ;;  %v3904_v12 = vpop.eup %2821 }
 0x1ae   : > { %v3782_v44 = vpop.f32.mrf.mxu0 }
 0x1af   : > { %v1008_v51 = vadd.f32 %v3782_v44, %v3768_v36 }
 0x1b1   : > { %v3786_v41 = vpop.f32.mrf.mxu2  ;;  %2827 = vtanh.f32 %v1008_v51 }
 0x1b2   : > { %v3788_v46 = vpop.f32.mrf.mxu3  ;;  %v3790_v47 = vpop.f32.mrf.mxu1 }
 0x1b3   : > { %v1057_v37 = vadd.f32 %v3790_v47, %v3768_v36 }
 0x1b5   : > { %2829 = vtanh.f32 %v1057_v37 }
 0x1b6   : > { %v3796_v52 = vpop.f32.mrf.mxu0 }
 0x1b7   : > { %v1010_v44 = vadd.f32 %v3796_v52, %v3758_v31  ;;  %v3907_v52 = vpop.eup %2823 }
 0x1b9   : > { %v3800_v55 = vpop.f32.mrf.mxu2 }
 0x1ba   : > { %v3802_v56 = vpop.f32.mrf.mxu3  ;;  %v3804_v57 = vpop.f32.mrf.mxu1 }
 0x1be   : > { %v3809_v60 = vpop.f32.mrf.mxu0 }
 0x1c1   : > { %v3816_v8 = vpop.f32.mrf.mxu2 }
 0x1c2   : > { %v3819_v11 = vpop.f32.mrf.mxu3  ;;  %v3821_v10 = vpop.f32.mrf.mxu1 }
 0x1c6   : > { %v1014_v62 = vpop.f32.mrf.mxu0 }
 0x1c7   : > { %v1015_v47 = vadd.f32 %v1014_v62, %v3746_v26  ;;  %v3909_v62 = vpop.eup %2825 }
 0x1c9   : > { %v3843_v7 = vpop.f32.mrf.mxu2 }
 0x1ca   : > { %v3849_v13 = vpop.f32.mrf.mxu3  ;;  %v1063_v15 = vpop.f32.mrf.mxu1 }
 0x1cb   : > { %v1064_v3 = vadd.f32 %v1063_v15, %v3746_v26 }
 0x1ce   : > { %v1017_v16 = vpop.f32.mrf.mxu0 }
 0x1cf   : > { %v1018_v42 = vadd.f32 %v1017_v16, %v3732_v20  ;;  %v1013_v16 = vadd.f32 %v3809_v60, %v3742_v24 }
 0x1d1   : > { %v1112_v30 = vpop.f32.mrf.mxu2  ;;  %2831 = vtanh.f32 %v1018_v42  ;;  %v2828_v42 = vpop.eup %2827 }
 0x1d2   : > { %v1161_v33 = vpop.f32.mrf.mxu3  ;;  %v1066_v23 = vpop.f32.mrf.mxu1  ;;  %v1113_v49 = vadd.f32 %v1112_v30, %v3746_v26 }
 0x1d3   : > { %v1067_v51 = vadd.f32 %v1066_v23, %v3732_v20  ;;  %v3915_v23 = vpop.eup %2829 }
 0x1d6   : > { %v1019_v50 = vpop.f32.mrf.mxu0 }
 0x1d7   : > { %v1020_v5 = vadd.f32 %v1019_v50, %v3754_v29  ;;  %v1059_v50 = vadd.f32 %v3804_v57, %v3758_v31 }
 0x1d9   : > { %v1115_v58 = vpop.f32.mrf.mxu2  ;;  %2833 = vtanh.f32 %v1020_v5  ;;  %v1062_v5 = vadd.f32 %v3821_v10, %v3742_v24 }
 0x1da   : > { %2835 = vtanh.f32 %v1010_v44  ;;  %v1164_v37 = vpop.f32.mrf.mxu3  ;;  %v1068_v63 = vpop.f32.mrf.mxu1  ;;  %v1116_v19 = vadd.f32 %v1115_v58, %v3732_v20 }
 0x1db   : > { %2837 = vtanh.f32 %v1015_v47  ;;  %v1069_v60 = vadd.f32 %v1068_v63, %v3754_v29  ;;  %v2832_v44 = vpop.eup %2831  ;;  %v1165_v57 = vadd.f32 %v1164_v37, %v3732_v20 }
 0x1dc   : > { %2839 = vtanh.f32 %v1013_v16 }
 0x1dd   : > { %2841 = vtanh.f32 %v1067_v51 }
 0x1de   : > { %2843 = vtanh.f32 %v1069_v60  ;;  %v1162_v60 = vadd.f32 %v1161_v33, %v3746_v26  ;;  %v1155_v33 = vadd.f32 %v3802_v56, %v3768_v36  ;;  %v1265_v56 = vpack.c.bf16 %v3907_v52, %v3900_v4 }
 0x1df   : > { %v2834_v6 = vpop.eup %2833  ;;  %2845 = vtanh.f32 %v1059_v50 }
 0x1e0   : > { %v2836_v47 = vpop.eup %2835  ;;  %2847 = vtanh.f32 %v1064_v3  ;;  %v1277_v63 = vpack.c.bf16 %v2834_v6, %v2832_v44  ;;  %v1111_v3 = vadd.f32 %v3843_v7, %v3742_v24  ;;  %v1108_v44 = vadd.f32 %v3816_v8, %v3758_v31 }
 0x1e1   : > { %v2838_v16 = vpop.eup %2837  ;;  %2849 = vtanh.f32 %v1062_v5  ;;  %v1117_v15 = vpop.f32.mrf.mxu2 }
 0x1e2   : > { %v2840_v2 = vpop.eup %2839  ;;  %2851 = vtanh.f32 %v1116_v19  ;;  %v1118_v10 = vadd.f32 %v1117_v15, %v3754_v29  ;;  %v1166_v51 = vpop.f32.mrf.mxu3  ;;  %1425 = vmatpush.bf16.msrb.mxu0 %v1277_v63  ;;  %v1160_v19 = vadd.f32 %v3849_v13, %v3742_v24  ;;  %v1269_v24 = vpack.c.bf16 %v2836_v47, %v2828_v42 }
 0x1e3   : > { %v2842_v58 = vpop.eup %2841  ;;  %2853 = vtanh.f32 %v1165_v57  ;;  %v1167_v20 = vadd.f32 %v1166_v51, %v3754_v29  ;;  %v1273_v6 = vpack.c.bf16 %v2838_v16, %v2840_v2  ;;  %v1157_v29 = vadd.f32 %v3819_v11, %v3758_v31 }
 0x1e4   : > { %v2844_v37 = vpop.eup %2843  ;;  %2855 = vtanh.f32 %v1118_v10  ;;  %v1106_v2 = vadd.f32 %v3800_v55, %v3768_v36  ;;  %v1103_v57 = vadd.f32 %v3786_v41, %v3784_v45  ;;  %v1152_v31 = vadd.f32 %v3788_v46, %v3784_v45 }
 0x1e5   : > { %v2846_v50 = vpop.eup %2845  ;;  %2857 = vtanh.f32 %v1167_v20  ;;  %v1278_v30 = vpack.c.bf16 %v2844_v37, %v2842_v58  ;;  %v1101_v47 = vadd.f32 %v3774_v39, %v3760_v32  ;;  %v1150_v41 = vadd.f32 %v3776_v40, %v3760_v32  ;;  %v4653_v20 = vld [vmem:[#allocation9_spill] sm:$0xff]  ;;  %v4655_v37 = vld [vmem:[#allocation7_spill] sm:$0xff] }
 0x1e6   : > { %v2848_v5 = vpop.eup %2847  ;;  %2859 = vtanh.f32 %v1113_v49  ;;  %1426 = vmatpush.bf16.msrb.mxu0 %v1273_v6  ;;  %v1270_v45 = vpack.c.bf16 %v2846_v50, %v3915_v23  ;;  %v1098_v16 = vadd.f32 %v3762_v34, %v3780_v43  ;;  %v1147_v15 = vadd.f32 %v3764_v35, %v3780_v43  ;;  %v4657_v6 = vld [vmem:[#allocation19_spill] sm:$0xff] }
 0x1e7   : > { %v2850_v26 = vpop.eup %2849  ;;  %2861 = vtanh.f32 %v1162_v60  ;;  %1474 = vmatpush.bf16.msrb.mxu1 %v1278_v30  ;;  %v1096_v32 = vadd.f32 %v3748_v27, %v3772_v38  ;;  %v1261_v23 = vpack.c.bf16 %v3892_v59, %v3887_v53  ;;  %v1145_v10 = vadd.f32 %v3750_v28, %v3772_v38 }
 0x1e8   : > { %v2852_v7 = vpop.eup %2851  ;;  %2863 = vtanh.f32 %v1111_v3  ;;  %v1274_v8 = vpack.c.bf16 %v2848_v5, %v2850_v26  ;;  %v1266_v35 = vpack.c.bf16 %v3909_v62, %v3904_v12  ;;  %v1093_v51 = vadd.f32 %v3736_v21, %v3792_v48  ;;  %v4659_v5 = vld [vmem:[#allocation21_spill] sm:$0xff] }
 0x1e9   : > { %v2854_v13 = vpop.eup %2853  ;;  %2865 = vtanh.f32 %v1160_v19  ;;  %v1142_v53 = vadd.f32 %v3738_v22, %v3792_v48  ;;  %v1091_v38 = vadd.f32 %v3726_v17, %v3798_v54  ;;  %v1257_v62 = vpack.c.bf16 %v3879_v9, %v3871_v25  ;;  %v4658_v19 = vld [vmem:[#allocation8_spill] sm:$0xff] }
 0x1ea   : > { %v2856_v49 = vpop.eup %2855  ;;  %2867 = vtanh.f32 %v1108_v44  ;;  %1427 = vmatpush.bf16.msrb.mxu0 %v1269_v24  ;;  %v1140_v58 = vadd.f32 %v3728_v18, %v3798_v54  ;;  %v1262_v22 = vpack.c.bf16 %v3896_v0, %v3890_v61  ;;  %v1088_v60 = vadd.f32 %v3718_v14, %v3823_v1  ;;  %v4654_v54 = vld [vmem:[#allocation10_spill] sm:$0xff]  ;;  %v4656_v61 = vld [vmem:[#allocation17_spill] sm:$0xff] }
 0x1eb   : > { %v2858_v11 = vpop.eup %2857  ;;  %2869 = vtanh.f32 %v1157_v29  ;;  %1475 = vmatpush.bf16.msrb.mxu1 %v1274_v8  ;;  %v1279_v55 = vpack.c.bf16 %v2856_v49, %v2852_v7  ;;  %v1137_v9 = vadd.f32 %v4653_v20, %v3823_v1  ;;  %v1086_v3 = vadd.f32 %v4655_v37, %v4654_v54  ;;  %v4660_v1 = vld [vmem:[#allocation22_spill] sm:$0xff]  ;;  %v4661_v29 = vld [vmem:[#allocation12_spill] sm:$0xff]  ;;  %v4662_v7 = vld [vmem:[#allocation5_spill] sm:$0xff] }
 0x1ec   : > { %v2860_v42 = vpop.eup %2859  ;;  %2871 = vtanh.f32 %v1106_v2  ;;  %v1280_v36 = vpack.c.bf16 %v2858_v11, %v2854_v13  ;;  %v1253_v50 = vpack.c.bf16 %v4657_v6, %v4656_v61  ;;  %v1135_v30 = vadd.f32 %v4658_v19, %v4654_v54  ;;  %v4663_v13 = vld [vmem:[#allocation6_spill] sm:$0xff]  ;;  %v4665_v11 = vld [vmem:[#allocation3_spill] sm:$0xff]  ;;  %v2637_v20 = vld [vmem:[%s4612_s5 + $0x30] sm:$0xff] }
 0x1ed   : > { %v2862_v63 = vpop.eup %2861  ;;  %2873 = vtanh.f32 %v1155_v33  ;;  %1523 = vmatpush.bf16.msrb.mxu2 %v1279_v55  ;;  %v1258_v44 = vpack.c.bf16 %v4660_v1, %v4659_v5  ;;  %v1083_v2 = vadd.f32 %v4662_v7, %v4661_v29  ;;  %v1132_v33 = vadd.f32 %v4663_v13, %v4661_v29 }
 0x1ee   : > { %v2864_v46 = vpop.eup %2863  ;;  %2875 = vtanh.f32 %v1103_v57  ;;  %1572 = vmatpush.bf16.msrb.mxu3 %v1280_v36  ;;  %1428 = vmatpush.bf16.msrb.mxu0 %v1265_v56  ;;  %v4664_v57 = vld [vmem:[#allocation11_spill] sm:$0xff] }
 0x1ef   : > { %v2866_v39 = vpop.eup %2865  ;;  %2877 = vtanh.f32 %v1152_v31  ;;  %1476 = vmatpush.bf16.msrb.mxu1 %v1270_v45  ;;  %v1275_v4 = vpack.c.bf16 %v2860_v42, %v2864_v46  ;;  %v1081_v31 = vadd.f32 %v4665_v11, %v4664_v57  ;;  %v4666_v42 = vld [vmem:[#allocation13_spill] sm:$0xff]  ;;  %v4669_v45 = vld [vmem:[#allocation18_spill] sm:$0xff]  ;;  %v4670_v46 = vld [vmem:[#allocation20_spill] sm:$0xff] }
 0x1f0   : > { %v2868_v52 = vpop.eup %2867  ;;  %2879 = vtanh.f32 %v1101_v47  ;;  %v1276_v40 = vpack.c.bf16 %v2862_v63, %v2866_v39  ;;  %v4667_v47 = vld [vmem:[#allocation15_spill] sm:$0xff]  ;;  %v4668_v63 = vld [vmem:[#allocation4_spill] sm:$0xff] }
 0x1f1   : > { %v2870_v34 = vpop.eup %2869  ;;  %2881 = vtanh.f32 %v1150_v41  ;;  %1524 = vmatpush.bf16.msrb.mxu2 %v1275_v4  ;;  %v1249_v36 = vpack.c.bf16 %v4667_v47, %v4666_v42  ;;  %v1130_v41 = vadd.f32 %v4668_v63, %v4664_v57  ;;  %v2631_v39 = vld [vmem:[%s4612_s5] sm:$0xff]  ;;  %v4076_v42 = vpop.permute.xlu2 %1359 }
 0x1f2   : > { %v2872_v43 = vpop.eup %2871  ;;  %2883 = vtanh.f32 %v1098_v16  ;;  %1573 = vmatpush.bf16.msrb.mxu3 %v1276_v40  ;;  %1429 = vmatpush.bf16.msrb.mxu0 %v1261_v23  ;;  %v1254_v16 = vpack.c.bf16 %v4670_v46, %v4669_v45  ;;  %v4088_v45 = vpop.permute.xlu1 %1374 }
 0x1f3   : > { %v2874_v27 = vpop.eup %2873  ;;  %2885 = vtanh.f32 %v1147_v15  ;;  %1477 = vmatpush.bf16.msrb.mxu1 %v1266_v35  ;;  %v1271_v59 = vpack.c.bf16 %v2868_v52, %v2872_v43 }
 0x1f4   : > { %v2876_v28 = vpop.eup %2875  ;;  %2887 = vtanh.f32 %v1096_v32  ;;  %v1272_v12 = vpack.c.bf16 %v2870_v34, %v2874_v27  ;;  %v4671_v34 = vld [vmem:[#allocation14_spill] sm:$0xff] }
 0x1f5   : > { %v2878_v21 = vpop.eup %2877  ;;  %2889 = vtanh.f32 %v1145_v10  ;;  %1525 = vmatpush.bf16.msrb.mxu2 %v1271_v59  ;;  %v4672_v10 = vld [vmem:[#allocation16_spill] sm:$0xff] }
 0x1f6   : > { %v2880_v48 = vpop.eup %2879  ;;  %2891 = vtanh.f32 %v1093_v51  ;;  %1574 = vmatpush.bf16.msrb.mxu3 %v1272_v12  ;;  %1430 = vmatpush.bf16.msrb.mxu0 %v1257_v62  ;;  %v1250_v35 = vpack.c.bf16 %v4672_v10, %v4671_v34 }
 0x1f7   : > { %v2882_v17 = vpop.eup %2881  ;;  %2893 = vtanh.f32 %v1142_v53  ;;  %1478 = vmatpush.bf16.msrb.mxu1 %v1262_v22  ;;  %v1267_v25 = vpack.c.bf16 %v2876_v28, %v2880_v48  ;;  %v2633_v22 = vld [vmem:[%s4612_s5 + $0x10] sm:$0xff]  ;;  %v2634_v48 = vld [vmem:[%s4612_s5 + $0x18] sm:$0xff] }
 0x1f8   : > { %v2884_v18 = vpop.eup %2883  ;;  %2895 = vtanh.f32 %v1091_v38  ;;  %v1268_v0 = vpack.c.bf16 %v2878_v21, %v2882_v17  ;;  %v2636_v17 = vld [vmem:[%s4612_s5 + $0x28] sm:$0xff] }
 0x1f9   : > { %v2886_v14 = vpop.eup %2885  ;;  %2897 = vtanh.f32 %v1140_v58  ;;  %1526 = vmatpush.bf16.msrb.mxu2 %v1267_v25  ;;  %v2632_v58 = vld [vmem:[%s4612_s5 + $0x8] sm:$0xff] }
 0x1fa   : > { %v2888_v26 = vpop.eup %2887  ;;  %2899 = vtanh.f32 %v1088_v60  ;;  %1575 = vmatpush.bf16.msrb.mxu3 %v1268_v0  ;;  %1431 = vmatpush.bf16.msrb.mxu0 %v1253_v50  ;;  %v2635_v60 = vld [vmem:[%s4612_s5 + $0x20] sm:$0xff] }
 0x1fb   : > { %v2890_v24 = vpop.eup %2889  ;;  %2901 = vtanh.f32 %v1137_v9  ;;  %1479 = vmatpush.bf16.msrb.mxu1 %v1258_v44  ;;  %v1263_v8 = vpack.c.bf16 %v2884_v18, %v2888_v26  ;;  %v2638_v9 = vld [vmem:[%s4612_s5 + $0x38] sm:$0xff] }
 0x1fc   : > { %v2892_v49 = vpop.eup %2891  ;;  %2903 = vtanh.f32 %v1086_v3  ;;  %v1264_v55 = vpack.c.bf16 %v2886_v14, %v2890_v24 }
 0x1fd   : > { %v2894_v56 = vpop.eup %2893  ;;  %2905 = vtanh.f32 %v1135_v30  ;;  %1527 = vmatpush.bf16.msrb.mxu2 %v1263_v8 }
 0x1fe   : > { %v2896_v15 = vpop.eup %2895  ;;  %2907 = vtanh.f32 %v1083_v2  ;;  %1576 = vmatpush.bf16.msrb.mxu3 %v1264_v55  ;;  %1432 = vmatpush.bf16.msrb.mxu0 %v1249_v36 }
 0x1ff   : > { %v2898_v4 = vpop.eup %2897  ;;  %2909 = vtanh.f32 %v1132_v33  ;;  %1480 = vmatpush.bf16.msrb.mxu1 %v1254_v16  ;;  %v1259_v52 = vpack.c.bf16 %v2892_v49, %v2896_v15  ;;  %v4066_v49 = vpop.permute.xlu0 %1369 }
 0x200   : > { %v2900_v32 = vpop.eup %2899  ;;  %2911 = vtanh.f32 %v1081_v31  ;;  %v1260_v40 = vpack.c.bf16 %v2894_v56, %v2898_v4  ;;  %v4092_v16 = vpop.permute.xlu2 %1354 }
 0x201   : > { %v2902_v23 = vpop.eup %2901  ;;  %2913 = vtanh.f32 %v1130_v41  ;;  %1528 = vmatpush.bf16.msrb.mxu2 %v1259_v52  ;;  %1433 = vmatmul.bf16.vlgmr.msrb.gmra.mxu0 %v2631_v39 }
 0x202   : > { %v2904_v43 = vpop.eup %2903  ;;  %1577 = vmatpush.bf16.msrb.mxu3 %v1260_v40 }
 0x203   : > { %v2906_v51 = vpop.eup %2905  ;;  %1481 = vmatpush.bf16.msrb.mxu1 %v1250_v35  ;;  %v1255_v27 = vpack.c.bf16 %v2900_v32, %v2904_v43  ;;  %v4102_v32 = vpop.permute.xlu1 %1349 }
 0x204   : > { %v2908_v53 = vpop.eup %2907  ;;  %v1256_v59 = vpack.c.bf16 %v2902_v23, %v2906_v51 }
 0x205   : > { %v2910_v28 = vpop.eup %2909  ;;  %1529 = vmatpush.bf16.msrb.mxu2 %v1255_v27 }
 0x206   : > { %v2912_v38 = vpop.eup %2911  ;;  %1578 = vmatpush.bf16.msrb.mxu3 %v1256_v59  ;;  %1482 = vmatmul.bf16.vlgmr.msrb.gmra.mxu1 %v2631_v39 }
 0x207   : > { %v2914_v12 = vpop.eup %2913  ;;  %v1251_v62 = vpack.c.bf16 %v2908_v53, %v2912_v38  ;;  %v4080_v36 = vpop.permute.xlu0 %1364 }
 0x208   : > { %v1252_v21 = vpack.c.bf16 %v2910_v28, %v2914_v12  ;;  %v4108_v34 = vpop.permute.xlu2 %1329 }
 0x209   : > { %1530 = vmatpush.bf16.msrb.mxu2 %v1251_v62 }
 0x20a   : > { %1579 = vmatpush.bf16.msrb.mxu3 %v1252_v21 }
 0x20b   : > { %v4118_v27 = vpop.permute.xlu1 %1344 }
 0x20c   : > { %1531 = vmatmul.bf16.vlgmr.msrb.gmra.mxu2 %v2631_v39 }
 0x20d   : > { %1580 = vmatmul.bf16.vlgmr.msrb.gmra.mxu3 %v2631_v39 }
 0x20f   : > { %v4096_v15 = vpop.permute.xlu0 %1339 }
 0x210   : > { %v4126_v38 = vpop.permute.xlu2 %1324 }
 0x211   : > { %1438 = vmatmul.bf16.gmra.mxu0 %v2632_v58 }
 0x216   : > { %1487 = vmatmul.bf16.gmra.mxu1 %v2632_v58 }
 0x217   : > { %v4114_v43 = vpop.permute.xlu0 %1334 }
 0x21c   : > { %1536 = vmatmul.bf16.gmra.mxu2 %v2632_v58 }
 0x21d   : > { %1585 = vmatmul.bf16.gmra.mxu3 %v2632_v58  ;;  %v4134_v58 = vpop.permute.xlu1 %1319 }
 0x21f   : > { %v4128_v12 = vpop.permute.xlu0 %1309 }
 0x220   : > { %4681 = vst [vmem:[#allocation12_spill] sm:$0xff] %v4128_v12 }
 0x221   : > { %1443 = vmatmul.bf16.gmra.mxu0 %v2633_v22 }
 0x226   : > { %1492 = vmatmul.bf16.gmra.mxu1 %v2633_v22 }
 0x22c   : > { %1541 = vmatmul.bf16.gmra.mxu2 %v2633_v22 }
 0x22d   : > { %1590 = vmatmul.bf16.gmra.mxu3 %v2633_v22 }
 0x231   : > { %1448 = vmatmul.bf16.gmra.mxu0 %v2634_v48 }
 0x236   : > { %1497 = vmatmul.bf16.gmra.mxu1 %v2634_v48 }
 0x23c   : > { %1546 = vmatmul.bf16.gmra.mxu2 %v2634_v48 }
 0x23d   : > { %1595 = vmatmul.bf16.gmra.mxu3 %v2634_v48 }
 0x241   : > { %1453 = vmatmul.bf16.gmra.mxu0 %v2635_v60 }
 0x246   : > { %1502 = vmatmul.bf16.gmra.mxu1 %v2635_v60 }
 0x24c   : > { %1551 = vmatmul.bf16.gmra.mxu2 %v2635_v60 }
 0x24d   : > { %1600 = vmatmul.bf16.gmra.mxu3 %v2635_v60  ;;  %v4140_v60 = vpop.permute.xlu2 %1299 }
 0x24e   : > { %4682 = vst [vmem:[#allocation5_spill] sm:$0xff] %v4140_v60 }
 0x251   : > { %1458 = vmatmul.bf16.gmra.mxu0 %v2636_v17 }
 0x256   : > { %1507 = vmatmul.bf16.gmra.mxu1 %v2636_v17 }
 0x25c   : > { %1556 = vmatmul.bf16.gmra.mxu2 %v2636_v17 }
 0x25d   : > { %1605 = vmatmul.bf16.gmra.mxu3 %v2636_v17 }
 0x261   : > { %1463 = vmatmul.bf16.gmra.mxu0 %v2637_v20 }
 0x266   : > { %1512 = vmatmul.bf16.gmra.mxu1 %v2637_v20 }
 0x26c   : > { %1561 = vmatmul.bf16.gmra.mxu2 %v2637_v20 }
 0x26d   : > { %1610 = vmatmul.bf16.gmra.mxu3 %v2637_v20 }
 0x271   : > { %1468 = vmatmul.bf16.gmra.mxu0 %v2638_v9 }
 0x276   : > { %1517 = vmatmul.bf16.gmra.mxu1 %v2638_v9 }
 0x27c   : > { %1566 = vmatmul.bf16.gmra.mxu2 %v2638_v9 }
 0x27d   : > { %1615 = vmatmul.bf16.gmra.mxu3 %v2638_v9  ;;  %v4145_v9 = vpop.permute.xlu0 %1304 }
 0x27e   : > { %v1434_v25 = vpop.f32.mrf.mxu0  ;;  %4683 = vst [vmem:[#allocation6_spill] sm:$0xff] %v4145_v9 }
 0x27f   : > { %v1435_v20 = vadd.f32 %v1434_v25, %v4140_v60  ;;  %v4159_v25 = vpop.permute.xlu1 %1314 }
 0x280   : > { %4684 = vst [vmem:[#allocation11_spill] sm:$0xff] %v4159_v25 }
 0x281   : > { %2915 = vtanh.f32 %v1435_v20 }
 0x283   : > { %v4022_v18 = vpop.f32.mrf.mxu1 }
 0x286   : > { %v4024_v54 = vpop.f32.mrf.mxu0 }
 0x28b   : > { %v4026_v37 = vpop.f32.mrf.mxu1 }
 0x28e   : > { %v4028_v3 = vpop.f32.mrf.mxu0 }
 0x28f   : > { %v4030_v0 = vpop.f32.mrf.mxu2 }
 0x290   : > { %4673 = vst [vmem:[#allocation9_spill] sm:$0xff] %v4030_v0  ;;  %v4032_v61 = vpop.f32.mrf.mxu3  ;;  %v1437_v0 = vadd.f32 %v4024_v54, %v4145_v9 }
 0x291   : > { %4674 = vst [vmem:[#allocation10_spill] sm:$0xff] %v4032_v61  ;;  %v1484_v61 = vadd.f32 %v4022_v18, %v4140_v60  ;;  %v4171_v60 = vpop.eup %2915 }
 0x292   : > { %4685 = vst [vmem:[#allocation3_spill] sm:$0xff] %v4171_v60 }
 0x293   : > { %v4034_v6 = vpop.f32.mrf.mxu1  ;;  %2917 = vtanh.f32 %v1484_v61 }
 0x294   : > { %v1489_v18 = vadd.f32 %v4034_v6, %v4128_v12  ;;  %2919 = vtanh.f32 %v1437_v0 }
 0x296   : > { %v4036_v50 = vpop.f32.mrf.mxu0 }
 0x297   : > { %v4038_v14 = vpop.f32.mrf.mxu2  ;;  %v1442_v54 = vadd.f32 %v4036_v50, %v4159_v25 }
 0x298   : > { %4675 = vst [vmem:[#allocation7_spill] sm:$0xff] %v4038_v14  ;;  %v4040_v19 = vpop.f32.mrf.mxu3  ;;  %v1486_v14 = vadd.f32 %v4026_v37, %v4145_v9 }
 0x299   : > { %4676 = vst [vmem:[#allocation17_spill] sm:$0xff] %v4040_v19  ;;  %v4175_v50 = vpop.eup %2917 }
 0x29a   : > { %2921 = vtanh.f32 %v1486_v14  ;;  %4686 = vst [vmem:[#allocation13_spill] sm:$0xff] %v4175_v50 }
 0x29b   : > { %v4042_v30 = vpop.f32.mrf.mxu1 }
 0x29c   : > { %v1491_v37 = vadd.f32 %v4042_v30, %v4159_v25 }
 0x29e   : > { %v4044_v5 = vpop.f32.mrf.mxu0 }
 0x29f   : > { %v4046_v1 = vpop.f32.mrf.mxu2 }
 0x2a0   : > { %4677 = vst [vmem:[#allocation19_spill] sm:$0xff] %v4046_v1  ;;  %v4048_v44 = vpop.f32.mrf.mxu3  ;;  %v1440_v1 = vadd.f32 %v4028_v3, %v4128_v12  ;;  %v1445_v3 = vadd.f32 %v4044_v5, %v4134_v58  ;;  %v4181_v5 = vpop.eup %2919 }
 0x2a1   : > { %4678 = vst [vmem:[#allocation8_spill] sm:$0xff] %v4048_v44 }
 0x2a2   : > { %2923 = vtanh.f32 %v1440_v1  ;;  %4687 = vst [vmem:[#allocation15_spill] sm:$0xff] %v4181_v5 }
 0x2a3   : > { %v4050_v26 = vpop.f32.mrf.mxu1  ;;  %2925 = vtanh.f32 %v1489_v18  ;;  %v4187_v18 = vpop.eup %2921 }
 0x2a4   : > { %v1494_v61 = vadd.f32 %v4050_v26, %v4134_v58  ;;  %2927 = vtanh.f32 %v1442_v54  ;;  %4688 = vst [vmem:[#allocation4_spill] sm:$0xff] %v4187_v18 }
 0x2a5   : > { %2929 = vtanh.f32 %v1491_v37 }
 0x2a6   : > { %v4052_v29 = vpop.f32.mrf.mxu0  ;;  %2931 = vtanh.f32 %v1445_v3 }
 0x2a7   : > { %v4054_v7 = vpop.f32.mrf.mxu2  ;;  %v1447_v0 = vadd.f32 %v4052_v29, %v4126_v38  ;;  %2933 = vtanh.f32 %v1494_v61 }
 0x2a8   : > { %4679 = vst [vmem:[#allocation21_spill] sm:$0xff] %v4054_v7  ;;  %v4056_v2 = vpop.f32.mrf.mxu3  ;;  %v4191_v54 = vpop.eup %2923 }
 0x2a9   : > { %4680 = vst [vmem:[#allocation22_spill] sm:$0xff] %v4056_v2  ;;  %2935 = vtanh.f32 %v1447_v0  ;;  %v4195_v37 = vpop.eup %2925 }
 0x2aa   : > { %4689 = vst [vmem:[#allocation18_spill] sm:$0xff] %v4195_v37  ;;  %v4199_v50 = vpop.eup %2927 }
 0x2ab   : > { %v4058_v24 = vpop.f32.mrf.mxu1  ;;  %v4202_v18 = vpop.eup %2929 }
 0x2ac   : > { %v1496_v14 = vadd.f32 %v4058_v24, %v4126_v38  ;;  %4690 = vst [vmem:[#allocation20_spill] sm:$0xff] %v4202_v18 }
 0x2ae   : > { %v4060_v13 = vpop.f32.mrf.mxu0  ;;  %2937 = vtanh.f32 %v1496_v14 }
 0x2af   : > { %v4062_v33 = vpop.f32.mrf.mxu2  ;;  %v1450_v1 = vadd.f32 %v4060_v13, %v4108_v34 }
 0x2b0   : > { %v4064_v8 = vpop.f32.mrf.mxu3 }
 0x2b1   : > { %2939 = vtanh.f32 %v1450_v1 }
 0x2b3   : > { %v4068_v57 = vpop.f32.mrf.mxu1 }
 0x2b4   : > { %v1499_v29 = vadd.f32 %v4068_v57, %v4108_v34  ;;  %v4204_v57 = vpop.eup %2931 }
 0x2b5   : > { %v4208_v14 = vpop.eup %2933 }
 0x2b6   : > { %v4070_v11 = vpop.f32.mrf.mxu0  ;;  %2941 = vtanh.f32 %v1499_v29  ;;  %v4212_v12 = vpop.eup %2935 }
 0x2b7   : > { %v4072_v31 = vpop.f32.mrf.mxu2  ;;  %v1452_v24 = vadd.f32 %v4070_v11, %v4114_v43 }
 0x2b8   : > { %v4074_v55 = vpop.f32.mrf.mxu3 }
 0x2b9   : > { %2943 = vtanh.f32 %v1452_v24  ;;  %v4216_v24 = vpop.eup %2937 }
 0x2ba   : > { %v4219_v18 = vpop.eup %2939 }
 0x2bb   : > { %v4078_v47 = vpop.f32.mrf.mxu1 }
 0x2bc   : > { %v1501_v13 = vadd.f32 %v4078_v47, %v4114_v43 }
 0x2be   : > { %v4082_v56 = vpop.f32.mrf.mxu0  ;;  %2945 = vtanh.f32 %v1501_v13  ;;  %v4221_v13 = vpop.eup %2941 }
 0x2bf   : > { %v4084_v63 = vpop.f32.mrf.mxu2  ;;  %v1455_v11 = vadd.f32 %v4082_v56, %v4096_v15  ;;  %v4225_v37 = vpop.eup %2943 }
 0x2c0   : > { %v4086_v41 = vpop.f32.mrf.mxu3 }
 0x2c3   : > { %v4090_v46 = vpop.f32.mrf.mxu1 }
 0x2c4   : > { %v4229_v5 = vpop.eup %2945 }
 0x2c6   : > { %v4094_v39 = vpop.f32.mrf.mxu0 }
 0x2c7   : > { %v4098_v4 = vpop.f32.mrf.mxu2 }
 0x2c8   : > { %v4100_v52 = vpop.f32.mrf.mxu3 }
 0x2cb   : > { %v4104_v40 = vpop.f32.mrf.mxu1 }
 0x2ce   : > { %v4106_v23 = vpop.f32.mrf.mxu0 }
 0x2cf   : > { %v4110_v10 = vpop.f32.mrf.mxu2 }
 0x2d0   : > { %v4112_v35 = vpop.f32.mrf.mxu3 }
 0x2d3   : > { %v4116_v51 = vpop.f32.mrf.mxu1 }
 0x2d6   : > { %v4120_v53 = vpop.f32.mrf.mxu0 }
 0x2d7   : > { %v4122_v59 = vpop.f32.mrf.mxu2 }
 0x2d8   : > { %v4124_v28 = vpop.f32.mrf.mxu3 }
 0x2db   : > { %v4130_v62 = vpop.f32.mrf.mxu1 }
 0x2de   : > { %v4132_v21 = vpop.f32.mrf.mxu0 }
 0x2df   : > { %v4136_v22 = vpop.f32.mrf.mxu2 }
 0x2e0   : > { %v4138_v48 = vpop.f32.mrf.mxu3 }
 0x2e3   : > { %v4142_v17 = vpop.f32.mrf.mxu1 }
 0x2e6   : > { %v1466_v19 = vpop.f32.mrf.mxu0 }
 0x2e7   : > { %v4153_v44 = vpop.f32.mrf.mxu2  ;;  %v1467_v47 = vadd.f32 %v1466_v19, %v4080_v36  ;;  %v1462_v19 = vadd.f32 %v4120_v53, %v4092_v16 }
 0x2e8   : > { %v4157_v2 = vpop.f32.mrf.mxu3 }
 0x2eb   : > { %v1515_v20 = vpop.f32.mrf.mxu1 }
 0x2ee   : > { %v1469_v6 = vpop.f32.mrf.mxu0 }
 0x2ef   : > { %v4179_v30 = vpop.f32.mrf.mxu2  ;;  %v1470_v61 = vadd.f32 %v1469_v6, %v4066_v49  ;;  %v1465_v6 = vadd.f32 %v4132_v21, %v4076_v42  ;;  %v1516_v21 = vadd.f32 %v1515_v20, %v4080_v36 }
 0x2f0   : > { %v4185_v26 = vpop.f32.mrf.mxu3 }
 0x2f1   : > { %2947 = vtanh.f32 %v1470_v61 }
 0x2f3   : > { %v1518_v3 = vpop.f32.mrf.mxu1 }
 0x2f4   : > { %v1519_v56 = vadd.f32 %v1518_v3, %v4066_v49  ;;  %v1460_v3 = vadd.f32 %v4106_v23, %v4102_v32 }
 0x2f6   : > { %v1471_v0 = vpop.f32.mrf.mxu0 }
 0x2f7   : > { %v1564_v9 = vpop.f32.mrf.mxu2  ;;  %v1472_v1 = vadd.f32 %v1471_v0, %v4088_v45 }
 0x2f8   : > { %v1613_v29 = vpop.f32.mrf.mxu3 }
 0x2f9   : > { %2949 = vtanh.f32 %v1472_v1  ;;  %v1514_v1 = vadd.f32 %v4142_v17, %v4076_v42 }
 0x2fa   : > { %2951 = vtanh.f32 %v1455_v11  ;;  %v2948_v11 = vpop.eup %2947 }
 0x2fb   : > { %2953 = vtanh.f32 %v1467_v47  ;;  %v1520_v0 = vpop.f32.mrf.mxu1  ;;  %v1457_v47 = vadd.f32 %v4094_v39, %v4118_v27 }
 0x2fc   : > { %2955 = vtanh.f32 %v1465_v6  ;;  %v1521_v61 = vadd.f32 %v1520_v0, %v4088_v45  ;;  %v1511_v0 = vadd.f32 %v4130_v62, %v4092_v16 }
 0x2fd   : > { %2957 = vtanh.f32 %v1519_v56  ;;  %v1504_v56 = vadd.f32 %v4090_v46, %v4096_v15 }
 0x2fe   : > { %2959 = vtanh.f32 %v1521_v61  ;;  %v1509_v61 = vadd.f32 %v4116_v51, %v4102_v32 }
 0x2ff   : > { %v2950_v53 = vpop.eup %2949  ;;  %2961 = vtanh.f32 %v1462_v19  ;;  %v1567_v6 = vpop.f32.mrf.mxu2  ;;  %v1506_v19 = vadd.f32 %v4104_v40, %v4118_v27  ;;  %v1565_v40 = vadd.f32 %v1564_v9, %v4080_v36  ;;  %v1612_v9 = vadd.f32 %v4185_v26, %v4076_v42 }
 0x300   : > { %v2952_v20 = vpop.eup %2951  ;;  %2963 = vtanh.f32 %v1516_v21  ;;  %v1616_v60 = vpop.f32.mrf.mxu3  ;;  %v1729_v7 = vpack.c.bf16 %v2950_v53, %v2948_v11  ;;  %v1568_v21 = vadd.f32 %v1567_v6, %v4066_v49  ;;  %v1607_v26 = vadd.f32 %v4138_v48, %v4102_v32 }
 0x301   : > { %v2954_v23 = vpop.eup %2953  ;;  %2965 = vtanh.f32 %v1460_v3  ;;  %v1617_v46 = vadd.f32 %v1616_v60, %v4066_v49 }
 0x302   : > { %v2956_v17 = vpop.eup %2955  ;;  %2967 = vtanh.f32 %v1514_v1  ;;  %1877 = vmatpush.bf16.msra.mxu0 %v1729_v7 }
 0x303   : > { %v2958_v39 = vpop.eup %2957  ;;  %2969 = vtanh.f32 %v1457_v47  ;;  %v1725_v11 = vpack.c.bf16 %v2954_v23, %v2956_v17 }
 0x304   : > { %v2960_v62 = vpop.eup %2959  ;;  %2971 = vtanh.f32 %v1511_v0 }
 0x305   : > { %v2962_v53 = vpop.eup %2961  ;;  %2973 = vtanh.f32 %v1504_v56  ;;  %v1730_v3 = vpack.c.bf16 %v2960_v62, %v2958_v39  ;;  %v1614_v56 = vadd.f32 %v1613_v29, %v4080_v36  ;;  %v1560_v36 = vadd.f32 %v4153_v44, %v4092_v16 }
 0x306   : > { %v2964_v25 = vpop.eup %2963  ;;  %2975 = vtanh.f32 %v1509_v61  ;;  %1878 = vmatpush.bf16.msra.mxu0 %v1725_v11  ;;  %v1563_v61 = vadd.f32 %v4179_v30, %v4076_v42 }
 0x307   : > { %v2966_v51 = vpop.eup %2965  ;;  %2977 = vtanh.f32 %v1506_v19  ;;  %v1569_v7 = vpop.f32.mrf.mxu2  ;;  %1926 = vmatpush.bf16.msra.mxu1 %v1730_v3 }
 0x308   : > { %v2968_v1 = vpop.eup %2967  ;;  %2979 = vtanh.f32 %v1568_v21  ;;  %v1570_v47 = vadd.f32 %v1569_v7, %v4088_v45  ;;  %v1618_v6 = vpop.f32.mrf.mxu3  ;;  %v1721_v0 = vpack.c.bf16 %v2962_v53, %v2966_v51  ;;  %v1558_v21 = vadd.f32 %v4136_v22, %v4102_v32 }
 0x309   : > { %v2970_v23 = vpop.eup %2969  ;;  %2981 = vtanh.f32 %v1617_v46  ;;  %v1619_v49 = vadd.f32 %v1618_v6, %v4088_v45  ;;  %v1726_v60 = vpack.c.bf16 %v2964_v25, %v2968_v1  ;;  %v1609_v25 = vadd.f32 %v4157_v2, %v4092_v16 }
 0x30a   : > { %v2972_v17 = vpop.eup %2971  ;;  %2983 = vtanh.f32 %v1570_v47  ;;  %1879 = vmatpush.bf16.msra.mxu0 %v1721_v0  ;;  %v1717_v29 = vpack.c.bf16 %v2970_v23, %v2952_v20  ;;  %v1555_v20 = vadd.f32 %v4122_v59, %v4118_v27  ;;  %v1713_v2 = vpack.c.bf16 %v4225_v37, %v4219_v18  ;;  %v4695_v23 = vld [vmem:[#allocation22_spill] sm:$0xff] }
 0x30b   : > { %v2974_v39 = vpop.eup %2973  ;;  %2985 = vtanh.f32 %v1619_v49  ;;  %1927 = vmatpush.bf16.msra.mxu1 %v1726_v60  ;;  %v1604_v22 = vadd.f32 %v4124_v28, %v4118_v27  ;;  %v1553_v32 = vadd.f32 %v4110_v10, %v4096_v15  ;;  %v1602_v59 = vadd.f32 %v4112_v35, %v4096_v15  ;;  %v4696_v49 = vld [vmem:[#allocation18_spill] sm:$0xff]  ;;  %v4697_v60 = vld [vmem:[#allocation20_spill] sm:$0xff] }
 0x30c   : > { %v2976_v19 = vpop.eup %2975  ;;  %2987 = vtanh.f32 %v1565_v40  ;;  %v1550_v27 = vadd.f32 %v4098_v4, %v4114_v43  ;;  %v1709_v28 = vpack.c.bf16 %v4212_v12, %v4204_v57  ;;  %v1599_v37 = vadd.f32 %v4100_v52, %v4114_v43 }
 0x30d   : > { %v2978_v45 = vpop.eup %2977  ;;  %2989 = vtanh.f32 %v1614_v56  ;;  %v1722_v30 = vpack.c.bf16 %v2972_v17, %v2976_v19  ;;  %v1714_v15 = vpack.c.bf16 %v4229_v5, %v4221_v13  ;;  %v1548_v7 = vadd.f32 %v4084_v63, %v4108_v34  ;;  %v2639_v17 = vld [vmem:[%s4614_s7] sm:$0xff] }
 0x30e   : > { %v2980_v62 = vpop.eup %2979  ;;  %2991 = vtanh.f32 %v1563_v61  ;;  %1880 = vmatpush.bf16.msra.mxu0 %v1717_v29  ;;  %v1718_v11 = vpack.c.bf16 %v2978_v45, %v2974_v39  ;;  %v1597_v12 = vadd.f32 %v4086_v41, %v4108_v34  ;;  %v1545_v43 = vadd.f32 %v4072_v31, %v4126_v38  ;;  %v4698_v39 = vld [vmem:[#allocation12_spill] sm:$0xff] }
 0x30f   : > { %v2982_v42 = vpop.eup %2981  ;;  %2993 = vtanh.f32 %v1612_v9  ;;  %1928 = vmatpush.bf16.msra.mxu1 %v1722_v30  ;;  %v1705_v5 = vpack.c.bf16 %v4199_v50, %v4191_v54  ;;  %v1594_v57 = vadd.f32 %v4074_v55, %v4126_v38  ;;  %v1710_v41 = vpack.c.bf16 %v4216_v24, %v4208_v14  ;;  %v4691_v38 = vld [vmem:[#allocation11_spill] sm:$0xff]  ;;  %v4692_v54 = vld [vmem:[#allocation21_spill] sm:$0xff]  ;;  %v4700_v45 = vld [vmem:[#allocation8_spill] sm:$0xff] }
 0x310   : > { %v2984_v44 = vpop.eup %2983  ;;  %2995 = vtanh.f32 %v1560_v36  ;;  %v1543_v40 = vadd.f32 %v4062_v33, %v4134_v58  ;;  %v1592_v50 = vadd.f32 %v4064_v8, %v4134_v58  ;;  %v1540_v6 = vadd.f32 %v4692_v54, %v4691_v38  ;;  %v4693_v14 = vld [vmem:[#allocation3_spill] sm:$0xff]  ;;  %v4344_v54 = vpop.permute.xlu0 %1761 }
 0x311   : > { %v2986_v16 = vpop.eup %2985  ;;  %2997 = vtanh.f32 %v1609_v25  ;;  %v1731_v53 = vpack.c.bf16 %v2984_v44, %v2980_v62  ;;  %v4694_v24 = vld [vmem:[#allocation15_spill] sm:$0xff]  ;;  %v1589_v56 = vadd.f32 %v4695_v23, %v4691_v38  ;;  %v1706_v8 = vpack.c.bf16 %v4697_v60, %v4696_v49  ;;  %v4701_v62 = vld [vmem:[#allocation6_spill] sm:$0xff]  ;;  %v4703_v44 = vld [vmem:[#allocation17_spill] sm:$0xff]  ;;  %v4342_v38 = vpop.permute.xlu2 %1756 }
 0x312   : > { %v2988_v46 = vpop.eup %2987  ;;  %2999 = vtanh.f32 %v1558_v21  ;;  %v1732_v48 = vpack.c.bf16 %v2986_v16, %v2982_v42  ;;  %1881 = vmatpush.bf16.msra.mxu0 %v1713_v2  ;;  %v1701_v0 = vpack.c.bf16 %v4694_v24, %v4693_v14  ;;  %v4699_v9 = vld [vmem:[#allocation19_spill] sm:$0xff]  ;;  %v1587_v25 = vadd.f32 %v4700_v45, %v4698_v39  ;;  %v4704_v2 = vld [vmem:[#allocation13_spill] sm:$0xff]  ;;  %v4705_v16 = vld [vmem:[#allocation4_spill] sm:$0xff] }
 0x313   : > { %v2990_v3 = vpop.eup %2989  ;;  %3001 = vtanh.f32 %v1607_v26  ;;  %1929 = vmatpush.bf16.msra.mxu1 %v1718_v11  ;;  %1975 = vmatpush.bf16.msra.mxu2 %v1731_v53  ;;  %v1538_v19 = vadd.f32 %v4699_v9, %v4698_v39  ;;  %v4702_v21 = vld [vmem:[#allocation7_spill] sm:$0xff]  ;;  %v2646_v14 = vld [vmem:[%s4614_s7 + $0x38] sm:$0xff] }
 0x314   : > { %v2992_v18 = vpop.eup %2991  ;;  %3003 = vtanh.f32 %v1555_v20  ;;  %2024 = vmatpush.bf16.msra.mxu3 %v1732_v48  ;;  %v1535_v42 = vadd.f32 %v4702_v21, %v4701_v62  ;;  %v1584_v20 = vadd.f32 %v4703_v44, %v4701_v62 }
 0x315   : > { %v2994_v10 = vpop.eup %2993  ;;  %3005 = vtanh.f32 %v1604_v22  ;;  %v1727_v35 = vpack.c.bf16 %v2988_v46, %v2992_v18  ;;  %v1702_v22 = vpack.c.bf16 %v4705_v16, %v4704_v2  ;;  %v4706_v46 = vld [vmem:[#allocation5_spill] sm:$0xff]  ;;  %v4708_v18 = vld [vmem:[#allocation10_spill] sm:$0xff] }
 0x316   : > { %v2996_v51 = vpop.eup %2995  ;;  %3007 = vtanh.f32 %v1553_v32  ;;  %v1728_v4 = vpack.c.bf16 %v2990_v3, %v2994_v10  ;;  %1882 = vmatpush.bf16.msra.mxu0 %v1709_v28  ;;  %v4707_v32 = vld [vmem:[#allocation9_spill] sm:$0xff] }
 0x317   : > { %v2998_v1 = vpop.eup %2997  ;;  %3009 = vtanh.f32 %v1602_v59  ;;  %1930 = vmatpush.bf16.msra.mxu1 %v1714_v15  ;;  %1976 = vmatpush.bf16.msra.mxu2 %v1727_v35  ;;  %v1533_v48 = vadd.f32 %v4707_v32, %v4706_v46 }
 0x318   : > { %v3000_v52 = vpop.eup %2999  ;;  %3011 = vtanh.f32 %v1550_v27  ;;  %2025 = vmatpush.bf16.msra.mxu3 %v1728_v4  ;;  %v1582_v27 = vadd.f32 %v4708_v18, %v4706_v46 }
 0x319   : > { %v3002_v63 = vpop.eup %3001  ;;  %3013 = vtanh.f32 %v1599_v37  ;;  %v1723_v34 = vpack.c.bf16 %v2996_v51, %v3000_v52  ;;  %v4351_v24 = vpop.permute.xlu2 %1771 }
 0x31a   : > { %v3004_v13 = vpop.eup %3003  ;;  %3015 = vtanh.f32 %v1548_v7  ;;  %v1724_v31 = vpack.c.bf16 %v2998_v1, %v3002_v63  ;;  %1883 = vmatpush.bf16.msra.mxu0 %v1705_v5 }
 0x31b   : > { %v3006_v47 = vpop.eup %3005  ;;  %3017 = vtanh.f32 %v1597_v12  ;;  %1931 = vmatpush.bf16.msra.mxu1 %v1710_v41  ;;  %1977 = vmatpush.bf16.msra.mxu2 %v1723_v34  ;;  %v2640_v41 = vld [vmem:[%s4614_s7 + $0x8] sm:$0xff] }
 0x31c   : > { %v3008_v55 = vpop.eup %3007  ;;  %3019 = vtanh.f32 %v1545_v43  ;;  %2026 = vmatpush.bf16.msra.mxu3 %v1724_v31  ;;  %v2643_v31 = vld [vmem:[%s4614_s7 + $0x20] sm:$0xff] }
 0x31d   : > { %v3010_v33 = vpop.eup %3009  ;;  %3021 = vtanh.f32 %v1594_v57  ;;  %v1719_v58 = vpack.c.bf16 %v3004_v13, %v3008_v55  ;;  %v2641_v13 = vld [vmem:[%s4614_s7 + $0x10] sm:$0xff] }
 0x31e   : > { %v3012_v61 = vpop.eup %3011  ;;  %3023 = vtanh.f32 %v1543_v40  ;;  %v1720_v36 = vpack.c.bf16 %v3006_v47, %v3010_v33  ;;  %1884 = vmatpush.bf16.msra.mxu0 %v1701_v0  ;;  %v2642_v40 = vld [vmem:[%s4614_s7 + $0x18] sm:$0xff]  ;;  %v2644_v47 = vld [vmem:[%s4614_s7 + $0x28] sm:$0xff]  ;;  %v2645_v55 = vld [vmem:[%s4614_s7 + $0x30] sm:$0xff]  ;;  %v4353_v0 = vpop.permute.xlu0 %1776 }
 0x31f   : > { %v3014_v29 = vpop.eup %3013  ;;  %3025 = vtanh.f32 %v1592_v50  ;;  %1932 = vmatpush.bf16.msra.mxu1 %v1706_v8  ;;  %1978 = vmatpush.bf16.msra.mxu2 %v1719_v58  ;;  %v4337_v50 = vpop.permute.xlu1 %1751 }
 0x320   : > { %v3016_v30 = vpop.eup %3015  ;;  %3027 = vtanh.f32 %v1540_v6  ;;  %2027 = vmatpush.bf16.msra.mxu3 %v1720_v36 }
 0x321   : > { %v3018_v26 = vpop.eup %3017  ;;  %3029 = vtanh.f32 %v1589_v56  ;;  %v1715_v11 = vpack.c.bf16 %v3012_v61, %v3016_v30  ;;  %1885 = vmatmul.bf16.vlgmr.msra.gmra.mxu0 %v2639_v17  ;;  %v4357_v23 = vpop.permute.xlu2 %1786 }
 0x322   : > { %v3020_v53 = vpop.eup %3019  ;;  %3031 = vtanh.f32 %v1538_v19  ;;  %v1716_v3 = vpack.c.bf16 %v3014_v29, %v3018_v26 }
 0x323   : > { %v3022_v59 = vpop.eup %3021  ;;  %3033 = vtanh.f32 %v1587_v25  ;;  %1933 = vmatpush.bf16.msra.mxu1 %v1702_v22  ;;  %1979 = vmatpush.bf16.msra.mxu2 %v1715_v11 }
 0x324   : > { %v3024_v28 = vpop.eup %3023  ;;  %3035 = vtanh.f32 %v1535_v42  ;;  %2028 = vmatpush.bf16.msra.mxu3 %v1716_v3 }
 0x325   : > { %v3026_v10 = vpop.eup %3025  ;;  %3037 = vtanh.f32 %v1584_v20  ;;  %v1711_v37 = vpack.c.bf16 %v3020_v53, %v3024_v28 }
 0x326   : > { %v3028_v15 = vpop.eup %3027  ;;  %3039 = vtanh.f32 %v1533_v48  ;;  %1934 = vmatmul.bf16.vlgmr.msra.gmra.mxu1 %v2639_v17  ;;  %v1712_v35 = vpack.c.bf16 %v3022_v59, %v3026_v10  ;;  %v4359_v56 = vpop.permute.xlu0 %1791 }
 0x327   : > { %v3030_v51 = vpop.eup %3029  ;;  %3041 = vtanh.f32 %v1582_v27  ;;  %1980 = vmatpush.bf16.msra.mxu2 %v1711_v37  ;;  %v4346_v6 = vpop.permute.xlu1 %1766 }
 0x328   : > { %v3032_v7 = vpop.eup %3031  ;;  %2029 = vmatpush.bf16.msra.mxu3 %v1712_v35 }
 0x329   : > { %v3034_v4 = vpop.eup %3033  ;;  %v1707_v1 = vpack.c.bf16 %v3028_v15, %v3032_v7  ;;  %v4363_v8 = vpop.permute.xlu2 %1801 }
 0x32a   : > { %v3036_v12 = vpop.eup %3035  ;;  %v1708_v52 = vpack.c.bf16 %v3030_v51, %v3034_v4 }
 0x32b   : > { %v3038_v43 = vpop.eup %3037  ;;  %1981 = vmatpush.bf16.msra.mxu2 %v1707_v1 }
 0x32c   : > { %v3040_v5 = vpop.eup %3039  ;;  %2030 = vmatpush.bf16.msra.mxu3 %v1708_v52 }
 0x32d   : > { %v3042_v63 = vpop.eup %3041  ;;  %v1703_v57 = vpack.c.bf16 %v3036_v12, %v3040_v5 }
 0x32e   : > { %v1704_v34 = vpack.c.bf16 %v3038_v43, %v3042_v63  ;;  %v4366_v61 = vpop.permute.xlu0 %1806 }
 0x32f   : > { %1982 = vmatpush.bf16.msra.mxu2 %v1703_v57  ;;  %v4355_v33 = vpop.permute.xlu1 %1781 }
 0x330   : > { %2031 = vmatpush.bf16.msra.mxu3 %v1704_v34 }
 0x331   : > { %1890 = vmatmul.bf16.gmra.mxu0 %v2640_v41  ;;  %v4373_v30 = vpop.permute.xlu2 %1816 }
 0x332   : > { %1983 = vmatmul.bf16.vlgmr.msra.gmra.mxu2 %v2639_v17 }
 0x333   : > { %2032 = vmatmul.bf16.vlgmr.msra.gmra.mxu3 %v2639_v17 }
 0x336   : > { %1939 = vmatmul.bf16.gmra.mxu1 %v2640_v41  ;;  %v4375_v42 = vpop.permute.xlu0 %2155 }
 0x337   : > { %v4361_v49 = vpop.permute.xlu1 %1796 }
 0x339   : > { %v4385_v28 = vpop.permute.xlu2 %2165 }
 0x33f   : > { %v4368_v39 = vpop.permute.xlu1 %1811 }
 0x341   : > { %1895 = vmatmul.bf16.gmra.mxu0 %v2641_v13 }
 0x342   : > { %1988 = vmatmul.bf16.gmra.mxu2 %v2640_v41 }
 0x343   : > { %2037 = vmatmul.bf16.gmra.mxu3 %v2640_v41 }
 0x346   : > { %1944 = vmatmul.bf16.gmra.mxu1 %v2641_v13 }
 0x347   : > { %v4377_v26 = vpop.permute.xlu1 %2160 }
 0x351   : > { %1900 = vmatmul.bf16.gmra.mxu0 %v2642_v40 }
 0x352   : > { %1993 = vmatmul.bf16.gmra.mxu2 %v2641_v13 }
 0x353   : > { %2042 = vmatmul.bf16.gmra.mxu3 %v2641_v13 }
 0x356   : > { %1949 = vmatmul.bf16.gmra.mxu1 %v2642_v40 }
 0x361   : > { %1905 = vmatmul.bf16.gmra.mxu0 %v2643_v31 }
 0x362   : > { %1998 = vmatmul.bf16.gmra.mxu2 %v2642_v40 }
 0x363   : > { %2047 = vmatmul.bf16.gmra.mxu3 %v2642_v40 }
 0x366   : > { %1954 = vmatmul.bf16.gmra.mxu1 %v2643_v31 }
 0x371   : > { %1910 = vmatmul.bf16.gmra.mxu0 %v2644_v47 }
 0x372   : > { %2003 = vmatmul.bf16.gmra.mxu2 %v2643_v31 }
 0x373   : > { %2052 = vmatmul.bf16.gmra.mxu3 %v2643_v31  ;;  %v2171_v31 = vpop.permute.xlu0 %2170 }
 0x376   : > { %1959 = vmatmul.bf16.gmra.mxu1 %v2644_v47 }
 0x381   : > { %1915 = vmatmul.bf16.gmra.mxu0 %v2645_v55 }
 0x382   : > { %2008 = vmatmul.bf16.gmra.mxu2 %v2644_v47 }
 0x383   : > { %2057 = vmatmul.bf16.gmra.mxu3 %v2644_v47 }
 0x386   : > { %1964 = vmatmul.bf16.gmra.mxu1 %v2645_v55 }
 0x391   : > { %1920 = vmatmul.bf16.gmra.mxu0 %v2646_v14 }
 0x392   : > { %2013 = vmatmul.bf16.gmra.mxu2 %v2645_v55 }
 0x393   : > { %2062 = vmatmul.bf16.gmra.mxu3 %v2645_v55 }
 0x396   : > { %1969 = vmatmul.bf16.gmra.mxu1 %v2646_v14 }
 0x39e   : > { %v1886_v60 = vpop.f32.mrf.mxu0 }
 0x39f   : > { %v1887_v58 = vadd.f32 %v1886_v60, %v4337_v50 }
 0x3a1   : > { %3043 = vtanh.f32 %v1887_v58 }
 0x3a2   : > { %2018 = vmatmul.bf16.gmra.mxu2 %v2646_v14 }
 0x3a3   : > { %2067 = vmatmul.bf16.gmra.mxu3 %v2646_v14  ;;  %v1935_v17 = vpop.f32.mrf.mxu1 }
 0x3a4   : > { %v1936_v36 = vadd.f32 %v1935_v17, %v4337_v50 }
 0x3a6   : > { %v1888_v9 = vpop.f32.mrf.mxu0 }
 0x3a7   : > { %v1889_v19 = vadd.f32 %v1888_v9, %v4342_v38  ;;  %v3044_v25 = vpop.eup %3043 }
 0x3a8   : > { %v2233_v20 = vmul.f32 %v3044_v25, %v4375_v42 }
 0x3a9   : > { %3045 = vtanh.f32 %v1889_v19 }
 0x3aa   : > { %3047 = vtanh.f32 %v1936_v36 }
 0x3ab   : > { %v1937_v29 = vpop.f32.mrf.mxu1 }
 0x3ac   : > { %v1938_v45 = vadd.f32 %v1937_v29, %v4342_v38 }
 0x3ae   : > { %3049 = vtanh.f32 %v1938_v45  ;;  %v1891_v62 = vpop.f32.mrf.mxu0 }
 0x3af   : > { %v3046_v21 = vpop.eup %3045  ;;  %v1892_v44 = vadd.f32 %v1891_v62, %v4344_v54 }
 0x3b0   : > { %v2237_v2 = vmul.f32 %v3046_v21, %v4377_v26  ;;  %v3048_v16 = vpop.eup %3047 }
 0x3b1   : > { %3051 = vtanh.f32 %v1892_v44  ;;  %v2234_v32 = vmul.f32 %v3048_v16, %v4375_v42  ;;  %v2176_v16 = vpop.permute.xlu1 %2175 }
 0x3b2   : > { %v2297_v22 = vadd.f32 %v2237_v2, %v2233_v20 }
 0x3b3   : > { %v1940_v11 = vpop.f32.mrf.mxu1 }
 0x3b4   : > { %v3050_v53 = vpop.eup %3049  ;;  %v1941_v46 = vadd.f32 %v1940_v11, %v4344_v54 }
 0x3b5   : > { %v2238_v48 = vmul.f32 %v3050_v53, %v4377_v26  ;;  %v1984_v3 = vpop.f32.mrf.mxu2 }
 0x3b6   : > { %3053 = vtanh.f32 %v1941_v46  ;;  %v2033_v59 = vpop.f32.mrf.mxu3  ;;  %v1893_v18 = vpop.f32.mrf.mxu0  ;;  %v1985_v35 = vadd.f32 %v1984_v3, %v4337_v50 }
 0x3b7   : > { %v3052_v27 = vpop.eup %3051  ;;  %v2318_v10 = vadd.f32 %v2238_v48, %v2234_v32  ;;  %v1894_v37 = vadd.f32 %v1893_v18, %v4346_v6  ;;  %v2034_v7 = vadd.f32 %v2033_v59, %v4337_v50 }
 0x3b8   : > { %v2241_v15 = vmul.f32 %v3052_v27, %v4385_v28 }
 0x3b9   : > { %3055 = vtanh.f32 %v1894_v37 }
 0x3ba   : > { %v2298_v51 = vadd.f32 %v2297_v22, %v2241_v15  ;;  %3057 = vtanh.f32 %v1985_v35 }
 0x3bb   : > { %v1942_v4 = vpop.f32.mrf.mxu1 }
 0x3bc   : > { %v3054_v1 = vpop.eup %3053  ;;  %v1943_v12 = vadd.f32 %v1942_v4, %v4346_v6 }
 0x3bd   : > { %v2242_v52 = vmul.f32 %v3054_v1, %v4385_v28  ;;  %v1986_v43 = vpop.f32.mrf.mxu2 }
 0x3be   : > { %3059 = vtanh.f32 %v1943_v12  ;;  %v1987_v5 = vadd.f32 %v1986_v43, %v4342_v38  ;;  %v2035_v63 = vpop.f32.mrf.mxu3  ;;  %v1896_v57 = vpop.f32.mrf.mxu0 }
 0x3bf   : > { %v2319_v41 = vadd.f32 %v2318_v10, %v2242_v52  ;;  %3061 = vtanh.f32 %v2034_v7  ;;  %v2036_v34 = vadd.f32 %v2035_v63, %v4342_v38  ;;  %v1897_v13 = vadd.f32 %v1896_v57, %v4351_v24  ;;  %v3056_v40 = vpop.eup %3055 }
 0x3c0   : > { %3063 = vtanh.f32 %v1987_v5  ;;  %v2245_v47 = vmul.f32 %v3056_v40, %v2171_v31  ;;  %v3058_v50 = vpop.eup %3057 }
 0x3c1   : > { %3065 = vtanh.f32 %v2036_v34  ;;  %v2235_v62 = vmul.f32 %v3058_v50, %v4375_v42 }
 0x3c2   : > { %3067 = vtanh.f32 %v1897_v13  ;;  %v2299_v55 = vadd.f32 %v2298_v51, %v2245_v47 }
 0x3c3   : > { %v1945_v14 = vpop.f32.mrf.mxu1 }
 0x3c4   : > { %v3060_v60 = vpop.eup %3059  ;;  %v1946_v58 = vadd.f32 %v1945_v14, %v4351_v24 }
 0x3c5   : > { %v3062_v17 = vpop.eup %3061  ;;  %v2246_v9 = vmul.f32 %v3060_v60, %v2171_v31  ;;  %v1989_v19 = vpop.f32.mrf.mxu2 }
 0x3c6   : > { %v3064_v36 = vpop.eup %3063  ;;  %3069 = vtanh.f32 %v1946_v58  ;;  %v1990_v38 = vadd.f32 %v1989_v19, %v4344_v54  ;;  %v2038_v29 = vpop.f32.mrf.mxu3  ;;  %v2236_v22 = vmul.f32 %v3062_v17, %v4375_v42 }
 0x3c7   : > { %v4398_v45 = vpop.f32.mrf.mxu0  ;;  %v3066_v25 = vpop.eup %3065  ;;  %v2320_v21 = vadd.f32 %v2319_v41, %v2246_v9  ;;  %v2239_v44 = vmul.f32 %v3064_v36, %v4377_v26  ;;  %v2039_v20 = vadd.f32 %v2038_v29, %v4344_v54 }
 0x3c8   : > { %v3068_v2 = vpop.eup %3067  ;;  %v2240_v11 = vmul.f32 %v3066_v25, %v4377_v26  ;;  %3071 = vtanh.f32 %v1990_v38 }
 0x3c9   : > { %v2339_v53 = vadd.f32 %v2239_v44, %v2235_v62  ;;  %v2249_v46 = vmul.f32 %v3068_v2, %v2176_v16  ;;  %3073 = vtanh.f32 %v2039_v20 }
 0x3ca   : > { %v2360_v32 = vadd.f32 %v2240_v11, %v2236_v22 }
 0x3cb   : > { %v4405_v48 = vadd.f32 %v2299_v55, %v2249_v46  ;;  %v1947_v3 = vpop.f32.mrf.mxu1  ;;  %v4429_v46 = vpop.permute.xlu0 %2185 }
 0x3cc   : > { %v3070_v59 = vpop.eup %3069 }
 0x3cd   : > { %v2250_v18 = vmul.f32 %v3070_v59, %v2176_v16  ;;  %v1991_v27 = vpop.f32.mrf.mxu2 }
 0x3ce   : > { %v3072_v10 = vpop.eup %3071  ;;  %v1992_v54 = vadd.f32 %v1991_v27, %v4346_v6  ;;  %v2040_v37 = vpop.f32.mrf.mxu3 }
 0x3cf   : > { %v1901_v15 = vpop.f32.mrf.mxu0  ;;  %v3074_v35 = vpop.eup %3073  ;;  %v4408_v42 = vadd.f32 %v2320_v21, %v2250_v18  ;;  %v2243_v26 = vmul.f32 %v3072_v10, %v4385_v28  ;;  %v2041_v51 = vadd.f32 %v2040_v37, %v4346_v6 }
 0x3d0   : > { %v2244_v7 = vmul.f32 %v3074_v35, %v4385_v28  ;;  %3075 = vtanh.f32 %v1992_v54  ;;  %v1902_v18 = vadd.f32 %v1901_v15, %v4355_v33  ;;  %v4433_v27 = vpop.permute.xlu1 %2190 }
 0x3d1   : > { %v2340_v4 = vadd.f32 %v2339_v53, %v2243_v26  ;;  %3077 = vtanh.f32 %v2041_v51  ;;  %v1899_v53 = vadd.f32 %v4398_v45, %v4353_v0 }
 0x3d2   : > { %v2361_v1 = vadd.f32 %v2360_v32, %v2244_v7  ;;  %v1948_v32 = vadd.f32 %v1947_v3, %v4353_v0 }
 0x3d3   : > { %v1950_v12 = vpop.f32.mrf.mxu1 }
 0x3d4   : > { %v1951_v10 = vadd.f32 %v1950_v12, %v4355_v33 }
 0x3d5   : > { %v1994_v52 = vpop.f32.mrf.mxu2 }
 0x3d6   : > { %v3076_v43 = vpop.eup %3075  ;;  %v1995_v5 = vadd.f32 %v1994_v52, %v4351_v24  ;;  %v2043_v63 = vpop.f32.mrf.mxu3 }
 0x3d7   : > { %v1903_v57 = vpop.f32.mrf.mxu0  ;;  %v3078_v41 = vpop.eup %3077  ;;  %v2247_v34 = vmul.f32 %v3076_v43, %v2171_v31  ;;  %v2044_v13 = vadd.f32 %v2043_v63, %v4351_v24 }
 0x3d8   : > { %v2248_v40 = vmul.f32 %v3078_v41, %v2171_v31  ;;  %3079 = vtanh.f32 %v1995_v5  ;;  %v1904_v37 = vadd.f32 %v1903_v57, %v4357_v23  ;;  %v4449_v5 = vpop.permute.xlu0 %2200 }
 0x3d9   : > { %v2341_v6 = vadd.f32 %v2340_v4, %v2247_v34  ;;  %3081 = vtanh.f32 %v2044_v13 }
 0x3da   : > { %v2362_v28 = vadd.f32 %v2361_v1, %v2248_v40  ;;  %3083 = vtanh.f32 %v1899_v53 }
 0x3db   : > { %v1952_v47 = vpop.f32.mrf.mxu1  ;;  %3085 = vtanh.f32 %v1948_v32 }
 0x3dc   : > { %v1953_v45 = vadd.f32 %v1952_v47, %v4357_v23  ;;  %3087 = vtanh.f32 %v1902_v18  ;;  %v4458_v47 = vpop.permute.xlu1 %1821 }
 0x3dd   : > { %v1996_v50 = vpop.f32.mrf.mxu2  ;;  %3089 = vtanh.f32 %v1951_v10 }
 0x3de   : > { %v3080_v55 = vpop.eup %3079  ;;  %v2045_v14 = vpop.f32.mrf.mxu3  ;;  %v1997_v3 = vadd.f32 %v1996_v50, %v4353_v0  ;;  %3091 = vtanh.f32 %v1904_v37 }
 0x3df   : > { %v1906_v60 = vpop.f32.mrf.mxu0  ;;  %v3082_v58 = vpop.eup %3081  ;;  %v2251_v17 = vmul.f32 %v3080_v55, %v2176_v16  ;;  %v2046_v15 = vadd.f32 %v2045_v14, %v4353_v0  ;;  %3093 = vtanh.f32 %v1953_v45 }
 0x3e0   : > { %v2252_v9 = vmul.f32 %v3082_v58, %v2176_v16  ;;  %v4425_v16 = vpop.permute.xlu2 %2180  ;;  %v1907_v7 = vadd.f32 %v1906_v60, %v4359_v56  ;;  %v3084_v12 = vpop.eup %3083  ;;  %3095 = vtanh.f32 %v1997_v3 }
 0x3e1   : > { %v4415_v19 = vadd.f32 %v2341_v6, %v2251_v17  ;;  %v3086_v43 = vpop.eup %3085  ;;  %3097 = vtanh.f32 %v2046_v15  ;;  %v4487_v15 = vpop.permute.xlu0 %1826 }
 0x3e2   : > { %v4417_v36 = vadd.f32 %v2362_v28, %v2252_v9  ;;  %v3088_v0 = vpop.eup %3087  ;;  %3099 = vtanh.f32 %v1907_v7  ;;  %v2253_v9 = vmul.f32 %v3084_v12, %v4425_v16  ;;  %v2254_v32 = vmul.f32 %v3086_v43, %v4425_v16 }
 0x3e3   : > { %v1955_v38 = vpop.f32.mrf.mxu1  ;;  %v3090_v40 = vpop.eup %3089 }
 0x3e4   : > { %v1956_v4 = vadd.f32 %v1955_v38, %v4359_v56  ;;  %v3092_v28 = vpop.eup %3091  ;;  %v2258_v7 = vmul.f32 %v3090_v40, %v4429_v46 }
 0x3e5   : > { %v1999_v29 = vpop.f32.mrf.mxu2  ;;  %v2261_v45 = vmul.f32 %v3092_v28, %v4433_v27 }
 0x3e6   : > { %v2048_v24 = vpop.f32.mrf.mxu3  ;;  %v2000_v52 = vadd.f32 %v1999_v29, %v4355_v33  ;;  %3101 = vtanh.f32 %v1956_v4 }
 0x3e7   : > { %v1908_v31 = vpop.f32.mrf.mxu0  ;;  %v2049_v63 = vadd.f32 %v2048_v24, %v4355_v33  ;;  %v3094_v33 = vpop.eup %3093 }
 0x3e8   : > { %v4443_v51 = vpop.permute.xlu2 %2195  ;;  %v1909_v41 = vadd.f32 %v1908_v31, %v4361_v49  ;;  %3103 = vtanh.f32 %v2000_v52  ;;  %v4462_v14 = vpop.eup %3095 }
 0x3e9   : > { %3105 = vtanh.f32 %v2049_v63  ;;  %v4465_v58 = vpop.eup %3097 }
 0x3ea   : > { %3107 = vtanh.f32 %v1909_v41  ;;  %v3100_v24 = vpop.eup %3099  ;;  %v2262_v41 = vmul.f32 %v3094_v33, %v4433_v27 }
 0x3eb   : > { %v1957_v25 = vpop.f32.mrf.mxu1  ;;  %v2265_v43 = vmul.f32 %v3100_v24, %v4443_v51 }
 0x3ec   : > { %v1958_v6 = vadd.f32 %v1957_v25, %v4361_v49  ;;  %v3102_v25 = vpop.eup %3101 }
 0x3ed   : > { %v2001_v62 = vpop.f32.mrf.mxu2 }
 0x3ee   : > { %v4419_v21 = vpop.f32.mrf.mxu3  ;;  %v2002_v55 = vadd.f32 %v2001_v62, %v4357_v23  ;;  %3109 = vtanh.f32 %v1958_v6  ;;  %v2257_v62 = vmul.f32 %v3088_v0, %v4429_v46  ;;  %v4476_v53 = vpop.eup %3103 }
 0x3ef   : > { %v1911_v44 = vpop.f32.mrf.mxu0  ;;  %v4482_v37 = vpop.eup %3105 }
 0x3f0   : > { %v1912_v50 = vadd.f32 %v1911_v44, %v4363_v8  ;;  %v4467_v17 = vpop.permute.xlu2 %2205  ;;  %v3108_v3 = vpop.eup %3107 }
 0x3f1   : > { %v4494_v0 = vpop.permute.xlu1 %2210  ;;  %v2269_v28 = vmul.f32 %v3108_v3, %v4449_v5 }
 0x3f2   : > { %3111 = vtanh.f32 %v1912_v50 }
 0x3f3   : > { %v1960_v20 = vpop.f32.mrf.mxu1  ;;  %3113 = vtanh.f32 %v2002_v55 }
 0x3f4   : > { %v1961_v38 = vadd.f32 %v1960_v20, %v4363_v8  ;;  %v3110_v12 = vpop.eup %3109 }
 0x3f5   : > { %v4421_v2 = vpop.f32.mrf.mxu2 }
 0x3f6   : > { %v4423_v22 = vpop.f32.mrf.mxu3 }
 0x3f7   : > { %v1913_v11 = vpop.f32.mrf.mxu0 }
 0x3f8   : > { %v1914_v60 = vadd.f32 %v1913_v11, %v4366_v61  ;;  %v3112_v63 = vpop.eup %3111 }
 0x3f9   : > { %v4499_v40 = vpop.eup %3113 }
 0x3fa   : > { %3115 = vtanh.f32 %v1914_v60 }
 0x3fb   : > { %v1962_v59 = vpop.f32.mrf.mxu1  ;;  %3117 = vtanh.f32 %v1961_v38  ;;  %v2273_v38 = vmul.f32 %v3112_v63, %v4467_v17  ;;  %v2255_v63 = vmul.f32 %v4462_v14, %v4425_v16 }
 0x3fc   : > { %v1963_v44 = vadd.f32 %v1962_v59, %v4366_v61 }
 0x3fd   : > { %v4436_v54 = vpop.f32.mrf.mxu2 }
 0x3fe   : > { %v4439_v35 = vpop.f32.mrf.mxu3 }
 0x3ff   : > { %v1916_v26 = vpop.f32.mrf.mxu0 }
 0x400   : > { %v1917_v31 = vadd.f32 %v1916_v26, %v4368_v39  ;;  %v2301_v26 = vadd.f32 %v4405_v48, %v2253_v9  ;;  %v2051_v48 = vadd.f32 %v4419_v21, %v4357_v23  ;;  %v3116_v55 = vpop.eup %3115  ;;  %v2266_v21 = vmul.f32 %v3102_v25, %v4443_v51  ;;  %v4504_v9 = vpop.permute.xlu2 %2215 }
 0x402   : > { %3119 = vtanh.f32 %v1917_v31  ;;  %v2302_v52 = vadd.f32 %v2301_v26, %v2257_v62  ;;  %v2054_v26 = vadd.f32 %v4423_v22, %v4359_v56 }
 0x403   : > { %v1965_v1 = vpop.f32.mrf.mxu1  ;;  %3121 = vtanh.f32 %v1963_v44  ;;  %v2270_v44 = vmul.f32 %v3110_v12, %v4449_v5 }
 0x404   : > { %v1966_v59 = vadd.f32 %v1965_v1, %v4368_v39  ;;  %v2322_v1 = vadd.f32 %v4408_v42, %v2254_v32  ;;  %v2303_v6 = vadd.f32 %v2302_v52, %v2261_v45  ;;  %v3118_v42 = vpop.eup %3117  ;;  %v2277_v45 = vmul.f32 %v3116_v55, %v4494_v0 }
 0x405   : > { %v4452_v57 = vpop.f32.mrf.mxu2 }
 0x406   : > { %v4455_v34 = vpop.f32.mrf.mxu3  ;;  %v2323_v23 = vadd.f32 %v2322_v1, %v2258_v7  ;;  %v2304_v33 = vadd.f32 %v2303_v6, %v2265_v43  ;;  %v2274_v7 = vmul.f32 %v3118_v42, %v4467_v17  ;;  %v2056_v43 = vadd.f32 %v4439_v35, %v4361_v49 }
 0x407   : > { %v1918_v13 = vpop.f32.mrf.mxu0  ;;  %v2256_v1 = vmul.f32 %v4465_v58, %v4425_v16  ;;  %v2010_v14 = vadd.f32 %v4452_v57, %v4363_v8 }
 0x408   : > { %v1919_v20 = vadd.f32 %v1918_v13, %v4373_v30  ;;  %v3120_v31 = vpop.eup %3119  ;;  %v2324_v62 = vadd.f32 %v2323_v23, %v2262_v41 }
 0x40a   : > { %3123 = vtanh.f32 %v1919_v20  ;;  %v3122_v20 = vpop.eup %3121  ;;  %v2325_v3 = vadd.f32 %v2324_v62, %v2266_v21 }
 0x40b   : > { %v1967_v29 = vpop.f32.mrf.mxu1  ;;  %3125 = vtanh.f32 %v1966_v59  ;;  %v2278_v6 = vmul.f32 %v3122_v20, %v4494_v0 }
 0x40c   : > { %v1968_v13 = vadd.f32 %v1967_v29, %v4373_v30  ;;  %v2005_v29 = vadd.f32 %v4421_v2, %v4359_v56  ;;  %v2281_v56 = vmul.f32 %v3120_v31, %v4504_v9  ;;  %v2326_v41 = vadd.f32 %v2325_v3, %v2270_v44 }
 0x40d   : > { %v4474_v11 = vpop.f32.mrf.mxu2 }
 0x40e   : > { %v4480_v18 = vpop.f32.mrf.mxu3  ;;  %v2327_v55 = vadd.f32 %v2326_v41, %v2274_v7 }
 0x40f   : > { %v1921_v10 = vpop.f32.mrf.mxu0 }
 0x410   : > { %v1922_v4 = vadd.f32 %v1921_v10, %v4458_v47  ;;  %v2305_v10 = vadd.f32 %v2304_v33, %v2269_v28  ;;  %v3124_v2 = vpop.eup %3123  ;;  %v2259_v33 = vmul.f32 %v4476_v53, %v4429_v46  ;;  %v2328_v57 = vadd.f32 %v2327_v55, %v2278_v6 }
 0x411   : > { %v3126_v12 = vpop.eup %3125  ;;  %v2364_v53 = vadd.f32 %v4417_v36, %v2256_v1 }
 0x412   : > { %3127 = vtanh.f32 %v1922_v4  ;;  %v2007_v4 = vadd.f32 %v4436_v54, %v4361_v49  ;;  %v2306_v52 = vadd.f32 %v2305_v10, %v2273_v38  ;;  %v2282_v23 = vmul.f32 %v3126_v12, %v4504_v9  ;;  %v4546_v10 = vpop.permute.xlu2 %2230 }
 0x413   : > { %v1970_v50 = vpop.f32.mrf.mxu1  ;;  %3129 = vtanh.f32 %v2051_v48  ;;  %v4524_v48 = vpop.permute.xlu0 %2220  ;;  %v2059_v38 = vadd.f32 %v4455_v34, %v4363_v8  ;;  %v2061_v8 = vadd.f32 %v4480_v18, %v4366_v61 }
 0x414   : > { %v1971_v60 = vadd.f32 %v1970_v50, %v4458_v47  ;;  %3131 = vtanh.f32 %v1968_v13  ;;  %v2307_v13 = vadd.f32 %v2306_v52, %v2277_v45  ;;  %v2285_v49 = vmul.f32 %v3124_v2, %v4524_v48  ;;  %v4532_v50 = vpop.permute.xlu1 %2225 }
 0x415   : > { %v4509_v24 = vpop.f32.mrf.mxu2  ;;  %v2329_v45 = vadd.f32 %v2328_v57, %v2282_v23 }
 0x416   : > { %v4512_v25 = vpop.f32.mrf.mxu3  ;;  %3133 = vtanh.f32 %v1971_v60  ;;  %v2308_v58 = vadd.f32 %v2307_v13, %v2281_v56 }
 0x417   : > { %v1923_v32 = vpop.f32.mrf.mxu0  ;;  %3135 = vtanh.f32 %v2005_v29 }
 0x418   : > { %v1924_v59 = vadd.f32 %v1923_v32, %v4487_v15  ;;  %v3128_v22 = vpop.eup %3127  ;;  %v2309_v62 = vadd.f32 %v2308_v58, %v2285_v49  ;;  %v2012_v32 = vadd.f32 %v4474_v11, %v4366_v61  ;;  %v2064_v61 = vadd.f32 %v4512_v25, %v4368_v39 }
 0x419   : > { %v3130_v54 = vpop.eup %3129  ;;  %v2289_v21 = vmul.f32 %v3128_v22, %v4532_v50 }
 0x41a   : > { %3137 = vtanh.f32 %v1924_v59  ;;  %v3132_v28 = vpop.eup %3131  ;;  %v2264_v56 = vmul.f32 %v3130_v54, %v4433_v27 }
 0x41b   : > { %3139 = vtanh.f32 %v2054_v26  ;;  %v1972_v35 = vpop.f32.mrf.mxu1  ;;  %v2286_v44 = vmul.f32 %v3132_v28, %v4524_v48  ;;  %v2343_v26 = vadd.f32 %v4415_v19, %v2255_v63  ;;  %v2310_v59 = vadd.f32 %v2309_v62, %v2289_v21  ;;  %v2385_v21 = vpop.permute.xlu0 %2384 }
 0x41c   : > { %3141 = vtanh.f32 %v2007_v4  ;;  %v1973_v16 = vadd.f32 %v1972_v35, %v4487_v15  ;;  %v3134_v42 = vpop.eup %3133  ;;  %v2260_v4 = vmul.f32 %v4482_v37, %v4429_v46  ;;  %v2015_v19 = vadd.f32 %v4509_v24, %v4368_v39 }
 0x41d   : > { %3143 = vtanh.f32 %v2056_v43  ;;  %v2016_v60 = vpop.f32.mrf.mxu2  ;;  %v3136_v31 = vpop.eup %3135  ;;  %v2290_v2 = vmul.f32 %v3134_v42, %v4532_v50  ;;  %v2344_v11 = vadd.f32 %v2343_v26, %v2259_v33  ;;  %v2330_v12 = vadd.f32 %v2329_v45, %v2286_v44 }
 0x41e   : > { %3145 = vtanh.f32 %v1973_v16  ;;  %v2065_v29 = vpop.f32.mrf.mxu3  ;;  %v2263_v43 = vmul.f32 %v4499_v40, %v4433_v27  ;;  %v2017_v46 = vadd.f32 %v2016_v60, %v4373_v30  ;;  %v2365_v13 = vadd.f32 %v2364_v53, %v2260_v4 }
 0x41f   : > { %3147 = vtanh.f32 %v2010_v14  ;;  %v2331_v37 = vadd.f32 %v2330_v12, %v2290_v2  ;;  %v2066_v63 = vadd.f32 %v2065_v29, %v4373_v30  ;;  %v2267_v39 = vmul.f32 %v3136_v31, %v4443_v51 }
 0x420   : > { %v3138_v20 = vpop.eup %3137  ;;  %3149 = vtanh.f32 %v2059_v38  ;;  %v2345_v35 = vadd.f32 %v2344_v11, %v2263_v43  ;;  %v2366_v14 = vadd.f32 %v2365_v13, %v2264_v56 }
 0x421   : > { %v3140_v34 = vpop.eup %3139  ;;  %v2293_v3 = vmul.f32 %v3138_v20, %v4546_v10  ;;  %3151 = vtanh.f32 %v2012_v32  ;;  %v4575_v32 = vperm.slane %v2385_v21, 0 }
 0x422   : > { %v3142_v7 = vpop.eup %3141  ;;  %3153 = vtanh.f32 %v2061_v8  ;;  %v2268_v28 = vmul.f32 %v3140_v34, %v4443_v51  ;;  %v2346_v60 = vadd.f32 %v2345_v35, %v2267_v39 }
 0x423   : > { %v3144_v36 = vpop.eup %3143  ;;  %v2311_v18 = vadd.f32 %v2310_v59, %v2293_v3  ;;  %3155 = vtanh.f32 %v2015_v19  ;;  %v2271_v30 = vmul.f32 %v3142_v7, %v4449_v5 }
 0x424   : > { %v3146_v52 = vpop.eup %3145  ;;  %3157 = vtanh.f32 %v2064_v61  ;;  %v2272_v42 = vmul.f32 %v3144_v36, %v4449_v5  ;;  %v2367_v29 = vadd.f32 %v2366_v14, %v2268_v28 }
 0x425   : > { %v2312_v22 = vrot.slane %v2311_v18, 4  ;;  %v2294_v24 = vmul.f32 %v3146_v52, %v4546_v10  ;;  %v2019_v1 = vpop.f32.mrf.mxu2  ;;  %v3148_v41 = vpop.eup %3147  ;;  %3159 = vtanh.f32 %v2017_v46  ;;  %v2347_v31 = vadd.f32 %v2346_v60, %v2271_v30 }
 0x426   : > { %v2020_v25 = vadd.f32 %v2019_v1, %v4458_v47  ;;  %v2068_v40 = vpop.f32.mrf.mxu3  ;;  %v3150_v49 = vpop.eup %3149  ;;  %3161 = vtanh.f32 %v2066_v63  ;;  %v2275_v33 = vmul.f32 %v3148_v41, %v4467_v17  ;;  %v2368_v8 = vadd.f32 %v2367_v29, %v2272_v42 }
 0x427   : > { %v2313_v27 = vadd.f32 %v2312_v22, %v2311_v18  ;;  %v2332_v54 = vadd.f32 %v2331_v37, %v2294_v24  ;;  %v2069_v6 = vadd.f32 %v2068_v40, %v4458_v47  ;;  %v3152_v55 = vpop.eup %3151  ;;  %v2276_v57 = vmul.f32 %v3150_v49, %v4467_v17 }
 0x428   : > { %v3154_v23 = vpop.eup %3153  ;;  %3163 = vtanh.f32 %v2020_v25  ;;  %v2279_v62 = vmul.f32 %v3152_v55, %v4494_v0  ;;  %v2348_v34 = vadd.f32 %v2347_v31, %v2275_v33 }
 0x429   : > { %v2314_v16 = vrot.slane %v2313_v27, 2  ;;  %v2333_v58 = vrot.slane %v2332_v54, 4  ;;  %3165 = vtanh.f32 %v2069_v6  ;;  %v3156_v51 = vpop.eup %3155  ;;  %v2280_v45 = vmul.f32 %v3154_v23, %v4494_v0 }
 0x42a   : > { %v3158_v44 = vpop.eup %3157  ;;  %v2283_v7 = vmul.f32 %v3156_v51, %v4504_v9  ;;  %v2369_v36 = vadd.f32 %v2368_v8, %v2276_v57  ;;  %v2349_v12 = vadd.f32 %v2348_v34, %v2279_v62 }
 0x42b   : > { %v2315_v47 = vadd.f32 %v2314_v16, %v2313_v27  ;;  %v2334_v38 = vadd.f32 %v2333_v58, %v2332_v54  ;;  %v3160_v5 = vpop.eup %3159  ;;  %v2284_v61 = vmul.f32 %v3158_v44, %v4504_v9 }
 0x42c   : > { %v3162_v3 = vpop.eup %3161  ;;  %v2287_v43 = vmul.f32 %v3160_v5, %v4524_v48  ;;  %v2370_v56 = vadd.f32 %v2369_v36, %v2280_v45  ;;  %v2350_v37 = vadd.f32 %v2349_v12, %v2283_v7 }
 0x42d   : > { %v2316_v20 = vrot.slane %v2315_v47, 1  ;;  %v2335_v26 = vrot.slane %v2334_v38, 2  ;;  %v2021_v53 = vpop.f32.mrf.mxu2  ;;  %v2288_v46 = vmul.f32 %v3162_v3, %v4524_v48 }
 0x42e   : > { %v2022_v59 = vadd.f32 %v2021_v53, %v4487_v15  ;;  %v2070_v2 = vpop.f32.mrf.mxu3  ;;  %v3164_v19 = vpop.eup %3163  ;;  %v2371_v63 = vadd.f32 %v2370_v56, %v2284_v61  ;;  %v2351_v13 = vadd.f32 %v2350_v37, %v2287_v43 }
 0x42f   : > { %v2317_v17 = vadd.f32 %v2316_v20, %v2315_v47  ;;  %v2336_v11 = vadd.f32 %v2335_v26, %v2334_v38  ;;  %v2071_v4 = vadd.f32 %v2070_v2, %v4487_v15  ;;  %v3166_v18 = vpop.eup %3165  ;;  %v2291_v24 = vmul.f32 %v3164_v19, %v4532_v50 }
 0x430   : > { %3167 = vtanh.f32 %v2022_v59  ;;  %v2292_v9 = vmul.f32 %v3166_v18, %v4532_v50  ;;  %v2372_v25 = vadd.f32 %v2371_v63, %v2288_v46 }
 0x431   : > { %v4583_v52 = vadd.f32 %v4575_v32, %v2317_v17  ;;  %v2337_v0 = vrot.slane %v2336_v11, 1  ;;  %3169 = vtanh.f32 %v2071_v4  ;;  %v2352_v54 = vadd.f32 %v2351_v13, %v2291_v24 }
 0x432   : > { %v2373_v49 = vadd.f32 %v2372_v25, %v2292_v9 }
 0x433   : > { %v2396_v15 = vand.u32 2147483647, %v4583_v52  ;;  %v2338_v22 = vadd.f32 %v2337_v0, %v2336_v11 }
 0x435   : > { %v2400_v1 = vsub.f32 0.0, %v2396_v15  ;;  %v4591_v41 = vadd.f32 %v4575_v32, %v2338_v22 }
 0x436   : > { %v3168_v39 = vpop.eup %3167 }
 0x437   : > { %v3170_v40 = vpop.eup %3169  ;;  %v2404_v27 = vmul.f32 1.442695, %v2400_v1  ;;  %v2397_v48 = vand.u32 2147483647, %v4591_v41  ;;  %v2295_v6 = vmul.f32 %v3168_v39, %v4546_v10  ;;  %v2393_v18 = vmax.f32 %v4591_v41, 0.0 }
 0x438   : > { %v2296_v35 = vmul.f32 %v3170_v40, %v4546_v10 }
 0x439   : > { %3171 = vpow2.f32 %v2404_v27  ;;  %v2401_v28 = vsub.f32 0.0, %v2397_v48  ;;  %v2353_v50 = vadd.f32 %v2352_v54, %v2295_v6 }
 0x43a   : > { %v2374_v30 = vadd.f32 %v2373_v49, %v2296_v35 }
 0x43b   : > { %v2406_v55 = vmul.f32 1.442695, %v2401_v28  ;;  %v2354_v14 = vrot.slane %v2353_v50, 4 }
 0x43c   : > { %v2375_v16 = vrot.slane %v2374_v30, 4 }
 0x43d   : > { %3173 = vpow2.f32 %v2406_v55  ;;  %v2355_v58 = vadd.f32 %v2354_v14, %v2353_v50 }
 0x43e   : > { %v2376_v23 = vadd.f32 %v2375_v16, %v2374_v30  ;;  %v2466_v16 = vlaneseq }
 0x43f   : > { %v3172_v21 = vpop.eup %3171  ;;  %v2356_v60 = vrot.slane %v2355_v58, 2 }
 0x440   : > { %v2412_v42 = vadd.f32 1.0, %v3172_v21  ;;  %v2377_v33 = vrot.slane %v2376_v23, 2  ;;  %v2415_v10 = vmul.f32 -0.5, %v3172_v21  ;;  %v2418_v59 = vand.u32 2147483647, %v3172_v21 }
 0x441   : > { %v2357_v47 = vadd.f32 %v2356_v60, %v2355_v58  ;;  %vm2468_vm7 = vcmp.lt.s32.totalorder %v2466_v16, 512 }
 0x442   : > { %3175 = vlog2.f32 %v2412_v42  ;;  %v2378_v38 = vadd.f32 %v2377_v33, %v2376_v23  ;;  %v2416_v5 = vadd.f32 1.0, %v2415_v10  ;;  %vm2419_vm0 = vcmp.lt.f32.partialorder %v2418_v59, 0.0004427343 }
 0x443   : > { %v3174_v51 = vpop.eup %3173  ;;  %v2358_v29 = vrot.slane %v2357_v47, 1 }
 0x444   : > { %v2421_v31 = vadd.f32 1.0, %v3174_v51  ;;  %v2424_v57 = vmul.f32 -0.5, %v3174_v51  ;;  %v2379_v44 = vrot.slane %v2378_v38, 1  ;;  %v2427_v2 = vand.u32 2147483647, %v3174_v51 }
 0x445   : > { %v2359_v62 = vadd.f32 %v2358_v29, %v2357_v47  ;;  %v2417_v4 = vmul.f32 %v3172_v21, %v2416_v5 }
 0x446   : > { %3177 = vlog2.f32 %v2421_v31  ;;  %v2380_v26 = vadd.f32 %v2379_v44, %v2378_v38  ;;  %v2425_v8 = vadd.f32 1.0, %v2424_v57  ;;  %vm2428_vm1 = vcmp.lt.f32.partialorder %v2427_v2, 0.0004427343 }
 0x447   : > { %v2390_v20 = vadd.f32 %v4575_v32, %v2359_v62 }
 0x448   : > { %v3176_v53 = vpop.eup %3175  ;;  %v2391_v45 = vadd.f32 %v4575_v32, %v2380_v26  ;;  %v2426_v36 = vmul.f32 %v3174_v51, %v2425_v8  ;;  %v2392_v32 = vmax.f32 %v4583_v52, 0.0 }
 0x449   : > { %v2398_v34 = vand.u32 2147483647, %v2390_v20  ;;  %v2414_v3 = vmul.f32 0.6931472, %v3176_v53  ;;  %v2394_v49 = vmax.f32 %v2390_v20, 0.0 }
 0x44a   : > { %v2399_v17 = vand.u32 2147483647, %v2391_v45  ;;  %v2395_v55 = vmax.f32 %v2391_v45, 0.0 }
 0x44b   : > { %v2402_v7 = vsub.f32 0.0, %v2398_v34  ;;  %v2420_v0 = vsel %vm2419_vm0, %v2417_v4, %v2414_v3 }
 0x44c   : > { %v3178_v11 = vpop.eup %3177  ;;  %v2403_v61 = vsub.f32 0.0, %v2399_v17  ;;  %v2448_v37 = vadd.f32 %v2420_v0, %v2392_v32 }
 0x44d   : > { %v2423_v19 = vmul.f32 0.6931472, %v3178_v11  ;;  %v2408_v12 = vmul.f32 1.442695, %v2402_v7 }
 0x44e   : > { %v2410_v56 = vmul.f32 1.442695, %v2403_v61 }
 0x44f   : > { %v2429_v43 = vsel %vm2428_vm1, %v2426_v36, %v2423_v19  ;;  %3179 = vpow2.f32 %v2408_v12 }
 0x450   : > { %v2449_v46 = vadd.f32 %v2429_v43, %v2393_v18  ;;  %3181 = vpow2.f32 %v2410_v56 }
 0x452   : > { %v2456_v15 = vrot.slane %v2449_v46, 7 }
 0x454   : > { %v2460_v22 = vsel %vm2459_vm2, %v2448_v37, %v2456_v15 }
 0x455   : > { %v3180_v24 = vpop.eup %3179 }
 0x456   : > { %v2430_v63 = vadd.f32 1.0, %v3180_v24  ;;  %v3182_v9 = vpop.eup %3181  ;;  %v2433_v1 = vmul.f32 -0.5, %v3180_v24  ;;  %v2436_v25 = vand.u32 2147483647, %v3180_v24 }
 0x457   : > { %v2439_v13 = vadd.f32 1.0, %v3182_v9  ;;  %v2442_v41 = vmul.f32 -0.5, %v3182_v9  ;;  %v2445_v48 = vand.u32 2147483647, %v3182_v9 }
 0x458   : > { %3183 = vlog2.f32 %v2430_v63  ;;  %v2434_v39 = vadd.f32 1.0, %v2433_v1  ;;  %vm2437_vm3 = vcmp.lt.f32.partialorder %v2436_v25, 0.0004427343 }
 0x459   : > { %3185 = vlog2.f32 %v2439_v13  ;;  %v2443_v40 = vadd.f32 1.0, %v2442_v41  ;;  %vm2446_vm4 = vcmp.lt.f32.partialorder %v2445_v48, 0.0004427343 }
 0x45a   : > { %v2435_v54 = vmul.f32 %v3180_v24, %v2434_v39 }
 0x45b   : > { %v2444_v50 = vmul.f32 %v3182_v9, %v2443_v40 }
 0x45e   : > { %v3184_v27 = vpop.eup %3183 }
 0x45f   : > { %v2432_v52 = vmul.f32 0.6931472, %v3184_v27  ;;  %v3186_v6 = vpop.eup %3185 }
 0x460   : > { %v2441_v28 = vmul.f32 0.6931472, %v3186_v6 }
 0x461   : > { %v2438_v35 = vsel %vm2437_vm3, %v2435_v54, %v2432_v52 }
 0x462   : > { %v2450_v30 = vadd.f32 %v2438_v35, %v2394_v49  ;;  %v2447_v14 = vsel %vm2446_vm4, %v2444_v50, %v2441_v28 }
 0x463   : > { %v2451_v23 = vadd.f32 %v2447_v14, %v2395_v55 }
 0x464   : > { %v2457_v58 = vrot.slane %v2450_v30, 6 }
 0x465   : > { %v2458_v21 = vrot.slane %v2451_v23, 5 }
 0x467   : > { %v2462_v60 = vsel %vm2461_vm5, %v2457_v58, %v2458_v21 }
 0x468   : > { %v2464_v42 = vsel %vm2463_vm6, %v2460_v22, %v2462_v60 }
 0x469   : > { %2470 = vst.msk [vmem:[%s385_s13] sm:$0xf] %vm2468_vm7, %v2464_v42 }
 0x46a PF: > { %s23_s19 = sadd.s32 1, %s3193_s19  }
 0x46b   : > { %p20_p4 = scmp.ge.s32.totalorder %s23_s19, 4  }
 0x46d   :  { %22 = sbr.rel (!%p20_p4) target bundleno = 3 (0x3), region = 94 }

// kernel: _forward.1
= control target key start
LH: loop header
LB: loop body
LE: loop exit
PB: predicated region body
PF: predicated region fallthrough
CT: control target
= control target key end

     0   :  { %s3259_s19 = smov 0   ;;  %s4607_s0 = inlined_call_operand.vmem [shape: f32[1,1024], index: 0, kind: input, shape index: {}]   ;;  %s4608_s1 = inlined_call_operand.vmem [shape: f32[128,1], index: 1, kind: input, shape index: {}]   ;;  %s4609_s2 = inlined_call_operand.vmem [shape: f32[128,1], index: 2, kind: input, shape index: {}]   ;;  %s4610_s3 = inlined_call_operand.vmem [shape: bf16[128,128], index: 3, kind: input, shape index: {}]   ;;  %s4611_s4 = inlined_call_operand.vmem [shape: f32[128,1], index: 4, kind: input, shape index: {}]   ;;  %s4612_s5 = inlined_call_operand.vmem [shape: bf16[128,128], index: 5, kind: input, shape index: {}]   ;;  %s4613_s6 = inlined_call_operand.vmem [shape: f32[128,1], index: 6, kind: input, shape index: {}]   ;;  %s4614_s7 = inlined_call_operand.vmem [shape: bf16[128,128], index: 7, kind: input, shape index: {}]   ;;  %s4615_s8 = inlined_call_operand.vmem [shape: f32[128,1], index: 8, kind: input, shape index: {}]   ;;  %s4616_s9 = inlined_call_operand.vmem [shape: f32[128,1], index: 9, kind: input, shape index: {}]   ;;  %s4617_s10 = inlined_call_operand.<no memory space> [shape: f32[1,1], index: 10, kind: input, shape index: {}]   ;;  %s4618_s11 = inlined_call_operand.vmem [shape: f32[1,1024], index: 11, kind: output, shape index: {}]  }
   0x1   :  { %v16_v0 = vstv %s4617_s10 }
   0x2   :  { %17 = vst [vmem:[#allocation2] sm:$0x1] %v16_v0 }
   0x3 LB: > { %s2518_s20 = sadd.s32 4294967295, %s3193_s19   ;;  %p2522_p0 = scmp.ge.s32.totalorder %s3193_s19, 1  ;;  %s3193_s19 = sphi %s3259_s19, %s23_s19  }
   0x4   : > { %p339_p1 = scmp.lt.s32.totalorder %s3193_s19, 3 }
   0x6   : > { %p340_p2 = pnand %p2522_p0, %p339_p1 }
   0x8   : > { %343 = sbr.rel (%p340_p2) target bundleno = 1130 (0x46a), region = 64 }
   0xd   : > { %v571_v1 = vld [vmem:[%s4609_s2 + $0x70] sm:$0xff]  ;;  %v400_v3 = vld [vmem:[%s4608_s1 + $0x60] sm:$0xff]  ;;  %v3195_v4 = vmov 0   ;;  %v572_v5 = vld [vmem:[%s4609_s2 + $0x78] sm:$0xff]  ;;  %s2523_s26 = sshll.u32 %s2518_s20, 2  ;;  %vm2459_vm2 = vcmask 1040384  }
   0xe   : > { %v402_v2 = vld [vmem:[%s4608_s1 + $0x70] sm:$0xff]  ;;  %2658 = vset.pattern.permute.xlu2 %v3195_v4  ;;  %2657 = vset.pattern.permute.xlu1 %v3195_v4  ;;  %v403_v6 = vld [vmem:[%s4608_s1 + $0x78] sm:$0xff]  ;;  %v401_v7 = vld [vmem:[%s4608_s1 + $0x68] sm:$0xff]  ;;  %p378_p3 = scmp.lt.s32.totalorder %s2523_s26, 7  ;;  %vm2461_vm5 = vcmask 1042434   ;;  %vm2463_vm6 = vcmask 1041408  }
   0xf   : > { %2656 = vset.pattern.permute.xlu0 %v3195_v4  ;;  %645 = vperm.xlu1 %2657, %v571_v1   ;;  %v570_v8 = vld [vmem:[%s4609_s2 + $0x68] sm:$0xff]  ;;  %v569_v9 = vld [vmem:[%s4609_s2 + $0x60] sm:$0xff]  ;;  %v398_v10 = vld [vmem:[%s4608_s1 + $0x50] sm:$0xff] }
  0x10   : > { %476 = vperm.xlu0 %2656, %v402_v2   ;;  %466 = vperm.xlu2 %2658, %v400_v3   ;;  %v567_v11 = vld [vmem:[%s4609_s2 + $0x50] sm:$0xff]  ;;  %v399_v12 = vld [vmem:[%s4608_s1 + $0x58] sm:$0xff]  ;;  %v397_v14 = vld [vmem:[%s4608_s1 + $0x48] sm:$0xff]  ;;  %s4710_s26 = smov (!%p378_p3, %s2523_s26), 7 }
  0x11   : > { %v568_v13 = vld [vmem:[%s4609_s2 + $0x58] sm:$0xff]  ;;  %v565_v15 = vld [vmem:[%s4609_s2 + $0x40] sm:$0xff]  ;;  %v394_v17 = vld [vmem:[%s4608_s1 + $0x30] sm:$0xff]  ;;  %s380_s15 = scalar_lea.vmem %s4607_s0, %s4710_s26  ;;  %s385_s13 = scalar_lea.vmem %s4618_s11, %s4710_s26 }
  0x12   : > { %v396_v16 = vld [vmem:[%s4608_s1 + $0x40] sm:$0xff]  ;;  %v566_v18 = vld [vmem:[%s4609_s2 + $0x48] sm:$0xff]  ;;  %v395_v19 = vld [vmem:[%s4608_s1 + $0x38] sm:$0xff] }
  0x13   : > { %v564_v20 = vld [vmem:[%s4609_s2 + $0x38] sm:$0xff]  ;;  %v563_v21 = vld [vmem:[%s4609_s2 + $0x30] sm:$0xff]  ;;  %v392_v22 = vld [vmem:[%s4608_s1 + $0x20] sm:$0xff] }
  0x14   : > { %v561_v23 = vld [vmem:[%s4609_s2 + $0x20] sm:$0xff]  ;;  %v393_v24 = vld [vmem:[%s4608_s1 + $0x28] sm:$0xff]  ;;  %v391_v26 = vld [vmem:[%s4608_s1 + $0x18] sm:$0xff] }
  0x15   : > { %v562_v25 = vld [vmem:[%s4609_s2 + $0x28] sm:$0xff]  ;;  %v559_v27 = vld [vmem:[%s4609_s2 + $0x10] sm:$0xff]  ;;  %v388_v29 = vld [vmem:[%s4608_s1] sm:$0xff] }
  0x16   : > { %v390_v28 = vld [vmem:[%s4608_s1 + $0x10] sm:$0xff]  ;;  %v560_v30 = vld [vmem:[%s4609_s2 + $0x18] sm:$0xff]  ;;  %v389_v31 = vld [vmem:[%s4608_s1 + $0x8] sm:$0xff] }
  0x17   : > { %650 = vperm.xlu1 %2657, %v572_v5   ;;  %v558_v32 = vld [vmem:[%s4609_s2 + $0x8] sm:$0xff]  ;;  %v557_v33 = vld [vmem:[%s4609_s2] sm:$0xff]  ;;  %v843_v34 = vld [vmem:[%s4611_s4 + $0x70] sm:$0xff] }
  0x18   : > { %481 = vperm.xlu0 %2656, %v403_v6   ;;  %471 = vperm.xlu2 %2658, %v401_v7   ;;  %v841_v35 = vld [vmem:[%s4611_s4 + $0x60] sm:$0xff]  ;;  %v844_v36 = vld [vmem:[%s4611_s4 + $0x78] sm:$0xff]  ;;  %v842_v37 = vld [vmem:[%s4611_s4 + $0x68] sm:$0xff] }
  0x19   : > { %v840_v38 = vld [vmem:[%s4611_s4 + $0x58] sm:$0xff]  ;;  %v839_v39 = vld [vmem:[%s4611_s4 + $0x50] sm:$0xff]  ;;  %v837_v40 = vld [vmem:[%s4611_s4 + $0x40] sm:$0xff] }
  0x1a   : > { %v835_v42 = vld [vmem:[%s4611_s4 + $0x30] sm:$0xff]  ;;  %v838_v43 = vld [vmem:[%s4611_s4 + $0x48] sm:$0xff]  ;;  %v836_v44 = vld [vmem:[%s4611_s4 + $0x38] sm:$0xff] }
  0x1b   : > { %v834_v45 = vld [vmem:[%s4611_s4 + $0x28] sm:$0xff]  ;;  %v387_v46 = vld [vmem:[%s380_s15] sm:$0xf]  ;;  %v831_v49 = vld [vmem:[%s4611_s4 + $0x10] sm:$0xff] }
  0x1c   : > { %v833_v48 = vld [vmem:[%s4611_s4 + $0x20] sm:$0xff]  ;;  %v3412_v50 = vperm.slane %v387_v46, 0  ;;  %v3414_v51 = vperm.slane %v387_v46, 1  ;;  %v3416_v53 = vperm.slane %v387_v46, 2  ;;  %v832_v58 = vld [vmem:[%s4611_s4 + $0x18] sm:$0xff]  ;;  %v830_v59 = vld [vmem:[%s4611_s4 + $0x8] sm:$0xff] }
  0x1d   : > { %v829_v56 = vld [vmem:[%s4611_s4] sm:$0xff]  ;;  %v3430_v61 = vperm.slane %v387_v46, 3 }
  0x1f   : > { %640 = vperm.xlu1 %2657, %v570_v8   ;;  %v1296_v8 = vld [vmem:[%s4613_s6 + $0x78] sm:$0xff] }
  0x20   : > { %635 = vperm.xlu0 %2656, %v569_v9   ;;  %456 = vperm.xlu2 %2658, %v398_v10   ;;  %v1295_v9 = vld [vmem:[%s4613_s6 + $0x70] sm:$0xff]  ;;  %v1293_v10 = vld [vmem:[%s4613_s6 + $0x60] sm:$0xff] }
  0x27   : > { %625 = vperm.xlu1 %2657, %v567_v11  }
  0x28   : > { %461 = vperm.xlu0 %2656, %v399_v12   ;;  %630 = vperm.xlu2 %2658, %v568_v13  }
  0x2f   : > { %451 = vperm.xlu1 %2657, %v397_v14  }
  0x30   : > { %615 = vperm.xlu2 %2658, %v565_v15   ;;  %446 = vperm.xlu0 %2656, %v396_v16  }
  0x37   : > { %436 = vperm.xlu1 %2657, %v394_v17  }
  0x38   : > { %620 = vperm.xlu0 %2656, %v566_v18   ;;  %441 = vperm.xlu2 %2658, %v395_v19  }
  0x3f   : > { %610 = vperm.xlu1 %2657, %v564_v20  }
  0x40   : > { %605 = vperm.xlu0 %2656, %v563_v21   ;;  %426 = vperm.xlu2 %2658, %v392_v22  }
  0x47   : > { %595 = vperm.xlu1 %2657, %v561_v23  }
  0x48   : > { %431 = vperm.xlu0 %2656, %v393_v24   ;;  %600 = vperm.xlu2 %2658, %v562_v25  }
  0x4f   : > { %421 = vperm.xlu1 %2657, %v391_v26  }
  0x50   : > { %585 = vperm.xlu2 %2658, %v559_v27   ;;  %416 = vperm.xlu0 %2656, %v390_v28  }
  0x57   : > { %406 = vperm.xlu1 %2657, %v388_v29  }
  0x58   : > { %590 = vperm.xlu0 %2656, %v560_v30   ;;  %411 = vperm.xlu2 %2658, %v389_v31  }
  0x5f   : > { %580 = vperm.xlu1 %2657, %v558_v32  }
  0x60   : > { %575 = vperm.xlu0 %2656, %v557_v33   ;;  %917 = vperm.xlu2 %2658, %v843_v34   ;;  %v1291_v34 = vld [vmem:[%s4613_s6 + $0x50] sm:$0xff] }
  0x67   : > { %907 = vperm.xlu1 %2657, %v841_v35  }
  0x68   : > { %922 = vperm.xlu0 %2656, %v844_v36   ;;  %912 = vperm.xlu2 %2658, %v842_v37  }
  0x6a   : > { %v3386_v41 = vpop.permute.xlu2 %466 }
  0x6b   : > { %v541_v22 = vmul.f32 %v3412_v50, %v3386_v41  ;;  %v542_v28 = vmul.f32 %v3414_v51, %v3386_v41  ;;  %v543_v31 = vmul.f32 %v3416_v53, %v3386_v41  ;;  %v544_v36 = vmul.f32 %v3430_v61, %v3386_v41 }
  0x6f   : > { %902 = vperm.xlu1 %2657, %v840_v38   ;;  %v1294_v38 = vld [vmem:[%s4613_s6 + $0x68] sm:$0xff] }
  0x70   : > { %897 = vperm.xlu0 %2656, %v839_v39   ;;  %887 = vperm.xlu2 %2658, %v837_v40   ;;  %v1292_v39 = vld [vmem:[%s4613_s6 + $0x58] sm:$0xff] }
  0x72   : > { %v472_v47 = vpop.permute.xlu2 %471 }
  0x73   : > { %v545_v15 = vmul.f32 %v3412_v50, %v472_v47  ;;  %v546_v16 = vmul.f32 %v3414_v51, %v472_v47  ;;  %v547_v17 = vmul.f32 %v3416_v53, %v472_v47  ;;  %v548_v18 = vmul.f32 %v3430_v61, %v472_v47 }
  0x77   : > { %877 = vperm.xlu1 %2657, %v835_v42  }
  0x78   : > { %892 = vperm.xlu0 %2656, %v838_v43   ;;  %882 = vperm.xlu2 %2658, %v836_v44  }
  0x7a   : > { %v3432_v62 = vpop.permute.xlu2 %456 }
  0x7b   : > { %v534_v47 = vmul.f32 %v3414_v51, %v3432_v62 }
  0x7f   : > { %872 = vperm.xlu1 %2657, %v834_v45   ;;  %v533_v45 = vmul.f32 %v3412_v50, %v3432_v62 }
  0x80   : > { %867 = vperm.xlu0 %2656, %v833_v48   ;;  %857 = vperm.xlu2 %2658, %v831_v49  }
  0x81   : > { %v646_v52 = vpop.permute.xlu1 %645 }
  0x82   : > { %v477_v54 = vpop.permute.xlu0 %476  ;;  %v3456_v19 = vpop.permute.xlu2 %630 }
  0x83   : > { %v549_v55 = vmul.f32 %v3412_v50, %v477_v54  ;;  %v550_v57 = vmul.f32 %v3414_v51, %v477_v54  ;;  %v551_v60 = vmul.f32 %v3416_v53, %v477_v54  ;;  %v552_v4 = vmul.f32 %v3430_v61, %v477_v54 }
  0x84   : > { %v535_v54 = vmul.f32 %v3416_v53, %v3432_v62 }
  0x85   : > { %v709_v63 = vadd.f32 %v646_v52, %v549_v55  ;;  %v710_v1 = vadd.f32 %v646_v52, %v550_v57  ;;  %v711_v3 = vadd.f32 %v646_v52, %v551_v60  ;;  %v712_v14 = vadd.f32 %v646_v52, %v552_v4 }
  0x86   : > { %v536_v57 = vmul.f32 %v3430_v61, %v3432_v62 }
  0x87   : > { %847 = vperm.xlu1 %2657, %v829_v56   ;;  %2659 = vtanh.f32 %v709_v63 }
  0x88   : > { %862 = vperm.xlu0 %2656, %v832_v58   ;;  %852 = vperm.xlu2 %2658, %v830_v59   ;;  %2661 = vtanh.f32 %v710_v1 }
  0x89   : > { %v3434_v0 = vpop.permute.xlu1 %650  ;;  %2663 = vtanh.f32 %v711_v3 }
  0x8a   : > { %v482_v2 = vpop.permute.xlu0 %481 }
  0x8b   : > { %v553_v5 = vmul.f32 %v3412_v50, %v482_v2  ;;  %v554_v6 = vmul.f32 %v3414_v51, %v482_v2  ;;  %v555_v7 = vmul.f32 %v3416_v53, %v482_v2  ;;  %v556_v32 = vmul.f32 %v3430_v61, %v482_v2 }
  0x8d   : > { %v713_v11 = vadd.f32 %v3434_v0, %v553_v5  ;;  %v714_v12 = vadd.f32 %v3434_v0, %v554_v6  ;;  %v715_v13 = vadd.f32 %v3434_v0, %v555_v7  ;;  %v2660_v21 = vpop.eup %2659  ;;  %v716_v49 = vadd.f32 %v3434_v0, %v556_v32  ;;  %v3487_v0 = vpop.permute.xlu2 %615  ;;  %v1290_v7 = vld [vmem:[%s4613_s6 + $0x48] sm:$0xff] }
  0x8e   : > { %v2662_v27 = vpop.eup %2661 }
  0x8f   : > { %1374 = vperm.xlu1 %2657, %v1296_v8   ;;  %2665 = vtanh.f32 %v713_v11  ;;  %v2664_v30 = vpop.eup %2663  ;;  %v1287_v11 = vld [vmem:[%s4613_s6 + $0x30] sm:$0xff] }
  0x90   : > { %1369 = vperm.xlu0 %2656, %v1295_v9   ;;  %1359 = vperm.xlu2 %2658, %v1293_v10   ;;  %2667 = vtanh.f32 %v714_v12  ;;  %v1289_v10 = vld [vmem:[%s4613_s6 + $0x40] sm:$0xff] }
  0x91   : > { %v641_v20 = vpop.permute.xlu1 %640  ;;  %2669 = vtanh.f32 %v715_v13 }
  0x92   : > { %v705_v23 = vadd.f32 %v641_v20, %v545_v15  ;;  %v706_v24 = vadd.f32 %v641_v20, %v546_v16  ;;  %v707_v25 = vadd.f32 %v641_v20, %v547_v17  ;;  %v636_v26 = vpop.permute.xlu0 %635  ;;  %v708_v29 = vadd.f32 %v641_v20, %v548_v18 }
  0x93   : > { %2671 = vtanh.f32 %v712_v14  ;;  %v701_v33 = vadd.f32 %v636_v26, %v541_v22  ;;  %v702_v37 = vadd.f32 %v636_v26, %v542_v28  ;;  %v703_v42 = vadd.f32 %v636_v26, %v543_v31  ;;  %v1285_v31 = vld [vmem:[%s4613_s6 + $0x20] sm:$0xff] }
  0x94   : > { %2673 = vtanh.f32 %v705_v23  ;;  %v704_v41 = vadd.f32 %v636_v26, %v544_v36  ;;  %v1288_v36 = vld [vmem:[%s4613_s6 + $0x38] sm:$0xff] }
  0x95   : > { %v2666_v35 = vpop.eup %2665  ;;  %2675 = vtanh.f32 %v706_v24 }
  0x96   : > { %v2668_v40 = vpop.eup %2667  ;;  %2677 = vtanh.f32 %v707_v25  ;;  %v825_v43 = vpack.c.bf16 %v2666_v35, %v2660_v21 }
  0x97   : > { %v2670_v44 = vpop.eup %2669  ;;  %2679 = vtanh.f32 %v708_v29  ;;  %1349 = vperm.xlu1 %2657, %v1291_v34   ;;  %v826_v46 = vpack.c.bf16 %v2668_v40, %v2662_v27 }
  0x98   : > { %2681 = vtanh.f32 %v701_v33  ;;  %1364 = vperm.xlu0 %2656, %v1294_v38   ;;  %1354 = vperm.xlu2 %2658, %v1292_v39   ;;  %v827_v48 = vpack.c.bf16 %v2670_v44, %v2664_v30  ;;  %v3513_v33 = vpop.permute.xlu2 %441 }
  0x99   : > { %v3481_v52 = vpop.eup %2671  ;;  %2683 = vtanh.f32 %v702_v37  ;;  %973 = vmatpush.bf16.msra.mxu0 %v825_v43  ;;  %1022 = vmatpush.bf16.msra.mxu1 %v826_v46  ;;  %v626_v55 = vpop.permute.xlu1 %625  ;;  %v1286_v37 = vld [vmem:[%s4613_s6 + $0x28] sm:$0xff] }
  0x9a   : > { %v2674_v56 = vpop.eup %2673  ;;  %2685 = vtanh.f32 %v703_v42  ;;  %1071 = vmatpush.bf16.msra.mxu2 %v827_v48  ;;  %v693_v58 = vadd.f32 %v626_v55, %v533_v45  ;;  %v694_v59 = vadd.f32 %v626_v55, %v534_v47  ;;  %v462_v60 = vpop.permute.xlu0 %461  ;;  %v695_v1 = vadd.f32 %v626_v55, %v535_v54 }
  0x9b   : > { %v2676_v63 = vpop.eup %2675  ;;  %2687 = vtanh.f32 %v704_v41  ;;  %v537_v2 = vmul.f32 %v3412_v50, %v462_v60  ;;  %v538_v3 = vmul.f32 %v3414_v51, %v462_v60  ;;  %v696_v5 = vadd.f32 %v626_v55, %v536_v57 }
  0x9c   : > { %v2678_v4 = vpop.eup %2677  ;;  %2689 = vtanh.f32 %v716_v49  ;;  %v539_v6 = vmul.f32 %v3416_v53, %v462_v60  ;;  %v540_v62 = vmul.f32 %v3430_v61, %v462_v60 }
  0x9d   : > { %v2680_v8 = vpop.eup %2679  ;;  %2691 = vtanh.f32 %v693_v58  ;;  %v697_v9 = vadd.f32 %v3456_v19, %v537_v2  ;;  %v698_v13 = vadd.f32 %v3456_v19, %v538_v3  ;;  %v1284_v2 = vld [vmem:[%s4613_s6 + $0x18] sm:$0xff]  ;;  %v1283_v3 = vld [vmem:[%s4613_s6 + $0x10] sm:$0xff] }
  0x9e   : > { %v2682_v12 = vpop.eup %2681  ;;  %2693 = vtanh.f32 %v694_v59  ;;  %v699_v15 = vadd.f32 %v3456_v19, %v539_v6  ;;  %v700_v18 = vadd.f32 %v3456_v19, %v540_v62 }
  0x9f   : > { %v2684_v14 = vpop.eup %2683  ;;  %2695 = vtanh.f32 %v695_v1  ;;  %v821_v16 = vpack.c.bf16 %v2674_v56, %v2682_v12  ;;  %1344 = vperm.xlu1 %2657, %v1290_v7   ;;  %v521_v7 = vmul.f32 %v3412_v50, %v3513_v33 }
  0xa0   : > { %v2686_v17 = vpop.eup %2685  ;;  %2697 = vtanh.f32 %v696_v5  ;;  %v822_v20 = vpack.c.bf16 %v2676_v63, %v2684_v14  ;;  %1339 = vperm.xlu0 %2656, %v1289_v10   ;;  %1329 = vperm.xlu2 %2658, %v1287_v11   ;;  %v427_v6 = vpop.permute.xlu2 %426 }
  0xa1   : > { %v2688_v21 = vpop.eup %2687  ;;  %2699 = vtanh.f32 %v697_v9  ;;  %974 = vmatpush.bf16.msra.mxu0 %v821_v16  ;;  %v823_v22 = vpack.c.bf16 %v2678_v4, %v2686_v17  ;;  %v452_v23 = vpop.permute.xlu1 %451  ;;  %v1281_v4 = vld [vmem:[%s4613_s6] sm:$0xff] }
  0xa2   : > { %v2690_v24 = vpop.eup %2689  ;;  %2701 = vtanh.f32 %v698_v13  ;;  %1023 = vmatpush.bf16.msra.mxu1 %v822_v20  ;;  %v447_v25 = vpop.permute.xlu0 %446  ;;  %v824_v34 = vpack.c.bf16 %v2680_v8, %v2688_v21  ;;  %v529_v47 = vmul.f32 %v3412_v50, %v452_v23  ;;  %v530_v48 = vmul.f32 %v3414_v51, %v452_v23 }
  0xa3   : > { %v2692_v26 = vpop.eup %2691  ;;  %v828_v27 = vpack.c.bf16 %v2690_v24, %v3481_v52  ;;  %2703 = vtanh.f32 %v699_v15  ;;  %1072 = vmatpush.bf16.msra.mxu2 %v823_v22  ;;  %v525_v19 = vmul.f32 %v3412_v50, %v447_v25  ;;  %v526_v29 = vmul.f32 %v3414_v51, %v447_v25 }
  0xa4   : > { %v2694_v28 = vpop.eup %2693  ;;  %2705 = vtanh.f32 %v700_v18  ;;  %v527_v30 = vmul.f32 %v3416_v53, %v447_v25  ;;  %v528_v35 = vmul.f32 %v3430_v61, %v447_v25  ;;  %v531_v55 = vmul.f32 %v3416_v53, %v452_v23 }
  0xa5   : > { %v2696_v32 = vpop.eup %2695  ;;  %1120 = vmatpush.bf16.msra.mxu3 %v828_v27  ;;  %v685_v39 = vadd.f32 %v3487_v0, %v525_v19  ;;  %v686_v40 = vadd.f32 %v3487_v0, %v526_v29  ;;  %v532_v56 = vmul.f32 %v3430_v61, %v452_v23  ;;  %v522_v18 = vmul.f32 %v3414_v51, %v3513_v33 }
  0xa6   : > { %v2698_v38 = vpop.eup %2697  ;;  %v687_v43 = vadd.f32 %v3487_v0, %v527_v30  ;;  %v688_v45 = vadd.f32 %v3487_v0, %v528_v35  ;;  %v523_v24 = vmul.f32 %v3416_v53, %v3513_v33  ;;  %v524_v25 = vmul.f32 %v3430_v61, %v3513_v33  ;;  %v1282_v30 = vld [vmem:[%s4613_s6 + $0x8] sm:$0xff] }
  0xa7   : > { %v2700_v42 = vpop.eup %2699  ;;  %1319 = vperm.xlu1 %2657, %v1285_v31   ;;  %2707 = vtanh.f32 %v685_v39  ;;  %v1734_v35 = vld [vmem:[%s4615_s8 + $0x8] sm:$0xff]  ;;  %v510_v39 = vmul.f32 %v3414_v51, %v427_v6 }
  0xa8   : > { %v2702_v44 = vpop.eup %2701  ;;  %1334 = vperm.xlu0 %2656, %v1288_v36   ;;  %1324 = vperm.xlu2 %2658, %v1286_v37   ;;  %v817_v41 = vpack.c.bf16 %v2700_v42, %v2692_v26  ;;  %2709 = vtanh.f32 %v686_v40  ;;  %v1733_v37 = vld [vmem:[%s4615_s8] sm:$0xff]  ;;  %v511_v40 = vmul.f32 %v3416_v53, %v427_v6  ;;  %v512_v42 = vmul.f32 %v3430_v61, %v427_v6 }
  0xa9   : > { %v2704_v46 = vpop.eup %2703  ;;  %1121 = vmatpush.bf16.msra.mxu3 %v824_v34  ;;  %v818_v49 = vpack.c.bf16 %v2702_v44, %v2694_v28  ;;  %v437_v52 = vpop.permute.xlu1 %436  ;;  %2711 = vtanh.f32 %v687_v43 }
  0xaa   : > { %v2706_v54 = vpop.eup %2705  ;;  %975 = vmatpush.bf16.msra.mxu0 %v817_v41  ;;  %v819_v57 = vpack.c.bf16 %v2704_v46, %v2696_v32  ;;  %v621_v58 = vpop.permute.xlu0 %620  ;;  %2713 = vtanh.f32 %v688_v45  ;;  %v517_v9 = vmul.f32 %v3412_v50, %v437_v52  ;;  %v518_v10 = vmul.f32 %v3414_v51, %v437_v52 }
  0xab   : > { %1024 = vmatpush.bf16.msra.mxu1 %v818_v49  ;;  %v820_v59 = vpack.c.bf16 %v2706_v54, %v2698_v38  ;;  %v689_v60 = vadd.f32 %v621_v58, %v529_v47  ;;  %v690_v63 = vadd.f32 %v621_v58, %v530_v48  ;;  %v691_v0 = vadd.f32 %v621_v58, %v531_v55  ;;  %v601_v43 = vpop.permute.xlu2 %600 }
  0xac   : > { %1073 = vmatpush.bf16.msra.mxu2 %v819_v57  ;;  %v692_v1 = vadd.f32 %v621_v58, %v532_v56  ;;  %v519_v11 = vmul.f32 %v3416_v53, %v437_v52  ;;  %v520_v14 = vmul.f32 %v3430_v61, %v437_v52  ;;  %v509_v38 = vmul.f32 %v3412_v50, %v427_v6 }
  0xad   : > { %1122 = vmatpush.bf16.msra.mxu3 %v820_v59  ;;  %2715 = vtanh.f32 %v689_v60  ;;  %v2708_v5 = vpop.eup %2707 }
  0xae   : > { %2717 = vtanh.f32 %v690_v63  ;;  %v2710_v62 = vpop.eup %2709 }
  0xaf   : > { %2719 = vtanh.f32 %v691_v0  ;;  %1314 = vperm.xlu1 %2657, %v1284_v2   ;;  %v2712_v8 = vpop.eup %2711 }
  0xb0   : > { %2721 = vtanh.f32 %v692_v1  ;;  %1309 = vperm.xlu0 %2656, %v1283_v3   ;;  %1299 = vperm.xlu2 %2658, %v1281_v4   ;;  %v2714_v13 = vpop.eup %2713  ;;  %v1735_v1 = vld [vmem:[%s4615_s8 + $0x10] sm:$0xff]  ;;  %v1737_v4 = vld [vmem:[%s4615_s8 + $0x20] sm:$0xff] }
  0xb1   : > { %v611_v12 = vpop.permute.xlu1 %610 }
  0xb2   : > { %v606_v15 = vpop.permute.xlu0 %605  ;;  %v681_v16 = vadd.f32 %v611_v12, %v521_v7  ;;  %v682_v28 = vadd.f32 %v611_v12, %v522_v18  ;;  %v683_v32 = vadd.f32 %v611_v12, %v523_v24  ;;  %v684_v33 = vadd.f32 %v611_v12, %v524_v25  ;;  %v1738_v25 = vld [vmem:[%s4615_s8 + $0x28] sm:$0xff] }
  0xb3   : > { %v2716_v17 = vpop.eup %2715  ;;  %v677_v20 = vadd.f32 %v606_v15, %v517_v9  ;;  %v678_v21 = vadd.f32 %v606_v15, %v518_v10  ;;  %v679_v22 = vadd.f32 %v606_v15, %v519_v11  ;;  %v680_v26 = vadd.f32 %v606_v15, %v520_v14 }
  0xb4   : > { %v2718_v23 = vpop.eup %2717  ;;  %2723 = vtanh.f32 %v681_v16  ;;  %v813_v19 = vpack.c.bf16 %v2716_v17, %v2708_v5  ;;  %v586_v16 = vpop.permute.xlu2 %585 }
  0xb5   : > { %v2720_v27 = vpop.eup %2719  ;;  %2725 = vtanh.f32 %v677_v20  ;;  %v814_v29 = vpack.c.bf16 %v2718_v23, %v2710_v62  ;;  %v1736_v62 = vld [vmem:[%s4615_s8 + $0x18] sm:$0xff] }
  0xb6   : > { %v2722_v31 = vpop.eup %2721  ;;  %2727 = vtanh.f32 %v678_v21  ;;  %v815_v34 = vpack.c.bf16 %v2720_v27, %v2712_v8  ;;  %976 = vmatpush.bf16.msra.mxu0 %v813_v19 }
  0xb7   : > { %2729 = vtanh.f32 %v679_v22  ;;  %1025 = vmatpush.bf16.msra.mxu1 %v814_v29  ;;  %v816_v36 = vpack.c.bf16 %v2722_v31, %v2714_v13  ;;  %1751 = vperm.xlu1 %2657, %v1733_v37  }
  0xb8   : > { %2731 = vtanh.f32 %v680_v26  ;;  %1074 = vmatpush.bf16.msra.mxu2 %v815_v34  ;;  %1304 = vperm.xlu0 %2656, %v1282_v30   ;;  %v1739_v30 = vld [vmem:[%s4615_s8 + $0x30] sm:$0xff] }
  0xb9   : > { %2733 = vtanh.f32 %v682_v28  ;;  %1123 = vmatpush.bf16.msra.mxu3 %v816_v36  ;;  %1756 = vperm.xlu2 %2658, %v1734_v35   ;;  %v596_v44 = vpop.permute.xlu1 %595  ;;  %v1740_v28 = vld [vmem:[%s4615_s8 + $0x38] sm:$0xff] }
  0xba   : > { %v2724_v45 = vpop.eup %2723  ;;  %2735 = vtanh.f32 %v683_v32  ;;  %v669_v41 = vadd.f32 %v596_v44, %v509_v38  ;;  %v670_v46 = vadd.f32 %v596_v44, %v510_v39  ;;  %v671_v47 = vadd.f32 %v596_v44, %v511_v40  ;;  %v432_v48 = vpop.permute.xlu0 %431 }
  0xbb   : > { %v2726_v49 = vpop.eup %2725  ;;  %2737 = vtanh.f32 %v684_v33  ;;  %v672_v52 = vadd.f32 %v596_v44, %v512_v42  ;;  %v513_v54 = vmul.f32 %v3412_v50, %v432_v48  ;;  %v514_v55 = vmul.f32 %v3414_v51, %v432_v48 }
  0xbc   : > { %v2728_v56 = vpop.eup %2727  ;;  %2739 = vtanh.f32 %v669_v41  ;;  %v515_v57 = vmul.f32 %v3416_v53, %v432_v48  ;;  %v516_v58 = vmul.f32 %v3430_v61, %v432_v48  ;;  %v809_v59 = vpack.c.bf16 %v2724_v45, %v2726_v49  ;;  %v412_v48 = vpop.permute.xlu2 %411  ;;  %v1741_v49 = vld [vmem:[%s4615_s8 + $0x40] sm:$0xff] }
  0xbd   : > { %v2730_v60 = vpop.eup %2729  ;;  %2741 = vtanh.f32 %v670_v46  ;;  %v673_v63 = vadd.f32 %v601_v43, %v513_v54  ;;  %v674_v0 = vadd.f32 %v601_v43, %v514_v55  ;;  %v1742_v55 = vld [vmem:[%s4615_s8 + $0x48] sm:$0xff] }
  0xbe   : > { %v2732_v2 = vpop.eup %2731  ;;  %2743 = vtanh.f32 %v671_v47  ;;  %v675_v3 = vadd.f32 %v601_v43, %v515_v57  ;;  %977 = vmatpush.bf16.msra.mxu0 %v809_v59  ;;  %v676_v6 = vadd.f32 %v601_v43, %v516_v58  ;;  %v497_v57 = vmul.f32 %v3412_v50, %v412_v48 }
  0xbf   : > { %v2734_v5 = vpop.eup %2733  ;;  %2745 = vtanh.f32 %v672_v52  ;;  %1766 = vperm.xlu1 %2657, %v1736_v62   ;;  %v1743_v52 = vld [vmem:[%s4615_s8 + $0x50] sm:$0xff] }
  0xc0   : > { %v2736_v7 = vpop.eup %2735  ;;  %2747 = vtanh.f32 %v673_v63  ;;  %v810_v8 = vpack.c.bf16 %v2734_v5, %v2728_v56  ;;  %1761 = vperm.xlu0 %2656, %v1735_v1  }
  0xc1   : > { %v2738_v9 = vpop.eup %2737  ;;  %2749 = vtanh.f32 %v674_v0  ;;  %v811_v10 = vpack.c.bf16 %v2736_v7, %v2730_v60  ;;  %1771 = vperm.xlu2 %2658, %v1737_v4   ;;  %v422_v11 = vpop.permute.xlu1 %421 }
  0xc2   : > { %v2740_v12 = vpop.eup %2739  ;;  %2751 = vtanh.f32 %v675_v3  ;;  %1026 = vmatpush.bf16.msra.mxu1 %v810_v8  ;;  %v812_v13 = vpack.c.bf16 %v2738_v9, %v2732_v2  ;;  %v417_v14 = vpop.permute.xlu0 %416  ;;  %v505_v34 = vmul.f32 %v3412_v50, %v422_v11  ;;  %v506_v37 = vmul.f32 %v3414_v51, %v422_v11 }
  0xc3   : > { %v2742_v15 = vpop.eup %2741  ;;  %2753 = vtanh.f32 %v676_v6  ;;  %1075 = vmatpush.bf16.msra.mxu2 %v811_v10  ;;  %v501_v17 = vmul.f32 %v3412_v50, %v417_v14  ;;  %v502_v20 = vmul.f32 %v3414_v51, %v417_v14  ;;  %v503_v21 = vmul.f32 %v3416_v53, %v417_v14 }
  0xc4   : > { %v2744_v18 = vpop.eup %2743  ;;  %1124 = vmatpush.bf16.msra.mxu3 %v812_v13  ;;  %v504_v22 = vmul.f32 %v3430_v61, %v417_v14  ;;  %v507_v38 = vmul.f32 %v3416_v53, %v422_v11  ;;  %v508_v42 = vmul.f32 %v3430_v61, %v422_v11  ;;  %v498_v6 = vmul.f32 %v3414_v51, %v412_v48 }
  0xc5   : > { %v2746_v23 = vpop.eup %2745  ;;  %v661_v24 = vadd.f32 %v586_v16, %v501_v17  ;;  %v662_v27 = vadd.f32 %v586_v16, %v502_v20  ;;  %v663_v29 = vadd.f32 %v586_v16, %v503_v21  ;;  %v500_v13 = vmul.f32 %v3430_v61, %v412_v48  ;;  %v1745_v21 = vld [vmem:[%s4615_s8 + $0x60] sm:$0xff] }
  0xc6   : > { %v2748_v26 = vpop.eup %2747  ;;  %v664_v35 = vadd.f32 %v586_v16, %v504_v22  ;;  %v1744_v16 = vld [vmem:[%s4615_s8 + $0x58] sm:$0xff] }
  0xc7   : > { %v2750_v19 = vpop.eup %2749  ;;  %v805_v31 = vpack.c.bf16 %v2748_v26, %v2740_v12  ;;  %2755 = vtanh.f32 %v661_v24  ;;  %1781 = vperm.xlu1 %2657, %v1739_v30  }
  0xc8   : > { %v2752_v32 = vpop.eup %2751  ;;  %1776 = vperm.xlu0 %2656, %v1738_v25   ;;  %v806_v33 = vpack.c.bf16 %v2750_v19, %v2742_v15  ;;  %2757 = vtanh.f32 %v662_v27  ;;  %v2137_v27 = vld [vmem:[%s4616_s9] sm:$0xff] }
  0xc9   : > { %v2754_v36 = vpop.eup %2753  ;;  %1786 = vperm.xlu2 %2658, %v1740_v28   ;;  %978 = vmatpush.bf16.msra.mxu0 %v805_v31  ;;  %v807_v39 = vpack.c.bf16 %v2752_v32, %v2744_v18  ;;  %v407_v40 = vpop.permute.xlu1 %406  ;;  %2759 = vtanh.f32 %v663_v29  ;;  %v2623_v28 = vld [vmem:[%s4610_s3] sm:$0xff]  ;;  %v2139_v29 = vld [vmem:[%s4616_s9 + $0x10] sm:$0xff]  ;;  %v2138_v31 = vld [vmem:[%s4616_s9 + $0x8] sm:$0xff] }
  0xca   : > { %1027 = vmatpush.bf16.msra.mxu1 %v806_v33  ;;  %v808_v43 = vpack.c.bf16 %v2754_v36, %v2746_v23  ;;  %v591_v44 = vpop.permute.xlu0 %590  ;;  %2761 = vtanh.f32 %v664_v35  ;;  %v493_v59 = vmul.f32 %v3412_v50, %v407_v40  ;;  %v494_v60 = vmul.f32 %v3414_v51, %v407_v40 }
  0xcb   : > { %1076 = vmatpush.bf16.msra.mxu2 %v807_v39  ;;  %v665_v45 = vadd.f32 %v591_v44, %v505_v34  ;;  %v666_v41 = vadd.f32 %v591_v44, %v506_v37  ;;  %v667_v46 = vadd.f32 %v591_v44, %v507_v38  ;;  %v668_v47 = vadd.f32 %v591_v44, %v508_v42  ;;  %v2140_v37 = vld [vmem:[%s4616_s9 + $0x18] sm:$0xff]  ;;  %v2142_v38 = vld [vmem:[%s4616_s9 + $0x28] sm:$0xff]  ;;  %v2141_v39 = vld [vmem:[%s4616_s9 + $0x20] sm:$0xff] }
  0xcc   : > { %1125 = vmatpush.bf16.msra.mxu3 %v808_v43  ;;  %v495_v63 = vmul.f32 %v3416_v53, %v407_v40  ;;  %v496_v2 = vmul.f32 %v3430_v61, %v407_v40  ;;  %v499_v50 = vmul.f32 %v3416_v53, %v412_v48  ;;  %v1746_v53 = vld [vmem:[%s4615_s8 + $0x68] sm:$0xff]  ;;  %v2143_v40 = vld [vmem:[%s4616_s9 + $0x30] sm:$0xff]  ;;  %v2145_v43 = vld [vmem:[%s4616_s9 + $0x40] sm:$0xff] }
  0xcd   : > { %2763 = vtanh.f32 %v665_v45  ;;  %v2756_v54 = vpop.eup %2755  ;;  %v2624_v42 = vld [vmem:[%s4610_s3 + $0x8] sm:$0xff]  ;;  %v2144_v44 = vld [vmem:[%s4616_s9 + $0x38] sm:$0xff]  ;;  %v2625_v48 = vld [vmem:[%s4610_s3 + $0x10] sm:$0xff] }
  0xce   : > { %2765 = vtanh.f32 %v666_v41  ;;  %v2758_v56 = vpop.eup %2757  ;;  %v2146_v45 = vld [vmem:[%s4616_s9 + $0x48] sm:$0xff]  ;;  %v2147_v41 = vld [vmem:[%s4616_s9 + $0x50] sm:$0xff] }
  0xcf   : > { %2767 = vtanh.f32 %v667_v46  ;;  %v2760_v58 = vpop.eup %2759  ;;  %1796 = vperm.xlu1 %2657, %v1742_v55   ;;  %v1747_v46 = vld [vmem:[%s4615_s8 + $0x70] sm:$0xff]  ;;  %v2152_v55 = vld [vmem:[%s4616_s9 + $0x78] sm:$0xff] }
  0xd0   : > { %2769 = vtanh.f32 %v668_v47  ;;  %1791 = vperm.xlu0 %2656, %v1741_v49   ;;  %v2762_v1 = vpop.eup %2761  ;;  %v1748_v47 = vld [vmem:[%s4615_s8 + $0x78] sm:$0xff]  ;;  %v2149_v49 = vld [vmem:[%s4616_s9 + $0x60] sm:$0xff] }
  0xd1   : > { %1801 = vperm.xlu2 %2658, %v1743_v52   ;;  %v581_v0 = vpop.permute.xlu1 %580  ;;  %v2148_v52 = vld [vmem:[%s4616_s9 + $0x58] sm:$0xff] }
  0xd2   : > { %v576_v3 = vpop.permute.xlu0 %575  ;;  %v657_v4 = vadd.f32 %v581_v0, %v497_v57  ;;  %v658_v14 = vadd.f32 %v581_v0, %v498_v6  ;;  %v659_v17 = vadd.f32 %v581_v0, %v499_v50  ;;  %v660_v20 = vadd.f32 %v581_v0, %v500_v13  ;;  %v2381_v57 = vld [vmem:[#allocation2] sm:$0x1]  ;;  %v2630_v0 = vld [vmem:[%s4610_s3 + $0x38] sm:$0xff] }
  0xd3   : > { %v2764_v5 = vpop.eup %2763  ;;  %v653_v62 = vadd.f32 %v576_v3, %v493_v59  ;;  %v654_v7 = vadd.f32 %v576_v3, %v494_v60  ;;  %v655_v8 = vadd.f32 %v576_v3, %v495_v63  ;;  %v656_v10 = vadd.f32 %v576_v3, %v496_v2  ;;  %v2627_v59 = vld [vmem:[%s4610_s3 + $0x20] sm:$0xff]  ;;  %v2628_v60 = vld [vmem:[%s4610_s3 + $0x28] sm:$0xff]  ;;  %v2629_v63 = vld [vmem:[%s4610_s3 + $0x30] sm:$0xff] }
  0xd4   : > { %v2766_v9 = vpop.eup %2765  ;;  %2771 = vtanh.f32 %v657_v4  ;;  %v801_v11 = vpack.c.bf16 %v2764_v5, %v2756_v54  ;;  %v2150_v54 = vld [vmem:[%s4616_s9 + $0x68] sm:$0xff] }
  0xd5   : > { %v2768_v12 = vpop.eup %2767  ;;  %2773 = vtanh.f32 %v653_v62  ;;  %v802_v15 = vpack.c.bf16 %v2766_v9, %v2758_v56  ;;  %v2151_v56 = vld [vmem:[%s4616_s9 + $0x70] sm:$0xff] }
  0xd6   : > { %v2770_v51 = vpop.eup %2769  ;;  %2775 = vtanh.f32 %v654_v7  ;;  %979 = vmatpush.bf16.msra.mxu0 %v801_v11  ;;  %v803_v18 = vpack.c.bf16 %v2768_v12, %v2760_v58  ;;  %v2626_v58 = vld [vmem:[%s4610_s3 + $0x18] sm:$0xff] }
  0xd7   : > { %2777 = vtanh.f32 %v655_v8  ;;  %1028 = vmatpush.bf16.msra.mxu1 %v802_v15  ;;  %v804_v61 = vpack.c.bf16 %v2770_v51, %v2762_v1  ;;  %1811 = vperm.xlu1 %2657, %v1745_v21  }
  0xd8   : > { %2779 = vtanh.f32 %v656_v10  ;;  %1077 = vmatpush.bf16.msra.mxu2 %v803_v18  ;;  %1806 = vperm.xlu0 %2656, %v1744_v16  }
  0xd9   : > { %2781 = vtanh.f32 %v658_v14  ;;  %1126 = vmatpush.bf16.msra.mxu3 %v804_v61  ;;  %1816 = vperm.xlu2 %2658, %v1746_v53  }
  0xda   : > { %v2772_v22 = vpop.eup %2771  ;;  %2783 = vtanh.f32 %v659_v17 }
  0xdb   : > { %v2774_v23 = vpop.eup %2773  ;;  %2785 = vtanh.f32 %v660_v20  ;;  %v3732_v20 = vpop.permute.xlu2 %917 }
  0xdc   : > { %v2776_v24 = vpop.eup %2775  ;;  %v797_v25 = vpack.c.bf16 %v2772_v22, %v2774_v23 }
  0xdd   : > { %v2778_v26 = vpop.eup %2777 }
  0xde   : > { %v2780_v19 = vpop.eup %2779  ;;  %980 = vmatpush.bf16.msra.mxu0 %v797_v25 }
  0xdf   : > { %v2782_v30 = vpop.eup %2781  ;;  %2160 = vperm.xlu1 %2657, %v2138_v31  }
  0xe0   : > { %v2784_v32 = vpop.eup %2783  ;;  %v798_v34 = vpack.c.bf16 %v2782_v30, %v2776_v24  ;;  %2155 = vperm.xlu0 %2656, %v2137_v27   ;;  %v3742_v24 = vpop.permute.xlu1 %907 }
  0xe1   : > { %v2786_v35 = vpop.eup %2785  ;;  %v799_v33 = vpack.c.bf16 %v2784_v32, %v2778_v26  ;;  %2165 = vperm.xlu2 %2658, %v2139_v29   ;;  %981 = vmatmul.bf16.vlgmr.msra.gmra.mxu0 %v2623_v28  ;;  %v3754_v29 = vpop.permute.xlu0 %922 }
  0xe2   : > { %1029 = vmatpush.bf16.msra.mxu1 %v798_v34  ;;  %v800_v36 = vpack.c.bf16 %v2786_v35, %v2780_v19 }
  0xe3   : > { %1078 = vmatpush.bf16.msra.mxu2 %v799_v33  ;;  %v3746_v26 = vpop.permute.xlu2 %912 }
  0xe4   : > { %1127 = vmatpush.bf16.msra.mxu3 %v800_v36 }
  0xe5   : > { %1030 = vmatmul.bf16.vlgmr.msra.gmra.mxu1 %v2623_v28 }
  0xe6   : > { %1079 = vmatmul.bf16.vlgmr.msra.gmra.mxu2 %v2623_v28 }
  0xe7   : > { %1128 = vmatmul.bf16.vlgmr.msra.gmra.mxu3 %v2623_v28  ;;  %2175 = vperm.xlu1 %2657, %v2141_v39  }
  0xe8   : > { %2170 = vperm.xlu0 %2656, %v2140_v37   ;;  %v3758_v31 = vpop.permute.xlu1 %902 }
  0xe9   : > { %2180 = vperm.xlu2 %2658, %v2142_v38   ;;  %v3768_v36 = vpop.permute.xlu0 %897 }
  0xeb   : > { %v3760_v32 = vpop.permute.xlu2 %887 }
  0xef   : > { %2190 = vperm.xlu1 %2657, %v2144_v44  }
  0xf0   : > { %2185 = vperm.xlu0 %2656, %v2143_v40   ;;  %v3772_v38 = vpop.permute.xlu1 %877 }
  0xf1   : > { %2195 = vperm.xlu2 %2658, %v2145_v43   ;;  %986 = vmatmul.bf16.gmra.mxu0 %v2624_v42 }
  0xf3   : > { %v3780_v43 = vpop.permute.xlu2 %882 }
  0xf5   : > { %1035 = vmatmul.bf16.gmra.mxu1 %v2624_v42 }
  0xf6   : > { %1084 = vmatmul.bf16.gmra.mxu2 %v2624_v42 }
  0xf7   : > { %1133 = vmatmul.bf16.gmra.mxu3 %v2624_v42  ;;  %1821 = vperm.xlu1 %2657, %v1747_v46  }
  0xf8   : > { %2200 = vperm.xlu0 %2656, %v2146_v45   ;;  %v3784_v45 = vpop.permute.xlu0 %892 }
  0xf9   : > { %2205 = vperm.xlu2 %2658, %v2147_v41  }
  0xff   : > { %2210 = vperm.xlu1 %2657, %v2148_v52  }
 0x100   : > { %1826 = vperm.xlu0 %2656, %v1748_v47  }
 0x101   : > { %2215 = vperm.xlu2 %2658, %v2149_v49   ;;  %991 = vmatmul.bf16.gmra.mxu0 %v2625_v48  ;;  %v3794_v49 = vpop.permute.xlu2 %857 }
 0x102   : > { %4640 = vst [vmem:[#allocation10_spill] sm:$0xff] %v3794_v49 }
 0x105   : > { %1040 = vmatmul.bf16.gmra.mxu1 %v2625_v48 }
 0x106   : > { %1089 = vmatmul.bf16.gmra.mxu2 %v2625_v48 }
 0x107   : > { %1138 = vmatmul.bf16.gmra.mxu3 %v2625_v48  ;;  %2225 = vperm.xlu1 %2657, %v2151_v56   ;;  %v3792_v48 = vpop.permute.xlu1 %872 }
 0x108   : > { %2220 = vperm.xlu0 %2656, %v2150_v54   ;;  %v3798_v54 = vpop.permute.xlu0 %867 }
 0x109   : > { %2230 = vperm.xlu2 %2658, %v2152_v55  }
 0x110   : > { %2384 = vperm.xlu0 %2656, %v2381_v57  }
 0x111   : > { %996 = vmatmul.bf16.gmra.mxu0 %v2626_v58 }
 0x115   : > { %1045 = vmatmul.bf16.gmra.mxu1 %v2626_v58 }
 0x116   : > { %1094 = vmatmul.bf16.gmra.mxu2 %v2626_v58 }
 0x117   : > { %1143 = vmatmul.bf16.gmra.mxu3 %v2626_v58  ;;  %v3806_v58 = vpop.permute.xlu1 %847 }
 0x118   : > { %4641 = vst [vmem:[#allocation11_spill] sm:$0xff] %v3806_v58 }
 0x121   : > { %1001 = vmatmul.bf16.gmra.mxu0 %v2627_v59 }
 0x125   : > { %1050 = vmatmul.bf16.gmra.mxu1 %v2627_v59 }
 0x126   : > { %1099 = vmatmul.bf16.gmra.mxu2 %v2627_v59 }
 0x127   : > { %1148 = vmatmul.bf16.gmra.mxu3 %v2627_v59 }
 0x131   : > { %1006 = vmatmul.bf16.gmra.mxu0 %v2628_v60 }
 0x135   : > { %1055 = vmatmul.bf16.gmra.mxu1 %v2628_v60 }
 0x136   : > { %1104 = vmatmul.bf16.gmra.mxu2 %v2628_v60 }
 0x137   : > { %1153 = vmatmul.bf16.gmra.mxu3 %v2628_v60 }
 0x141   : > { %1011 = vmatmul.bf16.gmra.mxu0 %v2629_v63 }
 0x145   : > { %1060 = vmatmul.bf16.gmra.mxu1 %v2629_v63 }
 0x146   : > { %1109 = vmatmul.bf16.gmra.mxu2 %v2629_v63 }
 0x147   : > { %1158 = vmatmul.bf16.gmra.mxu3 %v2629_v63  ;;  %v3811_v63 = vpop.permute.xlu2 %852 }
 0x148   : > { %4642 = vst [vmem:[#allocation12_spill] sm:$0xff] %v3811_v63 }
 0x151   : > { %1016 = vmatmul.bf16.gmra.mxu0 %v2630_v0 }
 0x155   : > { %1065 = vmatmul.bf16.gmra.mxu1 %v2630_v0 }
 0x156   : > { %1114 = vmatmul.bf16.gmra.mxu2 %v2630_v0 }
 0x157   : > { %1163 = vmatmul.bf16.gmra.mxu3 %v2630_v0 }
 0x15e   : > { %v982_v1 = vpop.f32.mrf.mxu0 }
 0x15f   : > { %v983_v59 = vadd.f32 %v982_v1, %v3806_v58  ;;  %v3823_v1 = vpop.permute.xlu0 %862 }
 0x161   : > { %2787 = vtanh.f32 %v983_v59 }
 0x162   : > { %v1031_v2 = vpop.f32.mrf.mxu1 }
 0x163   : > { %v1032_v0 = vadd.f32 %v1031_v2, %v3806_v58 }
 0x165   : > { %2789 = vtanh.f32 %v1032_v0 }
 0x166   : > { %v984_v3 = vpop.f32.mrf.mxu0 }
 0x167   : > { %v3835_v0 = vpop.eup %2787 }
 0x168   : > { %4643 = vst [vmem:[#allocation13_spill] sm:$0xff] %v3835_v0 }
 0x169   : > { %v3698_v4 = vpop.f32.mrf.mxu2 }
 0x16a   : > { %4633 = vst [vmem:[#allocation3_spill] sm:$0xff] %v3698_v4  ;;  %v3700_v5 = vpop.f32.mrf.mxu3  ;;  %v1033_v6 = vpop.f32.mrf.mxu1 }
 0x16b   : > { %4634 = vst [vmem:[#allocation4_spill] sm:$0xff] %v3700_v5  ;;  %v985_v5 = vadd.f32 %v984_v3, %v3811_v63  ;;  %v1034_v4 = vadd.f32 %v1033_v6, %v3811_v63 }
 0x16d   : > { %2791 = vtanh.f32 %v985_v5 }
 0x16e   : > { %v987_v62 = vpop.f32.mrf.mxu0  ;;  %2793 = vtanh.f32 %v1034_v4 }
 0x171   : > { %v3702_v7 = vpop.f32.mrf.mxu2 }
 0x172   : > { %4635 = vst [vmem:[#allocation5_spill] sm:$0xff] %v3702_v7  ;;  %v3704_v8 = vpop.f32.mrf.mxu3  ;;  %v3706_v9 = vpop.f32.mrf.mxu1  ;;  %v988_v7 = vadd.f32 %v987_v62, %v3794_v49 }
 0x173   : > { %4636 = vst [vmem:[#allocation6_spill] sm:$0xff] %v3704_v8 }
 0x174   : > { %2795 = vtanh.f32 %v988_v7 }
 0x176   : > { %v3708_v50 = vpop.f32.mrf.mxu0 }
 0x177   : > { %v990_v2 = vadd.f32 %v3708_v50, %v3823_v1 }
 0x179   : > { %v3710_v10 = vpop.f32.mrf.mxu2 }
 0x17a   : > { %4637 = vst [vmem:[#allocation7_spill] sm:$0xff] %v3710_v10  ;;  %v3712_v11 = vpop.f32.mrf.mxu3  ;;  %v3714_v12 = vpop.f32.mrf.mxu1 }
 0x17b   : > { %4638 = vst [vmem:[#allocation8_spill] sm:$0xff] %v3712_v11  ;;  %v1039_v3 = vadd.f32 %v3714_v12, %v3823_v1 }
 0x17e   : > { %v3716_v13 = vpop.f32.mrf.mxu0 }
 0x17f   : > { %v993_v6 = vadd.f32 %v3716_v13, %v3798_v54 }
 0x181   : > { %v3718_v14 = vpop.f32.mrf.mxu2 }
 0x182   : > { %v3720_v15 = vpop.f32.mrf.mxu3  ;;  %v3722_v16 = vpop.f32.mrf.mxu1 }
 0x183   : > { %4639 = vst [vmem:[#allocation9_spill] sm:$0xff] %v3720_v15  ;;  %v1037_v15 = vadd.f32 %v3706_v9, %v3794_v49  ;;  %v1042_v59 = vadd.f32 %v3722_v16, %v3798_v54  ;;  %v3839_v9 = vpop.eup %2789 }
 0x184   : > { %4644 = vst [vmem:[#allocation14_spill] sm:$0xff] %v3839_v9  ;;  %v3845_v50 = vpop.eup %2791 }
 0x185   : > { %2797 = vtanh.f32 %v1037_v15  ;;  %4645 = vst [vmem:[#allocation15_spill] sm:$0xff] %v3845_v50  ;;  %v3851_v16 = vpop.eup %2793 }
 0x186   : > { %v3724_v51 = vpop.f32.mrf.mxu0  ;;  %2799 = vtanh.f32 %v990_v2  ;;  %4646 = vst [vmem:[#allocation16_spill] sm:$0xff] %v3851_v16  ;;  %v3855_v2 = vpop.eup %2795 }
 0x187   : > { %v995_v5 = vadd.f32 %v3724_v51, %v3792_v48  ;;  %2801 = vtanh.f32 %v1039_v3  ;;  %4647 = vst [vmem:[#allocation17_spill] sm:$0xff] %v3855_v2 }
 0x188   : > { %2803 = vtanh.f32 %v993_v6 }
 0x189   : > { %v3726_v17 = vpop.f32.mrf.mxu2  ;;  %2805 = vtanh.f32 %v1042_v59 }
 0x18a   : > { %v3728_v18 = vpop.f32.mrf.mxu3  ;;  %v3730_v53 = vpop.f32.mrf.mxu1  ;;  %2807 = vtanh.f32 %v995_v5 }
 0x18b   : > { %v1044_v4 = vadd.f32 %v3730_v53, %v3792_v48  ;;  %v3859_v3 = vpop.eup %2797 }
 0x18c   : > { %4648 = vst [vmem:[#allocation18_spill] sm:$0xff] %v3859_v3  ;;  %v3863_v6 = vpop.eup %2799 }
 0x18d   : > { %2809 = vtanh.f32 %v1044_v4  ;;  %4649 = vst [vmem:[#allocation19_spill] sm:$0xff] %v3863_v6 }
 0x18e   : > { %v3734_v61 = vpop.f32.mrf.mxu0 }
 0x18f   : > { %v998_v12 = vadd.f32 %v3734_v61, %v3772_v38 }
 0x191   : > { %v3736_v21 = vpop.f32.mrf.mxu2  ;;  %2811 = vtanh.f32 %v998_v12 }
 0x192   : > { %v3738_v22 = vpop.f32.mrf.mxu3  ;;  %v3740_v23 = vpop.f32.mrf.mxu1 }
 0x193   : > { %v1047_v51 = vadd.f32 %v3740_v23, %v3772_v38  ;;  %v3867_v23 = vpop.eup %2801 }
 0x194   : > { %4650 = vst [vmem:[#allocation20_spill] sm:$0xff] %v3867_v23 }
 0x195   : > { %2813 = vtanh.f32 %v1047_v51 }
 0x196   : > { %v3744_v25 = vpop.f32.mrf.mxu0 }
 0x197   : > { %v1000_v53 = vadd.f32 %v3744_v25, %v3780_v43  ;;  %v3871_v25 = vpop.eup %2803 }
 0x199   : > { %v3748_v27 = vpop.f32.mrf.mxu2  ;;  %2815 = vtanh.f32 %v1000_v53 }
 0x19a   : > { %v3750_v28 = vpop.f32.mrf.mxu3  ;;  %v3752_v19 = vpop.f32.mrf.mxu1 }
 0x19b   : > { %v1049_v61 = vadd.f32 %v3752_v19, %v3780_v43  ;;  %v3875_v19 = vpop.eup %2805 }
 0x19c   : > { %4651 = vst [vmem:[#allocation21_spill] sm:$0xff] %v3875_v19  ;;  %v3879_v9 = vpop.eup %2807 }
 0x19d   : > { %2817 = vtanh.f32 %v1049_v61  ;;  %v3883_v3 = vpop.eup %2809 }
 0x19e   : > { %v3756_v30 = vpop.f32.mrf.mxu0  ;;  %4652 = vst [vmem:[#allocation22_spill] sm:$0xff] %v3883_v3  ;;  %v3887_v53 = vpop.eup %2811 }
 0x19f   : > { %v1003_v59 = vadd.f32 %v3756_v30, %v3760_v32  ;;  %v3890_v61 = vpop.eup %2813 }
 0x1a1   : > { %v3762_v34 = vpop.f32.mrf.mxu2  ;;  %2819 = vtanh.f32 %v1003_v59  ;;  %v3892_v59 = vpop.eup %2815 }
 0x1a2   : > { %v3764_v35 = vpop.f32.mrf.mxu3  ;;  %v3766_v33 = vpop.f32.mrf.mxu1 }
 0x1a3   : > { %v1052_v5 = vadd.f32 %v3766_v33, %v3760_v32  ;;  %v3896_v0 = vpop.eup %2817 }
 0x1a5   : > { %2821 = vtanh.f32 %v1052_v5 }
 0x1a6   : > { %v3770_v37 = vpop.f32.mrf.mxu0 }
 0x1a7   : > { %v1005_v4 = vadd.f32 %v3770_v37, %v3784_v45 }
 0x1a9   : > { %v3774_v39 = vpop.f32.mrf.mxu2  ;;  %2823 = vtanh.f32 %v1005_v4  ;;  %v3900_v4 = vpop.eup %2819 }
 0x1aa   : > { %v3776_v40 = vpop.f32.mrf.mxu3  ;;  %v3778_v42 = vpop.f32.mrf.mxu1 }
 0x1ab   : > { %v1054_v12 = vadd.f32 %v3778_v42, %v3784_v45 }
 0x1ad   : > { %2825 = vtanh.f32 %v1054_v12  ;;  %v3904_v12 = vpop.eup %2821 }
 0x1ae   : > { %v3782_v44 = vpop.f32.mrf.mxu0 }
 0x1af   : > { %v1008_v51 = vadd.f32 %v3782_v44, %v3768_v36 }
 0x1b1   : > { %v3786_v41 = vpop.f32.mrf.mxu2  ;;  %2827 = vtanh.f32 %v1008_v51 }
 0x1b2   : > { %v3788_v46 = vpop.f32.mrf.mxu3  ;;  %v3790_v47 = vpop.f32.mrf.mxu1 }
 0x1b3   : > { %v1057_v37 = vadd.f32 %v3790_v47, %v3768_v36 }
 0x1b5   : > { %2829 = vtanh.f32 %v1057_v37 }
 0x1b6   : > { %v3796_v52 = vpop.f32.mrf.mxu0 }
 0x1b7   : > { %v1010_v44 = vadd.f32 %v3796_v52, %v3758_v31  ;;  %v3907_v52 = vpop.eup %2823 }
 0x1b9   : > { %v3800_v55 = vpop.f32.mrf.mxu2 }
 0x1ba   : > { %v3802_v56 = vpop.f32.mrf.mxu3  ;;  %v3804_v57 = vpop.f32.mrf.mxu1 }
 0x1be   : > { %v3809_v60 = vpop.f32.mrf.mxu0 }
 0x1c1   : > { %v3816_v8 = vpop.f32.mrf.mxu2 }
 0x1c2   : > { %v3819_v11 = vpop.f32.mrf.mxu3  ;;  %v3821_v10 = vpop.f32.mrf.mxu1 }
 0x1c6   : > { %v1014_v62 = vpop.f32.mrf.mxu0 }
 0x1c7   : > { %v1015_v47 = vadd.f32 %v1014_v62, %v3746_v26  ;;  %v3909_v62 = vpop.eup %2825 }
 0x1c9   : > { %v3843_v7 = vpop.f32.mrf.mxu2 }
 0x1ca   : > { %v3849_v13 = vpop.f32.mrf.mxu3  ;;  %v1063_v15 = vpop.f32.mrf.mxu1 }
 0x1cb   : > { %v1064_v3 = vadd.f32 %v1063_v15, %v3746_v26 }
 0x1ce   : > { %v1017_v16 = vpop.f32.mrf.mxu0 }
 0x1cf   : > { %v1018_v42 = vadd.f32 %v1017_v16, %v3732_v20  ;;  %v1013_v16 = vadd.f32 %v3809_v60, %v3742_v24 }
 0x1d1   : > { %v1112_v30 = vpop.f32.mrf.mxu2  ;;  %2831 = vtanh.f32 %v1018_v42  ;;  %v2828_v42 = vpop.eup %2827 }
 0x1d2   : > { %v1161_v33 = vpop.f32.mrf.mxu3  ;;  %v1066_v23 = vpop.f32.mrf.mxu1  ;;  %v1113_v49 = vadd.f32 %v1112_v30, %v3746_v26 }
 0x1d3   : > { %v1067_v51 = vadd.f32 %v1066_v23, %v3732_v20  ;;  %v3915_v23 = vpop.eup %2829 }
 0x1d6   : > { %v1019_v50 = vpop.f32.mrf.mxu0 }
 0x1d7   : > { %v1020_v5 = vadd.f32 %v1019_v50, %v3754_v29  ;;  %v1059_v50 = vadd.f32 %v3804_v57, %v3758_v31 }
 0x1d9   : > { %v1115_v58 = vpop.f32.mrf.mxu2  ;;  %2833 = vtanh.f32 %v1020_v5  ;;  %v1062_v5 = vadd.f32 %v3821_v10, %v3742_v24 }
 0x1da   : > { %2835 = vtanh.f32 %v1010_v44  ;;  %v1164_v37 = vpop.f32.mrf.mxu3  ;;  %v1068_v63 = vpop.f32.mrf.mxu1  ;;  %v1116_v19 = vadd.f32 %v1115_v58, %v3732_v20 }
 0x1db   : > { %2837 = vtanh.f32 %v1015_v47  ;;  %v1069_v60 = vadd.f32 %v1068_v63, %v3754_v29  ;;  %v2832_v44 = vpop.eup %2831  ;;  %v1165_v57 = vadd.f32 %v1164_v37, %v3732_v20 }
 0x1dc   : > { %2839 = vtanh.f32 %v1013_v16 }
 0x1dd   : > { %2841 = vtanh.f32 %v1067_v51 }
 0x1de   : > { %2843 = vtanh.f32 %v1069_v60  ;;  %v1162_v60 = vadd.f32 %v1161_v33, %v3746_v26  ;;  %v1155_v33 = vadd.f32 %v3802_v56, %v3768_v36  ;;  %v1265_v56 = vpack.c.bf16 %v3907_v52, %v3900_v4 }
 0x1df   : > { %v2834_v6 = vpop.eup %2833  ;;  %2845 = vtanh.f32 %v1059_v50 }
 0x1e0   : > { %v2836_v47 = vpop.eup %2835  ;;  %2847 = vtanh.f32 %v1064_v3  ;;  %v1277_v63 = vpack.c.bf16 %v2834_v6, %v2832_v44  ;;  %v1111_v3 = vadd.f32 %v3843_v7, %v3742_v24  ;;  %v1108_v44 = vadd.f32 %v3816_v8, %v3758_v31 }
 0x1e1   : > { %v2838_v16 = vpop.eup %2837  ;;  %2849 = vtanh.f32 %v1062_v5  ;;  %v1117_v15 = vpop.f32.mrf.mxu2 }
 0x1e2   : > { %v2840_v2 = vpop.eup %2839  ;;  %2851 = vtanh.f32 %v1116_v19  ;;  %v1118_v10 = vadd.f32 %v1117_v15, %v3754_v29  ;;  %v1166_v51 = vpop.f32.mrf.mxu3  ;;  %1425 = vmatpush.bf16.msrb.mxu0 %v1277_v63  ;;  %v1160_v19 = vadd.f32 %v3849_v13, %v3742_v24  ;;  %v1269_v24 = vpack.c.bf16 %v2836_v47, %v2828_v42 }
 0x1e3   : > { %v2842_v58 = vpop.eup %2841  ;;  %2853 = vtanh.f32 %v1165_v57  ;;  %v1167_v20 = vadd.f32 %v1166_v51, %v3754_v29  ;;  %v1273_v6 = vpack.c.bf16 %v2838_v16, %v2840_v2  ;;  %v1157_v29 = vadd.f32 %v3819_v11, %v3758_v31 }
 0x1e4   : > { %v2844_v37 = vpop.eup %2843  ;;  %2855 = vtanh.f32 %v1118_v10  ;;  %v1106_v2 = vadd.f32 %v3800_v55, %v3768_v36  ;;  %v1103_v57 = vadd.f32 %v3786_v41, %v3784_v45  ;;  %v1152_v31 = vadd.f32 %v3788_v46, %v3784_v45 }
 0x1e5   : > { %v2846_v50 = vpop.eup %2845  ;;  %2857 = vtanh.f32 %v1167_v20  ;;  %v1278_v30 = vpack.c.bf16 %v2844_v37, %v2842_v58  ;;  %v1101_v47 = vadd.f32 %v3774_v39, %v3760_v32  ;;  %v1150_v41 = vadd.f32 %v3776_v40, %v3760_v32  ;;  %v4653_v20 = vld [vmem:[#allocation9_spill] sm:$0xff]  ;;  %v4655_v37 = vld [vmem:[#allocation7_spill] sm:$0xff] }
 0x1e6   : > { %v2848_v5 = vpop.eup %2847  ;;  %2859 = vtanh.f32 %v1113_v49  ;;  %1426 = vmatpush.bf16.msrb.mxu0 %v1273_v6  ;;  %v1270_v45 = vpack.c.bf16 %v2846_v50, %v3915_v23  ;;  %v1098_v16 = vadd.f32 %v3762_v34, %v3780_v43  ;;  %v1147_v15 = vadd.f32 %v3764_v35, %v3780_v43  ;;  %v4657_v6 = vld [vmem:[#allocation19_spill] sm:$0xff] }
 0x1e7   : > { %v2850_v26 = vpop.eup %2849  ;;  %2861 = vtanh.f32 %v1162_v60  ;;  %1474 = vmatpush.bf16.msrb.mxu1 %v1278_v30  ;;  %v1096_v32 = vadd.f32 %v3748_v27, %v3772_v38  ;;  %v1261_v23 = vpack.c.bf16 %v3892_v59, %v3887_v53  ;;  %v1145_v10 = vadd.f32 %v3750_v28, %v3772_v38 }
 0x1e8   : > { %v2852_v7 = vpop.eup %2851  ;;  %2863 = vtanh.f32 %v1111_v3  ;;  %v1274_v8 = vpack.c.bf16 %v2848_v5, %v2850_v26  ;;  %v1266_v35 = vpack.c.bf16 %v3909_v62, %v3904_v12  ;;  %v1093_v51 = vadd.f32 %v3736_v21, %v3792_v48  ;;  %v4659_v5 = vld [vmem:[#allocation21_spill] sm:$0xff] }
 0x1e9   : > { %v2854_v13 = vpop.eup %2853  ;;  %2865 = vtanh.f32 %v1160_v19  ;;  %v1142_v53 = vadd.f32 %v3738_v22, %v3792_v48  ;;  %v1091_v38 = vadd.f32 %v3726_v17, %v3798_v54  ;;  %v1257_v62 = vpack.c.bf16 %v3879_v9, %v3871_v25  ;;  %v4658_v19 = vld [vmem:[#allocation8_spill] sm:$0xff] }
 0x1ea   : > { %v2856_v49 = vpop.eup %2855  ;;  %2867 = vtanh.f32 %v1108_v44  ;;  %1427 = vmatpush.bf16.msrb.mxu0 %v1269_v24  ;;  %v1140_v58 = vadd.f32 %v3728_v18, %v3798_v54  ;;  %v1262_v22 = vpack.c.bf16 %v3896_v0, %v3890_v61  ;;  %v1088_v60 = vadd.f32 %v3718_v14, %v3823_v1  ;;  %v4654_v54 = vld [vmem:[#allocation10_spill] sm:$0xff]  ;;  %v4656_v61 = vld [vmem:[#allocation17_spill] sm:$0xff] }
 0x1eb   : > { %v2858_v11 = vpop.eup %2857  ;;  %2869 = vtanh.f32 %v1157_v29  ;;  %1475 = vmatpush.bf16.msrb.mxu1 %v1274_v8  ;;  %v1279_v55 = vpack.c.bf16 %v2856_v49, %v2852_v7  ;;  %v1137_v9 = vadd.f32 %v4653_v20, %v3823_v1  ;;  %v1086_v3 = vadd.f32 %v4655_v37, %v4654_v54  ;;  %v4660_v1 = vld [vmem:[#allocation22_spill] sm:$0xff]  ;;  %v4661_v29 = vld [vmem:[#allocation12_spill] sm:$0xff]  ;;  %v4662_v7 = vld [vmem:[#allocation5_spill] sm:$0xff] }
 0x1ec   : > { %v2860_v42 = vpop.eup %2859  ;;  %2871 = vtanh.f32 %v1106_v2  ;;  %v1280_v36 = vpack.c.bf16 %v2858_v11, %v2854_v13  ;;  %v1253_v50 = vpack.c.bf16 %v4657_v6, %v4656_v61  ;;  %v1135_v30 = vadd.f32 %v4658_v19, %v4654_v54  ;;  %v4663_v13 = vld [vmem:[#allocation6_spill] sm:$0xff]  ;;  %v4665_v11 = vld [vmem:[#allocation3_spill] sm:$0xff]  ;;  %v2637_v20 = vld [vmem:[%s4612_s5 + $0x30] sm:$0xff] }
 0x1ed   : > { %v2862_v63 = vpop.eup %2861  ;;  %2873 = vtanh.f32 %v1155_v33  ;;  %1523 = vmatpush.bf16.msrb.mxu2 %v1279_v55  ;;  %v1258_v44 = vpack.c.bf16 %v4660_v1, %v4659_v5  ;;  %v1083_v2 = vadd.f32 %v4662_v7, %v4661_v29  ;;  %v1132_v33 = vadd.f32 %v4663_v13, %v4661_v29 }
 0x1ee   : > { %v2864_v46 = vpop.eup %2863  ;;  %2875 = vtanh.f32 %v1103_v57  ;;  %1572 = vmatpush.bf16.msrb.mxu3 %v1280_v36  ;;  %1428 = vmatpush.bf16.msrb.mxu0 %v1265_v56  ;;  %v4664_v57 = vld [vmem:[#allocation11_spill] sm:$0xff] }
 0x1ef   : > { %v2866_v39 = vpop.eup %2865  ;;  %2877 = vtanh.f32 %v1152_v31  ;;  %1476 = vmatpush.bf16.msrb.mxu1 %v1270_v45  ;;  %v1275_v4 = vpack.c.bf16 %v2860_v42, %v2864_v46  ;;  %v1081_v31 = vadd.f32 %v4665_v11, %v4664_v57  ;;  %v4666_v42 = vld [vmem:[#allocation13_spill] sm:$0xff]  ;;  %v4669_v45 = vld [vmem:[#allocation18_spill] sm:$0xff]  ;;  %v4670_v46 = vld [vmem:[#allocation20_spill] sm:$0xff] }
 0x1f0   : > { %v2868_v52 = vpop.eup %2867  ;;  %2879 = vtanh.f32 %v1101_v47  ;;  %v1276_v40 = vpack.c.bf16 %v2862_v63, %v2866_v39  ;;  %v4667_v47 = vld [vmem:[#allocation15_spill] sm:$0xff]  ;;  %v4668_v63 = vld [vmem:[#allocation4_spill] sm:$0xff] }
 0x1f1   : > { %v2870_v34 = vpop.eup %2869  ;;  %2881 = vtanh.f32 %v1150_v41  ;;  %1524 = vmatpush.bf16.msrb.mxu2 %v1275_v4  ;;  %v1249_v36 = vpack.c.bf16 %v4667_v47, %v4666_v42  ;;  %v1130_v41 = vadd.f32 %v4668_v63, %v4664_v57  ;;  %v2631_v39 = vld [vmem:[%s4612_s5] sm:$0xff]  ;;  %v4076_v42 = vpop.permute.xlu2 %1359 }
 0x1f2   : > { %v2872_v43 = vpop.eup %2871  ;;  %2883 = vtanh.f32 %v1098_v16  ;;  %1573 = vmatpush.bf16.msrb.mxu3 %v1276_v40  ;;  %1429 = vmatpush.bf16.msrb.mxu0 %v1261_v23  ;;  %v1254_v16 = vpack.c.bf16 %v4670_v46, %v4669_v45  ;;  %v4088_v45 = vpop.permute.xlu1 %1374 }
 0x1f3   : > { %v2874_v27 = vpop.eup %2873  ;;  %2885 = vtanh.f32 %v1147_v15  ;;  %1477 = vmatpush.bf16.msrb.mxu1 %v1266_v35  ;;  %v1271_v59 = vpack.c.bf16 %v2868_v52, %v2872_v43 }
 0x1f4   : > { %v2876_v28 = vpop.eup %2875  ;;  %2887 = vtanh.f32 %v1096_v32  ;;  %v1272_v12 = vpack.c.bf16 %v2870_v34, %v2874_v27  ;;  %v4671_v34 = vld [vmem:[#allocation14_spill] sm:$0xff] }
 0x1f5   : > { %v2878_v21 = vpop.eup %2877  ;;  %2889 = vtanh.f32 %v1145_v10  ;;  %1525 = vmatpush.bf16.msrb.mxu2 %v1271_v59  ;;  %v4672_v10 = vld [vmem:[#allocation16_spill] sm:$0xff] }
 0x1f6   : > { %v2880_v48 = vpop.eup %2879  ;;  %2891 = vtanh.f32 %v1093_v51  ;;  %1574 = vmatpush.bf16.msrb.mxu3 %v1272_v12  ;;  %1430 = vmatpush.bf16.msrb.mxu0 %v1257_v62  ;;  %v1250_v35 = vpack.c.bf16 %v4672_v10, %v4671_v34 }
 0x1f7   : > { %v2882_v17 = vpop.eup %2881  ;;  %2893 = vtanh.f32 %v1142_v53  ;;  %1478 = vmatpush.bf16.msrb.mxu1 %v1262_v22  ;;  %v1267_v25 = vpack.c.bf16 %v2876_v28, %v2880_v48  ;;  %v2633_v22 = vld [vmem:[%s4612_s5 + $0x10] sm:$0xff]  ;;  %v2634_v48 = vld [vmem:[%s4612_s5 + $0x18] sm:$0xff] }
 0x1f8   : > { %v2884_v18 = vpop.eup %2883  ;;  %2895 = vtanh.f32 %v1091_v38  ;;  %v1268_v0 = vpack.c.bf16 %v2878_v21, %v2882_v17  ;;  %v2636_v17 = vld [vmem:[%s4612_s5 + $0x28] sm:$0xff] }
 0x1f9   : > { %v2886_v14 = vpop.eup %2885  ;;  %2897 = vtanh.f32 %v1140_v58  ;;  %1526 = vmatpush.bf16.msrb.mxu2 %v1267_v25  ;;  %v2632_v58 = vld [vmem:[%s4612_s5 + $0x8] sm:$0xff] }
 0x1fa   : > { %v2888_v26 = vpop.eup %2887  ;;  %2899 = vtanh.f32 %v1088_v60  ;;  %1575 = vmatpush.bf16.msrb.mxu3 %v1268_v0  ;;  %1431 = vmatpush.bf16.msrb.mxu0 %v1253_v50  ;;  %v2635_v60 = vld [vmem:[%s4612_s5 + $0x20] sm:$0xff] }
 0x1fb   : > { %v2890_v24 = vpop.eup %2889  ;;  %2901 = vtanh.f32 %v1137_v9  ;;  %1479 = vmatpush.bf16.msrb.mxu1 %v1258_v44  ;;  %v1263_v8 = vpack.c.bf16 %v2884_v18, %v2888_v26  ;;  %v2638_v9 = vld [vmem:[%s4612_s5 + $0x38] sm:$0xff] }
 0x1fc   : > { %v2892_v49 = vpop.eup %2891  ;;  %2903 = vtanh.f32 %v1086_v3  ;;  %v1264_v55 = vpack.c.bf16 %v2886_v14, %v2890_v24 }
 0x1fd   : > { %v2894_v56 = vpop.eup %2893  ;;  %2905 = vtanh.f32 %v1135_v30  ;;  %1527 = vmatpush.bf16.msrb.mxu2 %v1263_v8 }
 0x1fe   : > { %v2896_v15 = vpop.eup %2895  ;;  %2907 = vtanh.f32 %v1083_v2  ;;  %1576 = vmatpush.bf16.msrb.mxu3 %v1264_v55  ;;  %1432 = vmatpush.bf16.msrb.mxu0 %v1249_v36 }
 0x1ff   : > { %v2898_v4 = vpop.eup %2897  ;;  %2909 = vtanh.f32 %v1132_v33  ;;  %1480 = vmatpush.bf16.msrb.mxu1 %v1254_v16  ;;  %v1259_v52 = vpack.c.bf16 %v2892_v49, %v2896_v15  ;;  %v4066_v49 = vpop.permute.xlu0 %1369 }
 0x200   : > { %v2900_v32 = vpop.eup %2899  ;;  %2911 = vtanh.f32 %v1081_v31  ;;  %v1260_v40 = vpack.c.bf16 %v2894_v56, %v2898_v4  ;;  %v4092_v16 = vpop.permute.xlu2 %1354 }
 0x201   : > { %v2902_v23 = vpop.eup %2901  ;;  %2913 = vtanh.f32 %v1130_v41  ;;  %1528 = vmatpush.bf16.msrb.mxu2 %v1259_v52  ;;  %1433 = vmatmul.bf16.vlgmr.msrb.gmra.mxu0 %v2631_v39 }
 0x202   : > { %v2904_v43 = vpop.eup %2903  ;;  %1577 = vmatpush.bf16.msrb.mxu3 %v1260_v40 }
 0x203   : > { %v2906_v51 = vpop.eup %2905  ;;  %1481 = vmatpush.bf16.msrb.mxu1 %v1250_v35  ;;  %v1255_v27 = vpack.c.bf16 %v2900_v32, %v2904_v43  ;;  %v4102_v32 = vpop.permute.xlu1 %1349 }
 0x204   : > { %v2908_v53 = vpop.eup %2907  ;;  %v1256_v59 = vpack.c.bf16 %v2902_v23, %v2906_v51 }
 0x205   : > { %v2910_v28 = vpop.eup %2909  ;;  %1529 = vmatpush.bf16.msrb.mxu2 %v1255_v27 }
 0x206   : > { %v2912_v38 = vpop.eup %2911  ;;  %1578 = vmatpush.bf16.msrb.mxu3 %v1256_v59  ;;  %1482 = vmatmul.bf16.vlgmr.msrb.gmra.mxu1 %v2631_v39 }
 0x207   : > { %v2914_v12 = vpop.eup %2913  ;;  %v1251_v62 = vpack.c.bf16 %v2908_v53, %v2912_v38  ;;  %v4080_v36 = vpop.permute.xlu0 %1364 }
 0x208   : > { %v1252_v21 = vpack.c.bf16 %v2910_v28, %v2914_v12  ;;  %v4108_v34 = vpop.permute.xlu2 %1329 }
 0x209   : > { %1530 = vmatpush.bf16.msrb.mxu2 %v1251_v62 }
 0x20a   : > { %1579 = vmatpush.bf16.msrb.mxu3 %v1252_v21 }
 0x20b   : > { %v4118_v27 = vpop.permute.xlu1 %1344 }
 0x20c   : > { %1531 = vmatmul.bf16.vlgmr.msrb.gmra.mxu2 %v2631_v39 }
 0x20d   : > { %1580 = vmatmul.bf16.vlgmr.msrb.gmra.mxu3 %v2631_v39 }
 0x20f   : > { %v4096_v15 = vpop.permute.xlu0 %1339 }
 0x210   : > { %v4126_v38 = vpop.permute.xlu2 %1324 }
 0x211   : > { %1438 = vmatmul.bf16.gmra.mxu0 %v2632_v58 }
 0x216   : > { %1487 = vmatmul.bf16.gmra.mxu1 %v2632_v58 }
 0x217   : > { %v4114_v43 = vpop.permute.xlu0 %1334 }
 0x21c   : > { %1536 = vmatmul.bf16.gmra.mxu2 %v2632_v58 }
 0x21d   : > { %1585 = vmatmul.bf16.gmra.mxu3 %v2632_v58  ;;  %v4134_v58 = vpop.permute.xlu1 %1319 }
 0x21f   : > { %v4128_v12 = vpop.permute.xlu0 %1309 }
 0x220   : > { %4681 = vst [vmem:[#allocation12_spill] sm:$0xff] %v4128_v12 }
 0x221   : > { %1443 = vmatmul.bf16.gmra.mxu0 %v2633_v22 }
 0x226   : > { %1492 = vmatmul.bf16.gmra.mxu1 %v2633_v22 }
 0x22c   : > { %1541 = vmatmul.bf16.gmra.mxu2 %v2633_v22 }
 0x22d   : > { %1590 = vmatmul.bf16.gmra.mxu3 %v2633_v22 }
 0x231   : > { %1448 = vmatmul.bf16.gmra.mxu0 %v2634_v48 }
 0x236   : > { %1497 = vmatmul.bf16.gmra.mxu1 %v2634_v48 }
 0x23c   : > { %1546 = vmatmul.bf16.gmra.mxu2 %v2634_v48 }
 0x23d   : > { %1595 = vmatmul.bf16.gmra.mxu3 %v2634_v48 }
 0x241   : > { %1453 = vmatmul.bf16.gmra.mxu0 %v2635_v60 }
 0x246   : > { %1502 = vmatmul.bf16.gmra.mxu1 %v2635_v60 }
 0x24c   : > { %1551 = vmatmul.bf16.gmra.mxu2 %v2635_v60 }
 0x24d   : > { %1600 = vmatmul.bf16.gmra.mxu3 %v2635_v60  ;;  %v4140_v60 = vpop.permute.xlu2 %1299 }
 0x24e   : > { %4682 = vst [vmem:[#allocation5_spill] sm:$0xff] %v4140_v60 }
 0x251   : > { %1458 = vmatmul.bf16.gmra.mxu0 %v2636_v17 }
 0x256   : > { %1507 = vmatmul.bf16.gmra.mxu1 %v2636_v17 }
 0x25c   : > { %1556 = vmatmul.bf16.gmra.mxu2 %v2636_v17 }
 0x25d   : > { %1605 = vmatmul.bf16.gmra.mxu3 %v2636_v17 }
 0x261   : > { %1463 = vmatmul.bf16.gmra.mxu0 %v2637_v20 }
 0x266   : > { %1512 = vmatmul.bf16.gmra.mxu1 %v2637_v20 }
 0x26c   : > { %1561 = vmatmul.bf16.gmra.mxu2 %v2637_v20 }
 0x26d   : > { %1610 = vmatmul.bf16.gmra.mxu3 %v2637_v20 }
 0x271   : > { %1468 = vmatmul.bf16.gmra.mxu0 %v2638_v9 }
 0x276   : > { %1517 = vmatmul.bf16.gmra.mxu1 %v2638_v9 }
 0x27c   : > { %1566 = vmatmul.bf16.gmra.mxu2 %v2638_v9 }
 0x27d   : > { %1615 = vmatmul.bf16.gmra.mxu3 %v2638_v9  ;;  %v4145_v9 = vpop.permute.xlu0 %1304 }
 0x27e   : > { %v1434_v25 = vpop.f32.mrf.mxu0  ;;  %4683 = vst [vmem:[#allocation6_spill] sm:$0xff] %v4145_v9 }
 0x27f   : > { %v1435_v20 = vadd.f32 %v1434_v25, %v4140_v60  ;;  %v4159_v25 = vpop.permute.xlu1 %1314 }
 0x280   : > { %4684 = vst [vmem:[#allocation11_spill] sm:$0xff] %v4159_v25 }
 0x281   : > { %2915 = vtanh.f32 %v1435_v20 }
 0x283   : > { %v4022_v18 = vpop.f32.mrf.mxu1 }
 0x286   : > { %v4024_v54 = vpop.f32.mrf.mxu0 }
 0x28b   : > { %v4026_v37 = vpop.f32.mrf.mxu1 }
 0x28e   : > { %v4028_v3 = vpop.f32.mrf.mxu0 }
 0x28f   : > { %v4030_v0 = vpop.f32.mrf.mxu2 }
 0x290   : > { %4673 = vst [vmem:[#allocation9_spill] sm:$0xff] %v4030_v0  ;;  %v4032_v61 = vpop.f32.mrf.mxu3  ;;  %v1437_v0 = vadd.f32 %v4024_v54, %v4145_v9 }
 0x291   : > { %4674 = vst [vmem:[#allocation10_spill] sm:$0xff] %v4032_v61  ;;  %v1484_v61 = vadd.f32 %v4022_v18, %v4140_v60  ;;  %v4171_v60 = vpop.eup %2915 }
 0x292   : > { %4685 = vst [vmem:[#allocation3_spill] sm:$0xff] %v4171_v60 }
 0x293   : > { %v4034_v6 = vpop.f32.mrf.mxu1  ;;  %2917 = vtanh.f32 %v1484_v61 }
 0x294   : > { %v1489_v18 = vadd.f32 %v4034_v6, %v4128_v12  ;;  %2919 = vtanh.f32 %v1437_v0 }
 0x296   : > { %v4036_v50 = vpop.f32.mrf.mxu0 }
 0x297   : > { %v4038_v14 = vpop.f32.mrf.mxu2  ;;  %v1442_v54 = vadd.f32 %v4036_v50, %v4159_v25 }
 0x298   : > { %4675 = vst [vmem:[#allocation7_spill] sm:$0xff] %v4038_v14  ;;  %v4040_v19 = vpop.f32.mrf.mxu3  ;;  %v1486_v14 = vadd.f32 %v4026_v37, %v4145_v9 }
 0x299   : > { %4676 = vst [vmem:[#allocation17_spill] sm:$0xff] %v4040_v19  ;;  %v4175_v50 = vpop.eup %2917 }
 0x29a   : > { %2921 = vtanh.f32 %v1486_v14  ;;  %4686 = vst [vmem:[#allocation13_spill] sm:$0xff] %v4175_v50 }
 0x29b   : > { %v4042_v30 = vpop.f32.mrf.mxu1 }
 0x29c   : > { %v1491_v37 = vadd.f32 %v4042_v30, %v4159_v25 }
 0x29e   : > { %v4044_v5 = vpop.f32.mrf.mxu0 }
 0x29f   : > { %v4046_v1 = vpop.f32.mrf.mxu2 }
 0x2a0   : > { %4677 = vst [vmem:[#allocation19_spill] sm:$0xff] %v4046_v1  ;;  %v4048_v44 = vpop.f32.mrf.mxu3  ;;  %v1440_v1 = vadd.f32 %v4028_v3, %v4128_v12  ;;  %v1445_v3 = vadd.f32 %v4044_v5, %v4134_v58  ;;  %v4181_v5 = vpop.eup %2919 }
 0x2a1   : > { %4678 = vst [vmem:[#allocation8_spill] sm:$0xff] %v4048_v44 }
 0x2a2   : > { %2923 = vtanh.f32 %v1440_v1  ;;  %4687 = vst [vmem:[#allocation15_spill] sm:$0xff] %v4181_v5 }
 0x2a3   : > { %v4050_v26 = vpop.f32.mrf.mxu1  ;;  %2925 = vtanh.f32 %v1489_v18  ;;  %v4187_v18 = vpop.eup %2921 }
 0x2a4   : > { %v1494_v61 = vadd.f32 %v4050_v26, %v4134_v58  ;;  %2927 = vtanh.f32 %v1442_v54  ;;  %4688 = vst [vmem:[#allocation4_spill] sm:$0xff] %v4187_v18 }
 0x2a5   : > { %2929 = vtanh.f32 %v1491_v37 }
 0x2a6   : > { %v4052_v29 = vpop.f32.mrf.mxu0  ;;  %2931 = vtanh.f32 %v1445_v3 }
 0x2a7   : > { %v4054_v7 = vpop.f32.mrf.mxu2  ;;  %v1447_v0 = vadd.f32 %v4052_v29, %v4126_v38  ;;  %2933 = vtanh.f32 %v1494_v61 }
 0x2a8   : > { %4679 = vst [vmem:[#allocation21_spill] sm:$0xff] %v4054_v7  ;;  %v4056_v2 = vpop.f32.mrf.mxu3  ;;  %v4191_v54 = vpop.eup %2923 }
 0x2a9   : > { %4680 = vst [vmem:[#allocation22_spill] sm:$0xff] %v4056_v2  ;;  %2935 = vtanh.f32 %v1447_v0  ;;  %v4195_v37 = vpop.eup %2925 }
 0x2aa   : > { %4689 = vst [vmem:[#allocation18_spill] sm:$0xff] %v4195_v37  ;;  %v4199_v50 = vpop.eup %2927 }
 0x2ab   : > { %v4058_v24 = vpop.f32.mrf.mxu1  ;;  %v4202_v18 = vpop.eup %2929 }
 0x2ac   : > { %v1496_v14 = vadd.f32 %v4058_v24, %v4126_v38  ;;  %4690 = vst [vmem:[#allocation20_spill] sm:$0xff] %v4202_v18 }
 0x2ae   : > { %v4060_v13 = vpop.f32.mrf.mxu0  ;;  %2937 = vtanh.f32 %v1496_v14 }
 0x2af   : > { %v4062_v33 = vpop.f32.mrf.mxu2  ;;  %v1450_v1 = vadd.f32 %v4060_v13, %v4108_v34 }
 0x2b0   : > { %v4064_v8 = vpop.f32.mrf.mxu3 }
 0x2b1   : > { %2939 = vtanh.f32 %v1450_v1 }
 0x2b3   : > { %v4068_v57 = vpop.f32.mrf.mxu1 }
 0x2b4   : > { %v1499_v29 = vadd.f32 %v4068_v57, %v4108_v34  ;;  %v4204_v57 = vpop.eup %2931 }
 0x2b5   : > { %v4208_v14 = vpop.eup %2933 }
 0x2b6   : > { %v4070_v11 = vpop.f32.mrf.mxu0  ;;  %2941 = vtanh.f32 %v1499_v29  ;;  %v4212_v12 = vpop.eup %2935 }
 0x2b7   : > { %v4072_v31 = vpop.f32.mrf.mxu2  ;;  %v1452_v24 = vadd.f32 %v4070_v11, %v4114_v43 }
 0x2b8   : > { %v4074_v55 = vpop.f32.mrf.mxu3 }
 0x2b9   : > { %2943 = vtanh.f32 %v1452_v24  ;;  %v4216_v24 = vpop.eup %2937 }
 0x2ba   : > { %v4219_v18 = vpop.eup %2939 }
 0x2bb   : > { %v4078_v47 = vpop.f32.mrf.mxu1 }
 0x2bc   : > { %v1501_v13 = vadd.f32 %v4078_v47, %v4114_v43 }
 0x2be   : > { %v4082_v56 = vpop.f32.mrf.mxu0  ;;  %2945 = vtanh.f32 %v1501_v13  ;;  %v4221_v13 = vpop.eup %2941 }
 0x2bf   : > { %v4084_v63 = vpop.f32.mrf.mxu2  ;;  %v1455_v11 = vadd.f32 %v4082_v56, %v4096_v15  ;;  %v4225_v37 = vpop.eup %2943 }
 0x2c0   : > { %v4086_v41 = vpop.f32.mrf.mxu3 }
 0x2c3   : > { %v4090_v46 = vpop.f32.mrf.mxu1 }
 0x2c4   : > { %v4229_v5 = vpop.eup %2945 }
 0x2c6   : > { %v4094_v39 = vpop.f32.mrf.mxu0 }
 0x2c7   : > { %v4098_v4 = vpop.f32.mrf.mxu2 }
 0x2c8   : > { %v4100_v52 = vpop.f32.mrf.mxu3 }
 0x2cb   : > { %v4104_v40 = vpop.f32.mrf.mxu1 }
 0x2ce   : > { %v4106_v23 = vpop.f32.mrf.mxu0 }
 0x2cf   : > { %v4110_v10 = vpop.f32.mrf.mxu2 }
 0x2d0   : > { %v4112_v35 = vpop.f32.mrf.mxu3 }
 0x2d3   : > { %v4116_v51 = vpop.f32.mrf.mxu1 }
 0x2d6   : > { %v4120_v53 = vpop.f32.mrf.mxu0 }
 0x2d7   : > { %v4122_v59 = vpop.f32.mrf.mxu2 }
 0x2d8   : > { %v4124_v28 = vpop.f32.mrf.mxu3 }
 0x2db   : > { %v4130_v62 = vpop.f32.mrf.mxu1 }
 0x2de   : > { %v4132_v21 = vpop.f32.mrf.mxu0 }
 0x2df   : > { %v4136_v22 = vpop.f32.mrf.mxu2 }
 0x2e0   : > { %v4138_v48 = vpop.f32.mrf.mxu3 }
 0x2e3   : > { %v4142_v17 = vpop.f32.mrf.mxu1 }
 0x2e6   : > { %v1466_v19 = vpop.f32.mrf.mxu0 }
 0x2e7   : > { %v4153_v44 = vpop.f32.mrf.mxu2  ;;  %v1467_v47 = vadd.f32 %v1466_v19, %v4080_v36  ;;  %v1462_v19 = vadd.f32 %v4120_v53, %v4092_v16 }
 0x2e8   : > { %v4157_v2 = vpop.f32.mrf.mxu3 }
 0x2eb   : > { %v1515_v20 = vpop.f32.mrf.mxu1 }
 0x2ee   : > { %v1469_v6 = vpop.f32.mrf.mxu0 }
 0x2ef   : > { %v4179_v30 = vpop.f32.mrf.mxu2  ;;  %v1470_v61 = vadd.f32 %v1469_v6, %v4066_v49  ;;  %v1465_v6 = vadd.f32 %v4132_v21, %v4076_v42  ;;  %v1516_v21 = vadd.f32 %v1515_v20, %v4080_v36 }
 0x2f0   : > { %v4185_v26 = vpop.f32.mrf.mxu3 }
 0x2f1   : > { %2947 = vtanh.f32 %v1470_v61 }
 0x2f3   : > { %v1518_v3 = vpop.f32.mrf.mxu1 }
 0x2f4   : > { %v1519_v56 = vadd.f32 %v1518_v3, %v4066_v49  ;;  %v1460_v3 = vadd.f32 %v4106_v23, %v4102_v32 }
 0x2f6   : > { %v1471_v0 = vpop.f32.mrf.mxu0 }
 0x2f7   : > { %v1564_v9 = vpop.f32.mrf.mxu2  ;;  %v1472_v1 = vadd.f32 %v1471_v0, %v4088_v45 }
 0x2f8   : > { %v1613_v29 = vpop.f32.mrf.mxu3 }
 0x2f9   : > { %2949 = vtanh.f32 %v1472_v1  ;;  %v1514_v1 = vadd.f32 %v4142_v17, %v4076_v42 }
 0x2fa   : > { %2951 = vtanh.f32 %v1455_v11  ;;  %v2948_v11 = vpop.eup %2947 }
 0x2fb   : > { %2953 = vtanh.f32 %v1467_v47  ;;  %v1520_v0 = vpop.f32.mrf.mxu1  ;;  %v1457_v47 = vadd.f32 %v4094_v39, %v4118_v27 }
 0x2fc   : > { %2955 = vtanh.f32 %v1465_v6  ;;  %v1521_v61 = vadd.f32 %v1520_v0, %v4088_v45  ;;  %v1511_v0 = vadd.f32 %v4130_v62, %v4092_v16 }
 0x2fd   : > { %2957 = vtanh.f32 %v1519_v56  ;;  %v1504_v56 = vadd.f32 %v4090_v46, %v4096_v15 }
 0x2fe   : > { %2959 = vtanh.f32 %v1521_v61  ;;  %v1509_v61 = vadd.f32 %v4116_v51, %v4102_v32 }
 0x2ff   : > { %v2950_v53 = vpop.eup %2949  ;;  %2961 = vtanh.f32 %v1462_v19  ;;  %v1567_v6 = vpop.f32.mrf.mxu2  ;;  %v1506_v19 = vadd.f32 %v4104_v40, %v4118_v27  ;;  %v1565_v40 = vadd.f32 %v1564_v9, %v4080_v36  ;;  %v1612_v9 = vadd.f32 %v4185_v26, %v4076_v42 }
 0x300   : > { %v2952_v20 = vpop.eup %2951  ;;  %2963 = vtanh.f32 %v1516_v21  ;;  %v1616_v60 = vpop.f32.mrf.mxu3  ;;  %v1729_v7 = vpack.c.bf16 %v2950_v53, %v2948_v11  ;;  %v1568_v21 = vadd.f32 %v1567_v6, %v4066_v49  ;;  %v1607_v26 = vadd.f32 %v4138_v48, %v4102_v32 }
 0x301   : > { %v2954_v23 = vpop.eup %2953  ;;  %2965 = vtanh.f32 %v1460_v3  ;;  %v1617_v46 = vadd.f32 %v1616_v60, %v4066_v49 }
 0x302   : > { %v2956_v17 = vpop.eup %2955  ;;  %2967 = vtanh.f32 %v1514_v1  ;;  %1877 = vmatpush.bf16.msra.mxu0 %v1729_v7 }
 0x303   : > { %v2958_v39 = vpop.eup %2957  ;;  %2969 = vtanh.f32 %v1457_v47  ;;  %v1725_v11 = vpack.c.bf16 %v2954_v23, %v2956_v17 }
 0x304   : > { %v2960_v62 = vpop.eup %2959  ;;  %2971 = vtanh.f32 %v1511_v0 }
 0x305   : > { %v2962_v53 = vpop.eup %2961  ;;  %2973 = vtanh.f32 %v1504_v56  ;;  %v1730_v3 = vpack.c.bf16 %v2960_v62, %v2958_v39  ;;  %v1614_v56 = vadd.f32 %v1613_v29, %v4080_v36  ;;  %v1560_v36 = vadd.f32 %v4153_v44, %v4092_v16 }
 0x306   : > { %v2964_v25 = vpop.eup %2963  ;;  %2975 = vtanh.f32 %v1509_v61  ;;  %1878 = vmatpush.bf16.msra.mxu0 %v1725_v11  ;;  %v1563_v61 = vadd.f32 %v4179_v30, %v4076_v42 }
 0x307   : > { %v2966_v51 = vpop.eup %2965  ;;  %2977 = vtanh.f32 %v1506_v19  ;;  %v1569_v7 = vpop.f32.mrf.mxu2  ;;  %1926 = vmatpush.bf16.msra.mxu1 %v1730_v3 }
 0x308   : > { %v2968_v1 = vpop.eup %2967  ;;  %2979 = vtanh.f32 %v1568_v21  ;;  %v1570_v47 = vadd.f32 %v1569_v7, %v4088_v45  ;;  %v1618_v6 = vpop.f32.mrf.mxu3  ;;  %v1721_v0 = vpack.c.bf16 %v2962_v53, %v2966_v51  ;;  %v1558_v21 = vadd.f32 %v4136_v22, %v4102_v32 }
 0x309   : > { %v2970_v23 = vpop.eup %2969  ;;  %2981 = vtanh.f32 %v1617_v46  ;;  %v1619_v49 = vadd.f32 %v1618_v6, %v4088_v45  ;;  %v1726_v60 = vpack.c.bf16 %v2964_v25, %v2968_v1  ;;  %v1609_v25 = vadd.f32 %v4157_v2, %v4092_v16 }
 0x30a   : > { %v2972_v17 = vpop.eup %2971  ;;  %2983 = vtanh.f32 %v1570_v47  ;;  %1879 = vmatpush.bf16.msra.mxu0 %v1721_v0  ;;  %v1717_v29 = vpack.c.bf16 %v2970_v23, %v2952_v20  ;;  %v1555_v20 = vadd.f32 %v4122_v59, %v4118_v27  ;;  %v1713_v2 = vpack.c.bf16 %v4225_v37, %v4219_v18  ;;  %v4695_v23 = vld [vmem:[#allocation22_spill] sm:$0xff] }
 0x30b   : > { %v2974_v39 = vpop.eup %2973  ;;  %2985 = vtanh.f32 %v1619_v49  ;;  %1927 = vmatpush.bf16.msra.mxu1 %v1726_v60  ;;  %v1604_v22 = vadd.f32 %v4124_v28, %v4118_v27  ;;  %v1553_v32 = vadd.f32 %v4110_v10, %v4096_v15  ;;  %v1602_v59 = vadd.f32 %v4112_v35, %v4096_v15  ;;  %v4696_v49 = vld [vmem:[#allocation18_spill] sm:$0xff]  ;;  %v4697_v60 = vld [vmem:[#allocation20_spill] sm:$0xff] }
 0x30c   : > { %v2976_v19 = vpop.eup %2975  ;;  %2987 = vtanh.f32 %v1565_v40  ;;  %v1550_v27 = vadd.f32 %v4098_v4, %v4114_v43  ;;  %v1709_v28 = vpack.c.bf16 %v4212_v12, %v4204_v57  ;;  %v1599_v37 = vadd.f32 %v4100_v52, %v4114_v43 }
 0x30d   : > { %v2978_v45 = vpop.eup %2977  ;;  %2989 = vtanh.f32 %v1614_v56  ;;  %v1722_v30 = vpack.c.bf16 %v2972_v17, %v2976_v19  ;;  %v1714_v15 = vpack.c.bf16 %v4229_v5, %v4221_v13  ;;  %v1548_v7 = vadd.f32 %v4084_v63, %v4108_v34  ;;  %v2639_v17 = vld [vmem:[%s4614_s7] sm:$0xff] }
 0x30e   : > { %v2980_v62 = vpop.eup %2979  ;;  %2991 = vtanh.f32 %v1563_v61  ;;  %1880 = vmatpush.bf16.msra.mxu0 %v1717_v29  ;;  %v1718_v11 = vpack.c.bf16 %v2978_v45, %v2974_v39  ;;  %v1597_v12 = vadd.f32 %v4086_v41, %v4108_v34  ;;  %v1545_v43 = vadd.f32 %v4072_v31, %v4126_v38  ;;  %v4698_v39 = vld [vmem:[#allocation12_spill] sm:$0xff] }
 0x30f   : > { %v2982_v42 = vpop.eup %2981  ;;  %2993 = vtanh.f32 %v1612_v9  ;;  %1928 = vmatpush.bf16.msra.mxu1 %v1722_v30  ;;  %v1705_v5 = vpack.c.bf16 %v4199_v50, %v4191_v54  ;;  %v1594_v57 = vadd.f32 %v4074_v55, %v4126_v38  ;;  %v1710_v41 = vpack.c.bf16 %v4216_v24, %v4208_v14  ;;  %v4691_v38 = vld [vmem:[#allocation11_spill] sm:$0xff]  ;;  %v4692_v54 = vld [vmem:[#allocation21_spill] sm:$0xff]  ;;  %v4700_v45 = vld [vmem:[#allocation8_spill] sm:$0xff] }
 0x310   : > { %v2984_v44 = vpop.eup %2983  ;;  %2995 = vtanh.f32 %v1560_v36  ;;  %v1543_v40 = vadd.f32 %v4062_v33, %v4134_v58  ;;  %v1592_v50 = vadd.f32 %v4064_v8, %v4134_v58  ;;  %v1540_v6 = vadd.f32 %v4692_v54, %v4691_v38  ;;  %v4693_v14 = vld [vmem:[#allocation3_spill] sm:$0xff]  ;;  %v4344_v54 = vpop.permute.xlu0 %1761 }
 0x311   : > { %v2986_v16 = vpop.eup %2985  ;;  %2997 = vtanh.f32 %v1609_v25  ;;  %v1731_v53 = vpack.c.bf16 %v2984_v44, %v2980_v62  ;;  %v4694_v24 = vld [vmem:[#allocation15_spill] sm:$0xff]  ;;  %v1589_v56 = vadd.f32 %v4695_v23, %v4691_v38  ;;  %v1706_v8 = vpack.c.bf16 %v4697_v60, %v4696_v49  ;;  %v4701_v62 = vld [vmem:[#allocation6_spill] sm:$0xff]  ;;  %v4703_v44 = vld [vmem:[#allocation17_spill] sm:$0xff]  ;;  %v4342_v38 = vpop.permute.xlu2 %1756 }
 0x312   : > { %v2988_v46 = vpop.eup %2987  ;;  %2999 = vtanh.f32 %v1558_v21  ;;  %v1732_v48 = vpack.c.bf16 %v2986_v16, %v2982_v42  ;;  %1881 = vmatpush.bf16.msra.mxu0 %v1713_v2  ;;  %v1701_v0 = vpack.c.bf16 %v4694_v24, %v4693_v14  ;;  %v4699_v9 = vld [vmem:[#allocation19_spill] sm:$0xff]  ;;  %v1587_v25 = vadd.f32 %v4700_v45, %v4698_v39  ;;  %v4704_v2 = vld [vmem:[#allocation13_spill] sm:$0xff]  ;;  %v4705_v16 = vld [vmem:[#allocation4_spill] sm:$0xff] }
 0x313   : > { %v2990_v3 = vpop.eup %2989  ;;  %3001 = vtanh.f32 %v1607_v26  ;;  %1929 = vmatpush.bf16.msra.mxu1 %v1718_v11  ;;  %1975 = vmatpush.bf16.msra.mxu2 %v1731_v53  ;;  %v1538_v19 = vadd.f32 %v4699_v9, %v4698_v39  ;;  %v4702_v21 = vld [vmem:[#allocation7_spill] sm:$0xff]  ;;  %v2646_v14 = vld [vmem:[%s4614_s7 + $0x38] sm:$0xff] }
 0x314   : > { %v2992_v18 = vpop.eup %2991  ;;  %3003 = vtanh.f32 %v1555_v20  ;;  %2024 = vmatpush.bf16.msra.mxu3 %v1732_v48  ;;  %v1535_v42 = vadd.f32 %v4702_v21, %v4701_v62  ;;  %v1584_v20 = vadd.f32 %v4703_v44, %v4701_v62 }
 0x315   : > { %v2994_v10 = vpop.eup %2993  ;;  %3005 = vtanh.f32 %v1604_v22  ;;  %v1727_v35 = vpack.c.bf16 %v2988_v46, %v2992_v18  ;;  %v1702_v22 = vpack.c.bf16 %v4705_v16, %v4704_v2  ;;  %v4706_v46 = vld [vmem:[#allocation5_spill] sm:$0xff]  ;;  %v4708_v18 = vld [vmem:[#allocation10_spill] sm:$0xff] }
 0x316   : > { %v2996_v51 = vpop.eup %2995  ;;  %3007 = vtanh.f32 %v1553_v32  ;;  %v1728_v4 = vpack.c.bf16 %v2990_v3, %v2994_v10  ;;  %1882 = vmatpush.bf16.msra.mxu0 %v1709_v28  ;;  %v4707_v32 = vld [vmem:[#allocation9_spill] sm:$0xff] }
 0x317   : > { %v2998_v1 = vpop.eup %2997  ;;  %3009 = vtanh.f32 %v1602_v59  ;;  %1930 = vmatpush.bf16.msra.mxu1 %v1714_v15  ;;  %1976 = vmatpush.bf16.msra.mxu2 %v1727_v35  ;;  %v1533_v48 = vadd.f32 %v4707_v32, %v4706_v46 }
 0x318   : > { %v3000_v52 = vpop.eup %2999  ;;  %3011 = vtanh.f32 %v1550_v27  ;;  %2025 = vmatpush.bf16.msra.mxu3 %v1728_v4  ;;  %v1582_v27 = vadd.f32 %v4708_v18, %v4706_v46 }
 0x319   : > { %v3002_v63 = vpop.eup %3001  ;;  %3013 = vtanh.f32 %v1599_v37  ;;  %v1723_v34 = vpack.c.bf16 %v2996_v51, %v3000_v52  ;;  %v4351_v24 = vpop.permute.xlu2 %1771 }
 0x31a   : > { %v3004_v13 = vpop.eup %3003  ;;  %3015 = vtanh.f32 %v1548_v7  ;;  %v1724_v31 = vpack.c.bf16 %v2998_v1, %v3002_v63  ;;  %1883 = vmatpush.bf16.msra.mxu0 %v1705_v5 }
 0x31b   : > { %v3006_v47 = vpop.eup %3005  ;;  %3017 = vtanh.f32 %v1597_v12  ;;  %1931 = vmatpush.bf16.msra.mxu1 %v1710_v41  ;;  %1977 = vmatpush.bf16.msra.mxu2 %v1723_v34  ;;  %v2640_v41 = vld [vmem:[%s4614_s7 + $0x8] sm:$0xff] }
 0x31c   : > { %v3008_v55 = vpop.eup %3007  ;;  %3019 = vtanh.f32 %v1545_v43  ;;  %2026 = vmatpush.bf16.msra.mxu3 %v1724_v31  ;;  %v2643_v31 = vld [vmem:[%s4614_s7 + $0x20] sm:$0xff] }
 0x31d   : > { %v3010_v33 = vpop.eup %3009  ;;  %3021 = vtanh.f32 %v1594_v57  ;;  %v1719_v58 = vpack.c.bf16 %v3004_v13, %v3008_v55  ;;  %v2641_v13 = vld [vmem:[%s4614_s7 + $0x10] sm:$0xff] }
 0x31e   : > { %v3012_v61 = vpop.eup %3011  ;;  %3023 = vtanh.f32 %v1543_v40  ;;  %v1720_v36 = vpack.c.bf16 %v3006_v47, %v3010_v33  ;;  %1884 = vmatpush.bf16.msra.mxu0 %v1701_v0  ;;  %v2642_v40 = vld [vmem:[%s4614_s7 + $0x18] sm:$0xff]  ;;  %v2644_v47 = vld [vmem:[%s4614_s7 + $0x28] sm:$0xff]  ;;  %v2645_v55 = vld [vmem:[%s4614_s7 + $0x30] sm:$0xff]  ;;  %v4353_v0 = vpop.permute.xlu0 %1776 }
 0x31f   : > { %v3014_v29 = vpop.eup %3013  ;;  %3025 = vtanh.f32 %v1592_v50  ;;  %1932 = vmatpush.bf16.msra.mxu1 %v1706_v8  ;;  %1978 = vmatpush.bf16.msra.mxu2 %v1719_v58  ;;  %v4337_v50 = vpop.permute.xlu1 %1751 }
 0x320   : > { %v3016_v30 = vpop.eup %3015  ;;  %3027 = vtanh.f32 %v1540_v6  ;;  %2027 = vmatpush.bf16.msra.mxu3 %v1720_v36 }
 0x321   : > { %v3018_v26 = vpop.eup %3017  ;;  %3029 = vtanh.f32 %v1589_v56  ;;  %v1715_v11 = vpack.c.bf16 %v3012_v61, %v3016_v30  ;;  %1885 = vmatmul.bf16.vlgmr.msra.gmra.mxu0 %v2639_v17  ;;  %v4357_v23 = vpop.permute.xlu2 %1786 }
 0x322   : > { %v3020_v53 = vpop.eup %3019  ;;  %3031 = vtanh.f32 %v1538_v19  ;;  %v1716_v3 = vpack.c.bf16 %v3014_v29, %v3018_v26 }
 0x323   : > { %v3022_v59 = vpop.eup %3021  ;;  %3033 = vtanh.f32 %v1587_v25  ;;  %1933 = vmatpush.bf16.msra.mxu1 %v1702_v22  ;;  %1979 = vmatpush.bf16.msra.mxu2 %v1715_v11 }
 0x324   : > { %v3024_v28 = vpop.eup %3023  ;;  %3035 = vtanh.f32 %v1535_v42  ;;  %2028 = vmatpush.bf16.msra.mxu3 %v1716_v3 }
 0x325   : > { %v3026_v10 = vpop.eup %3025  ;;  %3037 = vtanh.f32 %v1584_v20  ;;  %v1711_v37 = vpack.c.bf16 %v3020_v53, %v3024_v28 }
 0x326   : > { %v3028_v15 = vpop.eup %3027  ;;  %3039 = vtanh.f32 %v1533_v48  ;;  %1934 = vmatmul.bf16.vlgmr.msra.gmra.mxu1 %v2639_v17  ;;  %v1712_v35 = vpack.c.bf16 %v3022_v59, %v3026_v10  ;;  %v4359_v56 = vpop.permute.xlu0 %1791 }
 0x327   : > { %v3030_v51 = vpop.eup %3029  ;;  %3041 = vtanh.f32 %v1582_v27  ;;  %1980 = vmatpush.bf16.msra.mxu2 %v1711_v37  ;;  %v4346_v6 = vpop.permute.xlu1 %1766 }
 0x328   : > { %v3032_v7 = vpop.eup %3031  ;;  %2029 = vmatpush.bf16.msra.mxu3 %v1712_v35 }
 0x329   : > { %v3034_v4 = vpop.eup %3033  ;;  %v1707_v1 = vpack.c.bf16 %v3028_v15, %v3032_v7  ;;  %v4363_v8 = vpop.permute.xlu2 %1801 }
 0x32a   : > { %v3036_v12 = vpop.eup %3035  ;;  %v1708_v52 = vpack.c.bf16 %v3030_v51, %v3034_v4 }
 0x32b   : > { %v3038_v43 = vpop.eup %3037  ;;  %1981 = vmatpush.bf16.msra.mxu2 %v1707_v1 }
 0x32c   : > { %v3040_v5 = vpop.eup %3039  ;;  %2030 = vmatpush.bf16.msra.mxu3 %v1708_v52 }
 0x32d   : > { %v3042_v63 = vpop.eup %3041  ;;  %v1703_v57 = vpack.c.bf16 %v3036_v12, %v3040_v5 }
 0x32e   : > { %v1704_v34 = vpack.c.bf16 %v3038_v43, %v3042_v63  ;;  %v4366_v61 = vpop.permute.xlu0 %1806 }
 0x32f   : > { %1982 = vmatpush.bf16.msra.mxu2 %v1703_v57  ;;  %v4355_v33 = vpop.permute.xlu1 %1781 }
 0x330   : > { %2031 = vmatpush.bf16.msra.mxu3 %v1704_v34 }
 0x331   : > { %1890 = vmatmul.bf16.gmra.mxu0 %v2640_v41  ;;  %v4373_v30 = vpop.permute.xlu2 %1816 }
 0x332   : > { %1983 = vmatmul.bf16.vlgmr.msra.gmra.mxu2 %v2639_v17 }
 0x333   : > { %2032 = vmatmul.bf16.vlgmr.msra.gmra.mxu3 %v2639_v17 }
 0x336   : > { %1939 = vmatmul.bf16.gmra.mxu1 %v2640_v41  ;;  %v4375_v42 = vpop.permute.xlu0 %2155 }
 0x337   : > { %v4361_v49 = vpop.permute.xlu1 %1796 }
 0x339   : > { %v4385_v28 = vpop.permute.xlu2 %2165 }
 0x33f   : > { %v4368_v39 = vpop.permute.xlu1 %1811 }
 0x341   : > { %1895 = vmatmul.bf16.gmra.mxu0 %v2641_v13 }
 0x342   : > { %1988 = vmatmul.bf16.gmra.mxu2 %v2640_v41 }
 0x343   : > { %2037 = vmatmul.bf16.gmra.mxu3 %v2640_v41 }
 0x346   : > { %1944 = vmatmul.bf16.gmra.mxu1 %v2641_v13 }
 0x347   : > { %v4377_v26 = vpop.permute.xlu1 %2160 }
 0x351   : > { %1900 = vmatmul.bf16.gmra.mxu0 %v2642_v40 }
 0x352   : > { %1993 = vmatmul.bf16.gmra.mxu2 %v2641_v13 }
 0x353   : > { %2042 = vmatmul.bf16.gmra.mxu3 %v2641_v13 }
 0x356   : > { %1949 = vmatmul.bf16.gmra.mxu1 %v2642_v40 }
 0x361   : > { %1905 = vmatmul.bf16.gmra.mxu0 %v2643_v31 }
 0x362   : > { %1998 = vmatmul.bf16.gmra.mxu2 %v2642_v40 }
 0x363   : > { %2047 = vmatmul.bf16.gmra.mxu3 %v2642_v40 }
 0x366   : > { %1954 = vmatmul.bf16.gmra.mxu1 %v2643_v31 }
 0x371   : > { %1910 = vmatmul.bf16.gmra.mxu0 %v2644_v47 }
 0x372   : > { %2003 = vmatmul.bf16.gmra.mxu2 %v2643_v31 }
 0x373   : > { %2052 = vmatmul.bf16.gmra.mxu3 %v2643_v31  ;;  %v2171_v31 = vpop.permute.xlu0 %2170 }
 0x376   : > { %1959 = vmatmul.bf16.gmra.mxu1 %v2644_v47 }
 0x381   : > { %1915 = vmatmul.bf16.gmra.mxu0 %v2645_v55 }
 0x382   : > { %2008 = vmatmul.bf16.gmra.mxu2 %v2644_v47 }
 0x383   : > { %2057 = vmatmul.bf16.gmra.mxu3 %v2644_v47 }
 0x386   : > { %1964 = vmatmul.bf16.gmra.mxu1 %v2645_v55 }
 0x391   : > { %1920 = vmatmul.bf16.gmra.mxu0 %v2646_v14 }
 0x392   : > { %2013 = vmatmul.bf16.gmra.mxu2 %v2645_v55 }
 0x393   : > { %2062 = vmatmul.bf16.gmra.mxu3 %v2645_v55 }
 0x396   : > { %1969 = vmatmul.bf16.gmra.mxu1 %v2646_v14 }
 0x39e   : > { %v1886_v60 = vpop.f32.mrf.mxu0 }
 0x39f   : > { %v1887_v58 = vadd.f32 %v1886_v60, %v4337_v50 }
 0x3a1   : > { %3043 = vtanh.f32 %v1887_v58 }
 0x3a2   : > { %2018 = vmatmul.bf16.gmra.mxu2 %v2646_v14 }
 0x3a3   : > { %2067 = vmatmul.bf16.gmra.mxu3 %v2646_v14  ;;  %v1935_v17 = vpop.f32.mrf.mxu1 }
 0x3a4   : > { %v1936_v36 = vadd.f32 %v1935_v17, %v4337_v50 }
 0x3a6   : > { %v1888_v9 = vpop.f32.mrf.mxu0 }
 0x3a7   : > { %v1889_v19 = vadd.f32 %v1888_v9, %v4342_v38  ;;  %v3044_v25 = vpop.eup %3043 }
 0x3a8   : > { %v2233_v20 = vmul.f32 %v3044_v25, %v4375_v42 }
 0x3a9   : > { %3045 = vtanh.f32 %v1889_v19 }
 0x3aa   : > { %3047 = vtanh.f32 %v1936_v36 }
 0x3ab   : > { %v1937_v29 = vpop.f32.mrf.mxu1 }
 0x3ac   : > { %v1938_v45 = vadd.f32 %v1937_v29, %v4342_v38 }
 0x3ae   : > { %3049 = vtanh.f32 %v1938_v45  ;;  %v1891_v62 = vpop.f32.mrf.mxu0 }
 0x3af   : > { %v3046_v21 = vpop.eup %3045  ;;  %v1892_v44 = vadd.f32 %v1891_v62, %v4344_v54 }
 0x3b0   : > { %v2237_v2 = vmul.f32 %v3046_v21, %v4377_v26  ;;  %v3048_v16 = vpop.eup %3047 }
 0x3b1   : > { %3051 = vtanh.f32 %v1892_v44  ;;  %v2234_v32 = vmul.f32 %v3048_v16, %v4375_v42  ;;  %v2176_v16 = vpop.permute.xlu1 %2175 }
 0x3b2   : > { %v2297_v22 = vadd.f32 %v2237_v2, %v2233_v20 }
 0x3b3   : > { %v1940_v11 = vpop.f32.mrf.mxu1 }
 0x3b4   : > { %v3050_v53 = vpop.eup %3049  ;;  %v1941_v46 = vadd.f32 %v1940_v11, %v4344_v54 }
 0x3b5   : > { %v2238_v48 = vmul.f32 %v3050_v53, %v4377_v26  ;;  %v1984_v3 = vpop.f32.mrf.mxu2 }
 0x3b6   : > { %3053 = vtanh.f32 %v1941_v46  ;;  %v2033_v59 = vpop.f32.mrf.mxu3  ;;  %v1893_v18 = vpop.f32.mrf.mxu0  ;;  %v1985_v35 = vadd.f32 %v1984_v3, %v4337_v50 }
 0x3b7   : > { %v3052_v27 = vpop.eup %3051  ;;  %v2318_v10 = vadd.f32 %v2238_v48, %v2234_v32  ;;  %v1894_v37 = vadd.f32 %v1893_v18, %v4346_v6  ;;  %v2034_v7 = vadd.f32 %v2033_v59, %v4337_v50 }
 0x3b8   : > { %v2241_v15 = vmul.f32 %v3052_v27, %v4385_v28 }
 0x3b9   : > { %3055 = vtanh.f32 %v1894_v37 }
 0x3ba   : > { %v2298_v51 = vadd.f32 %v2297_v22, %v2241_v15  ;;  %3057 = vtanh.f32 %v1985_v35 }
 0x3bb   : > { %v1942_v4 = vpop.f32.mrf.mxu1 }
 0x3bc   : > { %v3054_v1 = vpop.eup %3053  ;;  %v1943_v12 = vadd.f32 %v1942_v4, %v4346_v6 }
 0x3bd   : > { %v2242_v52 = vmul.f32 %v3054_v1, %v4385_v28  ;;  %v1986_v43 = vpop.f32.mrf.mxu2 }
 0x3be   : > { %3059 = vtanh.f32 %v1943_v12  ;;  %v1987_v5 = vadd.f32 %v1986_v43, %v4342_v38  ;;  %v2035_v63 = vpop.f32.mrf.mxu3  ;;  %v1896_v57 = vpop.f32.mrf.mxu0 }
 0x3bf   : > { %v2319_v41 = vadd.f32 %v2318_v10, %v2242_v52  ;;  %3061 = vtanh.f32 %v2034_v7  ;;  %v2036_v34 = vadd.f32 %v2035_v63, %v4342_v38  ;;  %v1897_v13 = vadd.f32 %v1896_v57, %v4351_v24  ;;  %v3056_v40 = vpop.eup %3055 }
 0x3c0   : > { %3063 = vtanh.f32 %v1987_v5  ;;  %v2245_v47 = vmul.f32 %v3056_v40, %v2171_v31  ;;  %v3058_v50 = vpop.eup %3057 }
 0x3c1   : > { %3065 = vtanh.f32 %v2036_v34  ;;  %v2235_v62 = vmul.f32 %v3058_v50, %v4375_v42 }
 0x3c2   : > { %3067 = vtanh.f32 %v1897_v13  ;;  %v2299_v55 = vadd.f32 %v2298_v51, %v2245_v47 }
 0x3c3   : > { %v1945_v14 = vpop.f32.mrf.mxu1 }
 0x3c4   : > { %v3060_v60 = vpop.eup %3059  ;;  %v1946_v58 = vadd.f32 %v1945_v14, %v4351_v24 }
 0x3c5   : > { %v3062_v17 = vpop.eup %3061  ;;  %v2246_v9 = vmul.f32 %v3060_v60, %v2171_v31  ;;  %v1989_v19 = vpop.f32.mrf.mxu2 }
 0x3c6   : > { %v3064_v36 = vpop.eup %3063  ;;  %3069 = vtanh.f32 %v1946_v58  ;;  %v1990_v38 = vadd.f32 %v1989_v19, %v4344_v54  ;;  %v2038_v29 = vpop.f32.mrf.mxu3  ;;  %v2236_v22 = vmul.f32 %v3062_v17, %v4375_v42 }
 0x3c7   : > { %v4398_v45 = vpop.f32.mrf.mxu0  ;;  %v3066_v25 = vpop.eup %3065  ;;  %v2320_v21 = vadd.f32 %v2319_v41, %v2246_v9  ;;  %v2239_v44 = vmul.f32 %v3064_v36, %v4377_v26  ;;  %v2039_v20 = vadd.f32 %v2038_v29, %v4344_v54 }
 0x3c8   : > { %v3068_v2 = vpop.eup %3067  ;;  %v2240_v11 = vmul.f32 %v3066_v25, %v4377_v26  ;;  %3071 = vtanh.f32 %v1990_v38 }
 0x3c9   : > { %v2339_v53 = vadd.f32 %v2239_v44, %v2235_v62  ;;  %v2249_v46 = vmul.f32 %v3068_v2, %v2176_v16  ;;  %3073 = vtanh.f32 %v2039_v20 }
 0x3ca   : > { %v2360_v32 = vadd.f32 %v2240_v11, %v2236_v22 }
 0x3cb   : > { %v4405_v48 = vadd.f32 %v2299_v55, %v2249_v46  ;;  %v1947_v3 = vpop.f32.mrf.mxu1  ;;  %v4429_v46 = vpop.permute.xlu0 %2185 }
 0x3cc   : > { %v3070_v59 = vpop.eup %3069 }
 0x3cd   : > { %v2250_v18 = vmul.f32 %v3070_v59, %v2176_v16  ;;  %v1991_v27 = vpop.f32.mrf.mxu2 }
 0x3ce   : > { %v3072_v10 = vpop.eup %3071  ;;  %v1992_v54 = vadd.f32 %v1991_v27, %v4346_v6  ;;  %v2040_v37 = vpop.f32.mrf.mxu3 }
 0x3cf   : > { %v1901_v15 = vpop.f32.mrf.mxu0  ;;  %v3074_v35 = vpop.eup %3073  ;;  %v4408_v42 = vadd.f32 %v2320_v21, %v2250_v18  ;;  %v2243_v26 = vmul.f32 %v3072_v10, %v4385_v28  ;;  %v2041_v51 = vadd.f32 %v2040_v37, %v4346_v6 }
 0x3d0   : > { %v2244_v7 = vmul.f32 %v3074_v35, %v4385_v28  ;;  %3075 = vtanh.f32 %v1992_v54  ;;  %v1902_v18 = vadd.f32 %v1901_v15, %v4355_v33  ;;  %v4433_v27 = vpop.permute.xlu1 %2190 }
 0x3d1   : > { %v2340_v4 = vadd.f32 %v2339_v53, %v2243_v26  ;;  %3077 = vtanh.f32 %v2041_v51  ;;  %v1899_v53 = vadd.f32 %v4398_v45, %v4353_v0 }
 0x3d2   : > { %v2361_v1 = vadd.f32 %v2360_v32, %v2244_v7  ;;  %v1948_v32 = vadd.f32 %v1947_v3, %v4353_v0 }
 0x3d3   : > { %v1950_v12 = vpop.f32.mrf.mxu1 }
 0x3d4   : > { %v1951_v10 = vadd.f32 %v1950_v12, %v4355_v33 }
 0x3d5   : > { %v1994_v52 = vpop.f32.mrf.mxu2 }
 0x3d6   : > { %v3076_v43 = vpop.eup %3075  ;;  %v1995_v5 = vadd.f32 %v1994_v52, %v4351_v24  ;;  %v2043_v63 = vpop.f32.mrf.mxu3 }
 0x3d7   : > { %v1903_v57 = vpop.f32.mrf.mxu0  ;;  %v3078_v41 = vpop.eup %3077  ;;  %v2247_v34 = vmul.f32 %v3076_v43, %v2171_v31  ;;  %v2044_v13 = vadd.f32 %v2043_v63, %v4351_v24 }
 0x3d8   : > { %v2248_v40 = vmul.f32 %v3078_v41, %v2171_v31  ;;  %3079 = vtanh.f32 %v1995_v5  ;;  %v1904_v37 = vadd.f32 %v1903_v57, %v4357_v23  ;;  %v4449_v5 = vpop.permute.xlu0 %2200 }
 0x3d9   : > { %v2341_v6 = vadd.f32 %v2340_v4, %v2247_v34  ;;  %3081 = vtanh.f32 %v2044_v13 }
 0x3da   : > { %v2362_v28 = vadd.f32 %v2361_v1, %v2248_v40  ;;  %3083 = vtanh.f32 %v1899_v53 }
 0x3db   : > { %v1952_v47 = vpop.f32.mrf.mxu1  ;;  %3085 = vtanh.f32 %v1948_v32 }
 0x3dc   : > { %v1953_v45 = vadd.f32 %v1952_v47, %v4357_v23  ;;  %3087 = vtanh.f32 %v1902_v18  ;;  %v4458_v47 = vpop.permute.xlu1 %1821 }
 0x3dd   : > { %v1996_v50 = vpop.f32.mrf.mxu2  ;;  %3089 = vtanh.f32 %v1951_v10 }
 0x3de   : > { %v3080_v55 = vpop.eup %3079  ;;  %v2045_v14 = vpop.f32.mrf.mxu3  ;;  %v1997_v3 = vadd.f32 %v1996_v50, %v4353_v0  ;;  %3091 = vtanh.f32 %v1904_v37 }
 0x3df   : > { %v1906_v60 = vpop.f32.mrf.mxu0  ;;  %v3082_v58 = vpop.eup %3081  ;;  %v2251_v17 = vmul.f32 %v3080_v55, %v2176_v16  ;;  %v2046_v15 = vadd.f32 %v2045_v14, %v4353_v0  ;;  %3093 = vtanh.f32 %v1953_v45 }
 0x3e0   : > { %v2252_v9 = vmul.f32 %v3082_v58, %v2176_v16  ;;  %v4425_v16 = vpop.permute.xlu2 %2180  ;;  %v1907_v7 = vadd.f32 %v1906_v60, %v4359_v56  ;;  %v3084_v12 = vpop.eup %3083  ;;  %3095 = vtanh.f32 %v1997_v3 }
 0x3e1   : > { %v4415_v19 = vadd.f32 %v2341_v6, %v2251_v17  ;;  %v3086_v43 = vpop.eup %3085  ;;  %3097 = vtanh.f32 %v2046_v15  ;;  %v4487_v15 = vpop.permute.xlu0 %1826 }
 0x3e2   : > { %v4417_v36 = vadd.f32 %v2362_v28, %v2252_v9  ;;  %v3088_v0 = vpop.eup %3087  ;;  %3099 = vtanh.f32 %v1907_v7  ;;  %v2253_v9 = vmul.f32 %v3084_v12, %v4425_v16  ;;  %v2254_v32 = vmul.f32 %v3086_v43, %v4425_v16 }
 0x3e3   : > { %v1955_v38 = vpop.f32.mrf.mxu1  ;;  %v3090_v40 = vpop.eup %3089 }
 0x3e4   : > { %v1956_v4 = vadd.f32 %v1955_v38, %v4359_v56  ;;  %v3092_v28 = vpop.eup %3091  ;;  %v2258_v7 = vmul.f32 %v3090_v40, %v4429_v46 }
 0x3e5   : > { %v1999_v29 = vpop.f32.mrf.mxu2  ;;  %v2261_v45 = vmul.f32 %v3092_v28, %v4433_v27 }
 0x3e6   : > { %v2048_v24 = vpop.f32.mrf.mxu3  ;;  %v2000_v52 = vadd.f32 %v1999_v29, %v4355_v33  ;;  %3101 = vtanh.f32 %v1956_v4 }
 0x3e7   : > { %v1908_v31 = vpop.f32.mrf.mxu0  ;;  %v2049_v63 = vadd.f32 %v2048_v24, %v4355_v33  ;;  %v3094_v33 = vpop.eup %3093 }
 0x3e8   : > { %v4443_v51 = vpop.permute.xlu2 %2195  ;;  %v1909_v41 = vadd.f32 %v1908_v31, %v4361_v49  ;;  %3103 = vtanh.f32 %v2000_v52  ;;  %v4462_v14 = vpop.eup %3095 }
 0x3e9   : > { %3105 = vtanh.f32 %v2049_v63  ;;  %v4465_v58 = vpop.eup %3097 }
 0x3ea   : > { %3107 = vtanh.f32 %v1909_v41  ;;  %v3100_v24 = vpop.eup %3099  ;;  %v2262_v41 = vmul.f32 %v3094_v33, %v4433_v27 }
 0x3eb   : > { %v1957_v25 = vpop.f32.mrf.mxu1  ;;  %v2265_v43 = vmul.f32 %v3100_v24, %v4443_v51 }
 0x3ec   : > { %v1958_v6 = vadd.f32 %v1957_v25, %v4361_v49  ;;  %v3102_v25 = vpop.eup %3101 }
 0x3ed   : > { %v2001_v62 = vpop.f32.mrf.mxu2 }
 0x3ee   : > { %v4419_v21 = vpop.f32.mrf.mxu3  ;;  %v2002_v55 = vadd.f32 %v2001_v62, %v4357_v23  ;;  %3109 = vtanh.f32 %v1958_v6  ;;  %v2257_v62 = vmul.f32 %v3088_v0, %v4429_v46  ;;  %v4476_v53 = vpop.eup %3103 }
 0x3ef   : > { %v1911_v44 = vpop.f32.mrf.mxu0  ;;  %v4482_v37 = vpop.eup %3105 }
 0x3f0   : > { %v1912_v50 = vadd.f32 %v1911_v44, %v4363_v8  ;;  %v4467_v17 = vpop.permute.xlu2 %2205  ;;  %v3108_v3 = vpop.eup %3107 }
 0x3f1   : > { %v4494_v0 = vpop.permute.xlu1 %2210  ;;  %v2269_v28 = vmul.f32 %v3108_v3, %v4449_v5 }
 0x3f2   : > { %3111 = vtanh.f32 %v1912_v50 }
 0x3f3   : > { %v1960_v20 = vpop.f32.mrf.mxu1  ;;  %3113 = vtanh.f32 %v2002_v55 }
 0x3f4   : > { %v1961_v38 = vadd.f32 %v1960_v20, %v4363_v8  ;;  %v3110_v12 = vpop.eup %3109 }
 0x3f5   : > { %v4421_v2 = vpop.f32.mrf.mxu2 }
 0x3f6   : > { %v4423_v22 = vpop.f32.mrf.mxu3 }
 0x3f7   : > { %v1913_v11 = vpop.f32.mrf.mxu0 }
 0x3f8   : > { %v1914_v60 = vadd.f32 %v1913_v11, %v4366_v61  ;;  %v3112_v63 = vpop.eup %3111 }
 0x3f9   : > { %v4499_v40 = vpop.eup %3113 }
 0x3fa   : > { %3115 = vtanh.f32 %v1914_v60 }
 0x3fb   : > { %v1962_v59 = vpop.f32.mrf.mxu1  ;;  %3117 = vtanh.f32 %v1961_v38  ;;  %v2273_v38 = vmul.f32 %v3112_v63, %v4467_v17  ;;  %v2255_v63 = vmul.f32 %v4462_v14, %v4425_v16 }
 0x3fc   : > { %v1963_v44 = vadd.f32 %v1962_v59, %v4366_v61 }
 0x3fd   : > { %v4436_v54 = vpop.f32.mrf.mxu2 }
 0x3fe   : > { %v4439_v35 = vpop.f32.mrf.mxu3 }
 0x3ff   : > { %v1916_v26 = vpop.f32.mrf.mxu0 }
 0x400   : > { %v1917_v31 = vadd.f32 %v1916_v26, %v4368_v39  ;;  %v2301_v26 = vadd.f32 %v4405_v48, %v2253_v9  ;;  %v2051_v48 = vadd.f32 %v4419_v21, %v4357_v23  ;;  %v3116_v55 = vpop.eup %3115  ;;  %v2266_v21 = vmul.f32 %v3102_v25, %v4443_v51  ;;  %v4504_v9 = vpop.permute.xlu2 %2215 }
 0x402   : > { %3119 = vtanh.f32 %v1917_v31  ;;  %v2302_v52 = vadd.f32 %v2301_v26, %v2257_v62  ;;  %v2054_v26 = vadd.f32 %v4423_v22, %v4359_v56 }
 0x403   : > { %v1965_v1 = vpop.f32.mrf.mxu1  ;;  %3121 = vtanh.f32 %v1963_v44  ;;  %v2270_v44 = vmul.f32 %v3110_v12, %v4449_v5 }
 0x404   : > { %v1966_v59 = vadd.f32 %v1965_v1, %v4368_v39  ;;  %v2322_v1 = vadd.f32 %v4408_v42, %v2254_v32  ;;  %v2303_v6 = vadd.f32 %v2302_v52, %v2261_v45  ;;  %v3118_v42 = vpop.eup %3117  ;;  %v2277_v45 = vmul.f32 %v3116_v55, %v4494_v0 }
 0x405   : > { %v4452_v57 = vpop.f32.mrf.mxu2 }
 0x406   : > { %v4455_v34 = vpop.f32.mrf.mxu3  ;;  %v2323_v23 = vadd.f32 %v2322_v1, %v2258_v7  ;;  %v2304_v33 = vadd.f32 %v2303_v6, %v2265_v43  ;;  %v2274_v7 = vmul.f32 %v3118_v42, %v4467_v17  ;;  %v2056_v43 = vadd.f32 %v4439_v35, %v4361_v49 }
 0x407   : > { %v1918_v13 = vpop.f32.mrf.mxu0  ;;  %v2256_v1 = vmul.f32 %v4465_v58, %v4425_v16  ;;  %v2010_v14 = vadd.f32 %v4452_v57, %v4363_v8 }
 0x408   : > { %v1919_v20 = vadd.f32 %v1918_v13, %v4373_v30  ;;  %v3120_v31 = vpop.eup %3119  ;;  %v2324_v62 = vadd.f32 %v2323_v23, %v2262_v41 }
 0x40a   : > { %3123 = vtanh.f32 %v1919_v20  ;;  %v3122_v20 = vpop.eup %3121  ;;  %v2325_v3 = vadd.f32 %v2324_v62, %v2266_v21 }
 0x40b   : > { %v1967_v29 = vpop.f32.mrf.mxu1  ;;  %3125 = vtanh.f32 %v1966_v59  ;;  %v2278_v6 = vmul.f32 %v3122_v20, %v4494_v0 }
 0x40c   : > { %v1968_v13 = vadd.f32 %v1967_v29, %v4373_v30  ;;  %v2005_v29 = vadd.f32 %v4421_v2, %v4359_v56  ;;  %v2281_v56 = vmul.f32 %v3120_v31, %v4504_v9  ;;  %v2326_v41 = vadd.f32 %v2325_v3, %v2270_v44 }
 0x40d   : > { %v4474_v11 = vpop.f32.mrf.mxu2 }
 0x40e   : > { %v4480_v18 = vpop.f32.mrf.mxu3  ;;  %v2327_v55 = vadd.f32 %v2326_v41, %v2274_v7 }
 0x40f   : > { %v1921_v10 = vpop.f32.mrf.mxu0 }
 0x410   : > { %v1922_v4 = vadd.f32 %v1921_v10, %v4458_v47  ;;  %v2305_v10 = vadd.f32 %v2304_v33, %v2269_v28  ;;  %v3124_v2 = vpop.eup %3123  ;;  %v2259_v33 = vmul.f32 %v4476_v53, %v4429_v46  ;;  %v2328_v57 = vadd.f32 %v2327_v55, %v2278_v6 }
 0x411   : > { %v3126_v12 = vpop.eup %3125  ;;  %v2364_v53 = vadd.f32 %v4417_v36, %v2256_v1 }
 0x412   : > { %3127 = vtanh.f32 %v1922_v4  ;;  %v2007_v4 = vadd.f32 %v4436_v54, %v4361_v49  ;;  %v2306_v52 = vadd.f32 %v2305_v10, %v2273_v38  ;;  %v2282_v23 = vmul.f32 %v3126_v12, %v4504_v9  ;;  %v4546_v10 = vpop.permute.xlu2 %2230 }
 0x413   : > { %v1970_v50 = vpop.f32.mrf.mxu1  ;;  %3129 = vtanh.f32 %v2051_v48  ;;  %v4524_v48 = vpop.permute.xlu0 %2220  ;;  %v2059_v38 = vadd.f32 %v4455_v34, %v4363_v8  ;;  %v2061_v8 = vadd.f32 %v4480_v18, %v4366_v61 }
 0x414   : > { %v1971_v60 = vadd.f32 %v1970_v50, %v4458_v47  ;;  %3131 = vtanh.f32 %v1968_v13  ;;  %v2307_v13 = vadd.f32 %v2306_v52, %v2277_v45  ;;  %v2285_v49 = vmul.f32 %v3124_v2, %v4524_v48  ;;  %v4532_v50 = vpop.permute.xlu1 %2225 }
 0x415   : > { %v4509_v24 = vpop.f32.mrf.mxu2  ;;  %v2329_v45 = vadd.f32 %v2328_v57, %v2282_v23 }
 0x416   : > { %v4512_v25 = vpop.f32.mrf.mxu3  ;;  %3133 = vtanh.f32 %v1971_v60  ;;  %v2308_v58 = vadd.f32 %v2307_v13, %v2281_v56 }
 0x417   : > { %v1923_v32 = vpop.f32.mrf.mxu0  ;;  %3135 = vtanh.f32 %v2005_v29 }
 0x418   : > { %v1924_v59 = vadd.f32 %v1923_v32, %v4487_v15  ;;  %v3128_v22 = vpop.eup %3127  ;;  %v2309_v62 = vadd.f32 %v2308_v58, %v2285_v49  ;;  %v2012_v32 = vadd.f32 %v4474_v11, %v4366_v61  ;;  %v2064_v61 = vadd.f32 %v4512_v25, %v4368_v39 }
 0x419   : > { %v3130_v54 = vpop.eup %3129  ;;  %v2289_v21 = vmul.f32 %v3128_v22, %v4532_v50 }
 0x41a   : > { %3137 = vtanh.f32 %v1924_v59  ;;  %v3132_v28 = vpop.eup %3131  ;;  %v2264_v56 = vmul.f32 %v3130_v54, %v4433_v27 }
 0x41b   : > { %3139 = vtanh.f32 %v2054_v26  ;;  %v1972_v35 = vpop.f32.mrf.mxu1  ;;  %v2286_v44 = vmul.f32 %v3132_v28, %v4524_v48  ;;  %v2343_v26 = vadd.f32 %v4415_v19, %v2255_v63  ;;  %v2310_v59 = vadd.f32 %v2309_v62, %v2289_v21  ;;  %v2385_v21 = vpop.permute.xlu0 %2384 }
 0x41c   : > { %3141 = vtanh.f32 %v2007_v4  ;;  %v1973_v16 = vadd.f32 %v1972_v35, %v4487_v15  ;;  %v3134_v42 = vpop.eup %3133  ;;  %v2260_v4 = vmul.f32 %v4482_v37, %v4429_v46  ;;  %v2015_v19 = vadd.f32 %v4509_v24, %v4368_v39 }
 0x41d   : > { %3143 = vtanh.f32 %v2056_v43  ;;  %v2016_v60 = vpop.f32.mrf.mxu2  ;;  %v3136_v31 = vpop.eup %3135  ;;  %v2290_v2 = vmul.f32 %v3134_v42, %v4532_v50  ;;  %v2344_v11 = vadd.f32 %v2343_v26, %v2259_v33  ;;  %v2330_v12 = vadd.f32 %v2329_v45, %v2286_v44 }
 0x41e   : > { %3145 = vtanh.f32 %v1973_v16  ;;  %v2065_v29 = vpop.f32.mrf.mxu3  ;;  %v2263_v43 = vmul.f32 %v4499_v40, %v4433_v27  ;;  %v2017_v46 = vadd.f32 %v2016_v60, %v4373_v30  ;;  %v2365_v13 = vadd.f32 %v2364_v53, %v2260_v4 }
 0x41f   : > { %3147 = vtanh.f32 %v2010_v14  ;;  %v2331_v37 = vadd.f32 %v2330_v12, %v2290_v2  ;;  %v2066_v63 = vadd.f32 %v2065_v29, %v4373_v30  ;;  %v2267_v39 = vmul.f32 %v3136_v31, %v4443_v51 }
 0x420   : > { %v3138_v20 = vpop.eup %3137  ;;  %3149 = vtanh.f32 %v2059_v38  ;;  %v2345_v35 = vadd.f32 %v2344_v11, %v2263_v43  ;;  %v2366_v14 = vadd.f32 %v2365_v13, %v2264_v56 }
 0x421   : > { %v3140_v34 = vpop.eup %3139  ;;  %v2293_v3 = vmul.f32 %v3138_v20, %v4546_v10  ;;  %3151 = vtanh.f32 %v2012_v32  ;;  %v4575_v32 = vperm.slane %v2385_v21, 0 }
 0x422   : > { %v3142_v7 = vpop.eup %3141  ;;  %3153 = vtanh.f32 %v2061_v8  ;;  %v2268_v28 = vmul.f32 %v3140_v34, %v4443_v51  ;;  %v2346_v60 = vadd.f32 %v2345_v35, %v2267_v39 }
 0x423   : > { %v3144_v36 = vpop.eup %3143  ;;  %v2311_v18 = vadd.f32 %v2310_v59, %v2293_v3  ;;  %3155 = vtanh.f32 %v2015_v19  ;;  %v2271_v30 = vmul.f32 %v3142_v7, %v4449_v5 }
 0x424   : > { %v3146_v52 = vpop.eup %3145  ;;  %3157 = vtanh.f32 %v2064_v61  ;;  %v2272_v42 = vmul.f32 %v3144_v36, %v4449_v5  ;;  %v2367_v29 = vadd.f32 %v2366_v14, %v2268_v28 }
 0x425   : > { %v2312_v22 = vrot.slane %v2311_v18, 4  ;;  %v2294_v24 = vmul.f32 %v3146_v52, %v4546_v10  ;;  %v2019_v1 = vpop.f32.mrf.mxu2  ;;  %v3148_v41 = vpop.eup %3147  ;;  %3159 = vtanh.f32 %v2017_v46  ;;  %v2347_v31 = vadd.f32 %v2346_v60, %v2271_v30 }
 0x426   : > { %v2020_v25 = vadd.f32 %v2019_v1, %v4458_v47  ;;  %v2068_v40 = vpop.f32.mrf.mxu3  ;;  %v3150_v49 = vpop.eup %3149  ;;  %3161 = vtanh.f32 %v2066_v63  ;;  %v2275_v33 = vmul.f32 %v3148_v41, %v4467_v17  ;;  %v2368_v8 = vadd.f32 %v2367_v29, %v2272_v42 }
 0x427   : > { %v2313_v27 = vadd.f32 %v2312_v22, %v2311_v18  ;;  %v2332_v54 = vadd.f32 %v2331_v37, %v2294_v24  ;;  %v2069_v6 = vadd.f32 %v2068_v40, %v4458_v47  ;;  %v3152_v55 = vpop.eup %3151  ;;  %v2276_v57 = vmul.f32 %v3150_v49, %v4467_v17 }
 0x428   : > { %v3154_v23 = vpop.eup %3153  ;;  %3163 = vtanh.f32 %v2020_v25  ;;  %v2279_v62 = vmul.f32 %v3152_v55, %v4494_v0  ;;  %v2348_v34 = vadd.f32 %v2347_v31, %v2275_v33 }
 0x429   : > { %v2314_v16 = vrot.slane %v2313_v27, 2  ;;  %v2333_v58 = vrot.slane %v2332_v54, 4  ;;  %3165 = vtanh.f32 %v2069_v6  ;;  %v3156_v51 = vpop.eup %3155  ;;  %v2280_v45 = vmul.f32 %v3154_v23, %v4494_v0 }
 0x42a   : > { %v3158_v44 = vpop.eup %3157  ;;  %v2283_v7 = vmul.f32 %v3156_v51, %v4504_v9  ;;  %v2369_v36 = vadd.f32 %v2368_v8, %v2276_v57  ;;  %v2349_v12 = vadd.f32 %v2348_v34, %v2279_v62 }
 0x42b   : > { %v2315_v47 = vadd.f32 %v2314_v16, %v2313_v27  ;;  %v2334_v38 = vadd.f32 %v2333_v58, %v2332_v54  ;;  %v3160_v5 = vpop.eup %3159  ;;  %v2284_v61 = vmul.f32 %v3158_v44, %v4504_v9 }
 0x42c   : > { %v3162_v3 = vpop.eup %3161  ;;  %v2287_v43 = vmul.f32 %v3160_v5, %v4524_v48  ;;  %v2370_v56 = vadd.f32 %v2369_v36, %v2280_v45  ;;  %v2350_v37 = vadd.f32 %v2349_v12, %v2283_v7 }
 0x42d   : > { %v2316_v20 = vrot.slane %v2315_v47, 1  ;;  %v2335_v26 = vrot.slane %v2334_v38, 2  ;;  %v2021_v53 = vpop.f32.mrf.mxu2  ;;  %v2288_v46 = vmul.f32 %v3162_v3, %v4524_v48 }
 0x42e   : > { %v2022_v59 = vadd.f32 %v2021_v53, %v4487_v15  ;;  %v2070_v2 = vpop.f32.mrf.mxu3  ;;  %v3164_v19 = vpop.eup %3163  ;;  %v2371_v63 = vadd.f32 %v2370_v56, %v2284_v61  ;;  %v2351_v13 = vadd.f32 %v2350_v37, %v2287_v43 }
 0x42f   : > { %v2317_v17 = vadd.f32 %v2316_v20, %v2315_v47  ;;  %v2336_v11 = vadd.f32 %v2335_v26, %v2334_v38  ;;  %v2071_v4 = vadd.f32 %v2070_v2, %v4487_v15  ;;  %v3166_v18 = vpop.eup %3165  ;;  %v2291_v24 = vmul.f32 %v3164_v19, %v4532_v50 }
 0x430   : > { %3167 = vtanh.f32 %v2022_v59  ;;  %v2292_v9 = vmul.f32 %v3166_v18, %v4532_v50  ;;  %v2372_v25 = vadd.f32 %v2371_v63, %v2288_v46 }
 0x431   : > { %v4583_v52 = vadd.f32 %v4575_v32, %v2317_v17  ;;  %v2337_v0 = vrot.slane %v2336_v11, 1  ;;  %3169 = vtanh.f32 %v2071_v4  ;;  %v2352_v54 = vadd.f32 %v2351_v13, %v2291_v24 }
 0x432   : > { %v2373_v49 = vadd.f32 %v2372_v25, %v2292_v9 }
 0x433   : > { %v2396_v15 = vand.u32 2147483647, %v4583_v52  ;;  %v2338_v22 = vadd.f32 %v2337_v0, %v2336_v11 }
 0x435   : > { %v2400_v1 = vsub.f32 0.0, %v2396_v15  ;;  %v4591_v41 = vadd.f32 %v4575_v32, %v2338_v22 }
 0x436   : > { %v3168_v39 = vpop.eup %3167 }
 0x437   : > { %v3170_v40 = vpop.eup %3169  ;;  %v2404_v27 = vmul.f32 1.442695, %v2400_v1  ;;  %v2397_v48 = vand.u32 2147483647, %v4591_v41  ;;  %v2295_v6 = vmul.f32 %v3168_v39, %v4546_v10  ;;  %v2393_v18 = vmax.f32 %v4591_v41, 0.0 }
 0x438   : > { %v2296_v35 = vmul.f32 %v3170_v40, %v4546_v10 }
 0x439   : > { %3171 = vpow2.f32 %v2404_v27  ;;  %v2401_v28 = vsub.f32 0.0, %v2397_v48  ;;  %v2353_v50 = vadd.f32 %v2352_v54, %v2295_v6 }
 0x43a   : > { %v2374_v30 = vadd.f32 %v2373_v49, %v2296_v35 }
 0x43b   : > { %v2406_v55 = vmul.f32 1.442695, %v2401_v28  ;;  %v2354_v14 = vrot.slane %v2353_v50, 4 }
 0x43c   : > { %v2375_v16 = vrot.slane %v2374_v30, 4 }
 0x43d   : > { %3173 = vpow2.f32 %v2406_v55  ;;  %v2355_v58 = vadd.f32 %v2354_v14, %v2353_v50 }
 0x43e   : > { %v2376_v23 = vadd.f32 %v2375_v16, %v2374_v30  ;;  %v2466_v16 = vlaneseq }
 0x43f   : > { %v3172_v21 = vpop.eup %3171  ;;  %v2356_v60 = vrot.slane %v2355_v58, 2 }
 0x440   : > { %v2412_v42 = vadd.f32 1.0, %v3172_v21  ;;  %v2377_v33 = vrot.slane %v2376_v23, 2  ;;  %v2415_v10 = vmul.f32 -0.5, %v3172_v21  ;;  %v2418_v59 = vand.u32 2147483647, %v3172_v21 }
 0x441   : > { %v2357_v47 = vadd.f32 %v2356_v60, %v2355_v58  ;;  %vm2468_vm7 = vcmp.lt.s32.totalorder %v2466_v16, 512 }
 0x442   : > { %3175 = vlog2.f32 %v2412_v42  ;;  %v2378_v38 = vadd.f32 %v2377_v33, %v2376_v23  ;;  %v2416_v5 = vadd.f32 1.0, %v2415_v10  ;;  %vm2419_vm0 = vcmp.lt.f32.partialorder %v2418_v59, 0.0004427343 }
 0x443   : > { %v3174_v51 = vpop.eup %3173  ;;  %v2358_v29 = vrot.slane %v2357_v47, 1 }
 0x444   : > { %v2421_v31 = vadd.f32 1.0, %v3174_v51  ;;  %v2424_v57 = vmul.f32 -0.5, %v3174_v51  ;;  %v2379_v44 = vrot.slane %v2378_v38, 1  ;;  %v2427_v2 = vand.u32 2147483647, %v3174_v51 }
 0x445   : > { %v2359_v62 = vadd.f32 %v2358_v29, %v2357_v47  ;;  %v2417_v4 = vmul.f32 %v3172_v21, %v2416_v5 }
 0x446   : > { %3177 = vlog2.f32 %v2421_v31  ;;  %v2380_v26 = vadd.f32 %v2379_v44, %v2378_v38  ;;  %v2425_v8 = vadd.f32 1.0, %v2424_v57  ;;  %vm2428_vm1 = vcmp.lt.f32.partialorder %v2427_v2, 0.0004427343 }
 0x447   : > { %v2390_v20 = vadd.f32 %v4575_v32, %v2359_v62 }
 0x448   : > { %v3176_v53 = vpop.eup %3175  ;;  %v2391_v45 = vadd.f32 %v4575_v32, %v2380_v26  ;;  %v2426_v36 = vmul.f32 %v3174_v51, %v2425_v8  ;;  %v2392_v32 = vmax.f32 %v4583_v52, 0.0 }
 0x449   : > { %v2398_v34 = vand.u32 2147483647, %v2390_v20  ;;  %v2414_v3 = vmul.f32 0.6931472, %v3176_v53  ;;  %v2394_v49 = vmax.f32 %v2390_v20, 0.0 }
 0x44a   : > { %v2399_v17 = vand.u32 2147483647, %v2391_v45  ;;  %v2395_v55 = vmax.f32 %v2391_v45, 0.0 }
 0x44b   : > { %v2402_v7 = vsub.f32 0.0, %v2398_v34  ;;  %v2420_v0 = vsel %vm2419_vm0, %v2417_v4, %v2414_v3 }
 0x44c   : > { %v3178_v11 = vpop.eup %3177  ;;  %v2403_v61 = vsub.f32 0.0, %v2399_v17  ;;  %v2448_v37 = vadd.f32 %v2420_v0, %v2392_v32 }
 0x44d   : > { %v2423_v19 = vmul.f32 0.6931472, %v3178_v11  ;;  %v2408_v12 = vmul.f32 1.442695, %v2402_v7 }
 0x44e   : > { %v2410_v56 = vmul.f32 1.442695, %v2403_v61 }
 0x44f   : > { %v2429_v43 = vsel %vm2428_vm1, %v2426_v36, %v2423_v19  ;;  %3179 = vpow2.f32 %v2408_v12 }
 0x450   : > { %v2449_v46 = vadd.f32 %v2429_v43, %v2393_v18  ;;  %3181 = vpow2.f32 %v2410_v56 }
 0x452   : > { %v2456_v15 = vrot.slane %v2449_v46, 7 }
 0x454   : > { %v2460_v22 = vsel %vm2459_vm2, %v2448_v37, %v2456_v15 }
 0x455   : > { %v3180_v24 = vpop.eup %3179 }
 0x456   : > { %v2430_v63 = vadd.f32 1.0, %v3180_v24  ;;  %v3182_v9 = vpop.eup %3181  ;;  %v2433_v1 = vmul.f32 -0.5, %v3180_v24  ;;  %v2436_v25 = vand.u32 2147483647, %v3180_v24 }
 0x457   : > { %v2439_v13 = vadd.f32 1.0, %v3182_v9  ;;  %v2442_v41 = vmul.f32 -0.5, %v3182_v9  ;;  %v2445_v48 = vand.u32 2147483647, %v3182_v9 }
 0x458   : > { %3183 = vlog2.f32 %v2430_v63  ;;  %v2434_v39 = vadd.f32 1.0, %v2433_v1  ;;  %vm2437_vm3 = vcmp.lt.f32.partialorder %v2436_v25, 0.0004427343 }
 0x459   : > { %3185 = vlog2.f32 %v2439_v13  ;;  %v2443_v40 = vadd.f32 1.0, %v2442_v41  ;;  %vm2446_vm4 = vcmp.lt.f32.partialorder %v2445_v48, 0.0004427343 }
 0x45a   : > { %v2435_v54 = vmul.f32 %v3180_v24, %v2434_v39 }
 0x45b   : > { %v2444_v50 = vmul.f32 %v3182_v9, %v2443_v40 }
 0x45e   : > { %v3184_v27 = vpop.eup %3183 }
 0x45f   : > { %v2432_v52 = vmul.f32 0.6931472, %v3184_v27  ;;  %v3186_v6 = vpop.eup %3185 }
 0x460   : > { %v2441_v28 = vmul.f32 0.6931472, %v3186_v6 }
 0x461   : > { %v2438_v35 = vsel %vm2437_vm3, %v2435_v54, %v2432_v52 }
 0x462   : > { %v2450_v30 = vadd.f32 %v2438_v35, %v2394_v49  ;;  %v2447_v14 = vsel %vm2446_vm4, %v2444_v50, %v2441_v28 }
 0x463   : > { %v2451_v23 = vadd.f32 %v2447_v14, %v2395_v55 }
 0x464   : > { %v2457_v58 = vrot.slane %v2450_v30, 6 }
 0x465   : > { %v2458_v21 = vrot.slane %v2451_v23, 5 }
 0x467   : > { %v2462_v60 = vsel %vm2461_vm5, %v2457_v58, %v2458_v21 }
 0x468   : > { %v2464_v42 = vsel %vm2463_vm6, %v2460_v22, %v2462_v60 }
 0x469   : > { %2470 = vst.msk [vmem:[%s385_s13] sm:$0xf] %vm2468_vm7, %v2464_v42 }
 0x46a PF: > { %s23_s19 = sadd.s32 1, %s3193_s19  }
 0x46b   : > { %p20_p4 = scmp.ge.s32.totalorder %s23_s19, 4  }
 0x46d   :  { %22 = sbr.rel (!%p20_p4) target bundleno = 3 (0x3), region = 94 }

</bundles_post_ra>
